<compile_context>
chip_gen: v7x
topology: tpu7x:2x2x1
jax: 0.10.0
libtpu: 0.0.40
codegen_flags: <defaults>
</compile_context>

<pallas_src>
import functools
from math import sqrt

import jax
import jax.numpy as jnp
from jax.experimental import pallas as pl
from jax.experimental.pallas import tpu as pltpu

_CDT = jnp.bfloat16          # MXU input dtype (accumulation stays float32)


# ----------------------------------------------------------------------------
# Fused kernel: conv1(9x9)+ReLU -> conv2(1x1)+ReLU -> conv3(5x5)
# ----------------------------------------------------------------------------
def _srcnn1_fused_kernel(x_ref, t1_ref, b1_ref, w2_ref, b2_ref, t3_ref,
                         b3_ref, o_ref, z_ref, *, kh1, kh3, ho1, hout, zoff):
    x = x_ref[0]                                           # (Hp, Wp*Cin) bf16

    # ---- conv1: 9x9 via width-lowered Toeplitz dots (f32 accumulation) ----
    acc1 = jnp.dot(x[0:ho1, :], t1_ref[0],
                   preferred_element_type=jnp.float32)
    for i in range(1, kh1):
        acc1 = acc1 + jnp.dot(x[i:i + ho1, :], t1_ref[i],
                              preferred_element_type=jnp.float32)
    acc1 = jnp.maximum(acc1 + b1_ref[...], 0.0)            # (Ho1, Wo1*64)

    # ---- conv2: 1x1 (64->32) as one block-diagonal MXU dot + bias + ReLU ---
    acc2 = jnp.dot(acc1.astype(_CDT), w2_ref[...],
                   preferred_element_type=jnp.float32)
    acc2 = jnp.maximum(acc2 + b2_ref[...], 0.0)            # (Ho1, Wo1*32)

    # ---- stage conv3's interior input in VMEM with a zero row frame --------
    # (conv2 padding ring + conv3 zero padding are folded into b3_ref)
    z_ref[...] = jnp.zeros_like(z_ref)
    z_ref[zoff:zoff + ho1, :] = acc2.astype(z_ref.dtype)

    # ---- conv3: 5x5 via restricted Toeplitz dots over the interior ---------
    acc3 = jnp.dot(z_ref[0:hout, :], t3_ref[0],
                   preferred_element_type=jnp.float32)
    for p in range(1, kh3):
        acc3 = acc3 + jnp.dot(z_ref[p:p + hout, :], t3_ref[p],
                              preferred_element_type=jnp.float32)
    o_ref[0] = (acc3 + b3_ref[...]).astype(o_ref.dtype)


# ----------------------------------------------------------------------------
# Wrapper-side weight / bias lowering
# ----------------------------------------------------------------------------
def _lowered_weights(w_hwio, wp):
    """(KH,KW,Cin,Cout) -> (KH, Wp*Cin, Wo*Cout) block-Toeplitz over width:
    T[i, (wo+j)*Cin + ci, wo*Cout + co] = w[i, j, ci, co]."""
    kh, kw, cin, cout = w_hwio.shape
    wo = wp - kw + 1
    wk = w_hwio.reshape(kh, kw * cin, cout)
    t = jnp.zeros((kh, wp * cin, wo * cout), w_hwio.dtype)
    for o in range(wo):
        t = t.at[:, o * cin: o * cin + kw * cin,
                 o * cout: (o + 1) * cout].set(wk)
    return t


def _conv3_interior_weights(w3, w_out, wo1, zoff):
    """conv3 Toeplitz restricted to the nonzero interior columns of its input.
    T[p, (j-zoff)*C2 + c, s*C3 + co] = w3[p, j-s, c, co] for j in
    [zoff, zoff+wo1) and 0 <= j-s < KW3."""
    kh3, kw3, c2, c3 = w3.shape
    t = jnp.zeros((kh3, wo1 * c2, w_out * c3), w3.dtype)
    for s in range(w_out):
        for q in range(kw3):
            j = s + q
            if zoff <= j < zoff + wo1:
                t = t.at[:, (j - zoff) * c2:(j - zoff + 1) * c2,
                         s * c3:(s + 1) * c3].set(w3[:, q])
    return t


def _conv3_ring_bias(w3, b2, b3, h, w):
    """Per-position conv3 bias that also accounts for conv3 applied to
    conv2's padding ring (whose value is the constant relu(b2)) and conv3's
    own zero padding.  Returns (H, W*3) f32."""
    kh3, kw3, _, c3 = w3.shape
    m = jnp.zeros((h + kh3 - 1, w + kw3 - 1), jnp.float32)
    m = m.at[2:h + 2, 2:w + 2].set(1.0)   # conv2 output region inside conv3 pad
    m = m.at[4:h, 4:w].set(0.0)           # computed interior handled in-kernel
    wsum = jnp.einsum('pqcd,c->pqd', w3.astype(jnp.float32),
                      jnp.maximum(b2, 0.0).astype(jnp.float32))   # (5,5,3)
    ring = jnp.zeros((h, w, c3), jnp.float32)
    for p in range(kh3):
        for q in range(kw3):
            ring = ring + m[p:p + h, q:q + w, None] * wsum[p, q]
    return (ring + b3.astype(jnp.float32)).reshape(h, w * c3)


# ----------------------------------------------------------------------------
# SRCNN1 forward (matches the PyTorch module semantics)
# ----------------------------------------------------------------------------
def init_srcnn1_params(key):
    ks = jax.random.split(key, 6)

    def _init(kw_key, kb_key, kh, kwid, cin, cout):
        fan_in = kh * kwid * cin
        bound = 1.0 / sqrt(fan_in)
        w = jax.random.uniform(kw_key, (kh, kwid, cin, cout), jnp.float32,
                               minval=-bound, maxval=bound)
        b = jax.random.uniform(kb_key, (cout,), jnp.float32,
                               minval=-bound, maxval=bound)
        return w, b

    w1, b1 = _init(ks[0], ks[1], 9, 9, 3, 64)
    w2, b2 = _init(ks[2], ks[3], 1, 1, 64, 32)
    w3, b3 = _init(ks[4], ks[5], 5, 5, 32, 3)
    return (w1, b1), (w2, b2), (w3, b3)


@jax.jit
def srcnn1_forward(x_nchw, params):
    (w1, b1), (w2, b2), (w3, b3) = params
    n, cin, h, w = x_nchw.shape
    kh1, kw1, _, c1 = w1.shape               # 9, 9, 3, 64
    c2 = w2.shape[3]                         # 32
    kh3, kw3, _, c3 = w3.shape               # 5, 5, 32, 3

    hp, wp = h + 4, w + 4                    # conv1-padded spatial dims
    ho1, wo1 = hp - kh1 + 1, wp - kw1 + 1    # conv1/conv2 interior: H-4, W-4
    zoff = 4                                 # conv2 pad (2) + conv3 pad (2)
    zrows = h + kh3 - 1                      # rows of conv3's padded input

    # Padded NHWC input, each row laid out as Wp*Cin lanes, bf16 for the MXU.
    x = jnp.transpose(x_nchw, (0, 2, 3, 1))                     # NCHW -> NHWC
    xp = jnp.pad(x, ((0, 0), (2, 2), (2, 2), (0, 0)))
    xp = xp.reshape(n, hp, wp * cin).astype(_CDT)

    # VMEM-resident operands.
    t1 = _lowered_weights(w1, wp).astype(_CDT)                  # (9, Wp*3, Wo1*64)
    b1l = jnp.tile(b1, wo1)[None, :].astype(jnp.float32)        # (1, Wo1*64)
    w2bd = jnp.kron(jnp.eye(wo1, dtype=w2.dtype),
                    w2[0, 0]).astype(_CDT)                      # (Wo1*64, Wo1*32)
    b2l = jnp.tile(b2, wo1)[None, :].astype(jnp.float32)        # (1, Wo1*32)
    t3 = _conv3_interior_weights(w3, w, wo1, zoff).astype(_CDT) # (5, Wo1*32, W*3)
    b3f = _conv3_ring_bias(w3, b2, b3, h, w)                    # (H, W*3) f32

    flops = n * (2 * ho1 * (wp * cin) * (wo1 * c1) * kh1
                 + 2 * ho1 * (wo1 * c1) * (wo1 * c2)
                 + 2 * h * (wo1 * c2) * (w * c3) * kh3)
    bytes_accessed = (xp.size * 2 + (t1.size + w2bd.size + t3.size) * 2
                      + (b1l.size + b2l.size + b3f.size) * 4
                      + n * h * w * c3 * 4)

    kernel = functools.partial(_srcnn1_fused_kernel, kh1=kh1, kh3=kh3,
                               ho1=ho1, hout=h, zoff=zoff)

    out = pl.pallas_call(
        kernel,
        out_shape=jax.ShapeDtypeStruct((n, h, w * c3), jnp.float32),
        grid_spec=pltpu.PrefetchScalarGridSpec(
            num_scalar_prefetch=0,
            grid=(n,),
            in_specs=[
                pl.BlockSpec((1, hp, wp * cin), lambda i: (i, 0, 0)),
                pl.BlockSpec(t1.shape, lambda i: (0, 0, 0)),
                pl.BlockSpec(b1l.shape, lambda i: (0, 0)),
                pl.BlockSpec(w2bd.shape, lambda i: (0, 0)),
                pl.BlockSpec(b2l.shape, lambda i: (0, 0)),
                pl.BlockSpec(t3.shape, lambda i: (0, 0, 0)),
                pl.BlockSpec(b3f.shape, lambda i: (0, 0)),
            ],
            out_specs=pl.BlockSpec((1, h, w * c3), lambda i: (i, 0, 0)),
            scratch_shapes=[pltpu.VMEM((zrows, wo1 * c2), _CDT)],
        ),
        compiler_params=pltpu.CompilerParams(
            dimension_semantics=("parallel",),
            vmem_limit_bytes=32 * 1024 * 1024,
        ),
        cost_estimate=pl.CostEstimate(flops=flops, transcendentals=0,
                                      bytes_accessed=bytes_accessed),
    )(xp, t1, b1l, w2bd, b2l, t3, b3f)

    y = out.reshape(n, h, w, c3)
    return jnp.transpose(y, (0, 3, 1, 2))                       # NHWC -> NCHW


# ----------------------------------------------------------------------------
# Pure-JAX reference (lax.conv, f32) used only as a correctness check.
# ----------------------------------------------------------------------------
def _conv_ref(x_nhwc, w_hwio, b, pad, relu):
    dn = jax.lax.conv_dimension_numbers(x_nhwc.shape, w_hwio.shape,
                                        ("NHWC", "HWIO", "NHWC"))
    y = jax.lax.conv_general_dilated(
        x_nhwc, w_hwio, window_strides=(1, 1),
        padding=[(pad, pad), (pad, pad)], dimension_numbers=dn)
    y = y + b
    return jnp.maximum(y, 0.0) if relu else y


def srcnn1_reference(x_nchw, params):
    (w1, b1), (w2, b2), (w3, b3) = params
    x = jnp.transpose(x_nchw, (0, 2, 3, 1))
    x = _conv_ref(x, w1, b1, 2, True)
    x = _conv_ref(x, w2, b2, 2, True)
    x = _conv_ref(x, w3, b3, 2, False)
    return jnp.transpose(x, (0, 3, 1, 2))


if __name__ == "__main__":
    key = jax.random.PRNGKey(0)
    k_x, k_p = jax.random.split(key)

    # PyTorch input convention: NCHW, Cin = 3.
    x = jax.random.normal(k_x, (2, 3, 16, 16), jnp.float32)
    params = init_srcnn1_params(k_p)

    out = jax.block_until_ready(srcnn1_forward(x, params))
    assert out.shape == (2, 3, 16, 16), out.shape

    ref = jax.block_until_ready(srcnn1_reference(x, params))
    err = float(jnp.max(jnp.abs(out - ref)))
    # bf16 MXU inputs with f32 accumulation -> slightly looser tolerance.
    assert jnp.allclose(out, ref, rtol=3e-2, atol=3e-2), err

    print("KERNEL_OK")
</pallas_src>

<mosaic_0001>
module attributes {stable_mosaic.version = 11 : i64} {
  func.func @_srcnn1_fused_kernel(%arg0: i32, %arg1: memref<1x20x60xbf16, #tpu.memory_space<vmem>>, %arg2: memref<9x60x768xbf16, #tpu.memory_space<vmem>>, %arg3: memref<1x768xf32, #tpu.memory_space<vmem>>, %arg4: memref<768x384xbf16, #tpu.memory_space<vmem>>, %arg5: memref<1x384xf32, #tpu.memory_space<vmem>>, %arg6: memref<5x384x48xbf16, #tpu.memory_space<vmem>>, %arg7: memref<16x48xf32, #tpu.memory_space<vmem>>, %arg8: memref<1x16x48xf32, #tpu.memory_space<vmem>>, %arg9: memref<20x384xbf16, #tpu.memory_space<vmem>>) attributes {dimension_semantics = [#tpu.dimension_semantics<parallel>], iteration_bounds = array<i64: 2>, scalar_prefetch = 0 : i64, scratch_operands = 1 : i64, tpu.core_type = #tpu.core_type<tc>, window_params = [{transform_indices = @transform_0, window_bounds = array<i64: 1, 20, 60>}, {pipeline_mode = #tpu.pipeline_mode<synchronous>, transform_indices = @transform_1, window_bounds = array<i64: 9, 60, 768>}, {pipeline_mode = #tpu.pipeline_mode<synchronous>, transform_indices = @transform_2, window_bounds = array<i64: 1, 768>}, {pipeline_mode = #tpu.pipeline_mode<synchronous>, transform_indices = @transform_3, window_bounds = array<i64: 768, 384>}, {pipeline_mode = #tpu.pipeline_mode<synchronous>, transform_indices = @transform_4, window_bounds = array<i64: 1, 384>}, {pipeline_mode = #tpu.pipeline_mode<synchronous>, transform_indices = @transform_5, window_bounds = array<i64: 5, 384, 48>}, {pipeline_mode = #tpu.pipeline_mode<synchronous>, transform_indices = @transform_6, window_bounds = array<i64: 16, 48>}, {transform_indices = @transform_7, window_bounds = array<i64: 1, 16, 48>}]} {
    %c0 = arith.constant 0 : index
    %c0_0 = arith.constant 0 : index
    %c0_1 = arith.constant 0 : index
    %0 = vector.load %arg1[%c0, %c0_0, %c0_1] : memref<1x20x60xbf16, #tpu.memory_space<vmem>>, vector<1x20x60xbf16>
    %1 = vector.shape_cast %0 : vector<1x20x60xbf16> to vector<20x60xbf16>
    %2 = vector.extract_strided_slice %1 {offsets = [0, 0], sizes = [12, 60], strides = [1, 1]} : vector<20x60xbf16> to vector<12x60xbf16>
    %c0_2 = arith.constant 0 : index
    %c0_3 = arith.constant 0 : index
    %c0_4 = arith.constant 0 : index
    %3 = vector.load %arg2[%c0_2, %c0_3, %c0_4] : memref<9x60x768xbf16, #tpu.memory_space<vmem>>, vector<1x60x768xbf16>
    %4 = vector.shape_cast %3 : vector<1x60x768xbf16> to vector<60x768xbf16>
    %cst = arith.constant dense<0.000000e+00> : vector<12x768xf32>
    %5 = tpu.matmul %2, %4, %cst {dimension_numbers = #tpu.dot_dimension_numbers<[1], [0], [0], [1], [0, 0, 1, 1], [], []>} : vector<12x60xbf16>, vector<60x768xbf16>, vector<12x768xf32> -> vector<12x768xf32>
    %6 = vector.extract_strided_slice %1 {offsets = [1, 0], sizes = [12, 60], strides = [1, 1]} : vector<20x60xbf16> to vector<12x60xbf16>
    %c1 = arith.constant 1 : index
    %c0_5 = arith.constant 0 : index
    %c0_6 = arith.constant 0 : index
    %7 = vector.load %arg2[%c1, %c0_5, %c0_6] : memref<9x60x768xbf16, #tpu.memory_space<vmem>>, vector<1x60x768xbf16>
    %8 = vector.shape_cast %7 : vector<1x60x768xbf16> to vector<60x768xbf16>
    %cst_7 = arith.constant dense<0.000000e+00> : vector<12x768xf32>
    %9 = tpu.matmul %6, %8, %cst_7 {dimension_numbers = #tpu.dot_dimension_numbers<[1], [0], [0], [1], [0, 0, 1, 1], [], []>} : vector<12x60xbf16>, vector<60x768xbf16>, vector<12x768xf32> -> vector<12x768xf32>
    %10 = arith.addf %5, %9 : vector<12x768xf32>
    %11 = vector.extract_strided_slice %1 {offsets = [2, 0], sizes = [12, 60], strides = [1, 1]} : vector<20x60xbf16> to vector<12x60xbf16>
    %c2 = arith.constant 2 : index
    %c0_8 = arith.constant 0 : index
    %c0_9 = arith.constant 0 : index
    %12 = vector.load %arg2[%c2, %c0_8, %c0_9] : memref<9x60x768xbf16, #tpu.memory_space<vmem>>, vector<1x60x768xbf16>
    %13 = vector.shape_cast %12 : vector<1x60x768xbf16> to vector<60x768xbf16>
    %cst_10 = arith.constant dense<0.000000e+00> : vector<12x768xf32>
    %14 = tpu.matmul %11, %13, %cst_10 {dimension_numbers = #tpu.dot_dimension_numbers<[1], [0], [0], [1], [0, 0, 1, 1], [], []>} : vector<12x60xbf16>, vector<60x768xbf16>, vector<12x768xf32> -> vector<12x768xf32>
    %15 = arith.addf %10, %14 : vector<12x768xf32>
    %16 = vector.extract_strided_slice %1 {offsets = [3, 0], sizes = [12, 60], strides = [1, 1]} : vector<20x60xbf16> to vector<12x60xbf16>
    %c3 = arith.constant 3 : index
    %c0_11 = arith.constant 0 : index
    %c0_12 = arith.constant 0 : index
    %17 = vector.load %arg2[%c3, %c0_11, %c0_12] : memref<9x60x768xbf16, #tpu.memory_space<vmem>>, vector<1x60x768xbf16>
    %18 = vector.shape_cast %17 : vector<1x60x768xbf16> to vector<60x768xbf16>
    %cst_13 = arith.constant dense<0.000000e+00> : vector<12x768xf32>
    %19 = tpu.matmul %16, %18, %cst_13 {dimension_numbers = #tpu.dot_dimension_numbers<[1], [0], [0], [1], [0, 0, 1, 1], [], []>} : vector<12x60xbf16>, vector<60x768xbf16>, vector<12x768xf32> -> vector<12x768xf32>
    %20 = arith.addf %15, %19 : vector<12x768xf32>
    %21 = vector.extract_strided_slice %1 {offsets = [4, 0], sizes = [12, 60], strides = [1, 1]} : vector<20x60xbf16> to vector<12x60xbf16>
    %c4 = arith.constant 4 : index
    %c0_14 = arith.constant 0 : index
    %c0_15 = arith.constant 0 : index
    %22 = vector.load %arg2[%c4, %c0_14, %c0_15] : memref<9x60x768xbf16, #tpu.memory_space<vmem>>, vector<1x60x768xbf16>
    %23 = vector.shape_cast %22 : vector<1x60x768xbf16> to vector<60x768xbf16>
    %cst_16 = arith.constant dense<0.000000e+00> : vector<12x768xf32>
    %24 = tpu.matmul %21, %23, %cst_16 {dimension_numbers = #tpu.dot_dimension_numbers<[1], [0], [0], [1], [0, 0, 1, 1], [], []>} : vector<12x60xbf16>, vector<60x768xbf16>, vector<12x768xf32> -> vector<12x768xf32>
    %25 = arith.addf %20, %24 : vector<12x768xf32>
    %26 = vector.extract_strided_slice %1 {offsets = [5, 0], sizes = [12, 60], strides = [1, 1]} : vector<20x60xbf16> to vector<12x60xbf16>
    %c5 = arith.constant 5 : index
    %c0_17 = arith.constant 0 : index
    %c0_18 = arith.constant 0 : index
    %27 = vector.load %arg2[%c5, %c0_17, %c0_18] : memref<9x60x768xbf16, #tpu.memory_space<vmem>>, vector<1x60x768xbf16>
    %28 = vector.shape_cast %27 : vector<1x60x768xbf16> to vector<60x768xbf16>
    %cst_19 = arith.constant dense<0.000000e+00> : vector<12x768xf32>
    %29 = tpu.matmul %26, %28, %cst_19 {dimension_numbers = #tpu.dot_dimension_numbers<[1], [0], [0], [1], [0, 0, 1, 1], [], []>} : vector<12x60xbf16>, vector<60x768xbf16>, vector<12x768xf32> -> vector<12x768xf32>
    %30 = arith.addf %25, %29 : vector<12x768xf32>
    %31 = vector.extract_strided_slice %1 {offsets = [6, 0], sizes = [12, 60], strides = [1, 1]} : vector<20x60xbf16> to vector<12x60xbf16>
    %c6 = arith.constant 6 : index
    %c0_20 = arith.constant 0 : index
    %c0_21 = arith.constant 0 : index
    %32 = vector.load %arg2[%c6, %c0_20, %c0_21] : memref<9x60x768xbf16, #tpu.memory_space<vmem>>, vector<1x60x768xbf16>
    %33 = vector.shape_cast %32 : vector<1x60x768xbf16> to vector<60x768xbf16>
    %cst_22 = arith.constant dense<0.000000e+00> : vector<12x768xf32>
    %34 = tpu.matmul %31, %33, %cst_22 {dimension_numbers = #tpu.dot_dimension_numbers<[1], [0], [0], [1], [0, 0, 1, 1], [], []>} : vector<12x60xbf16>, vector<60x768xbf16>, vector<12x768xf32> -> vector<12x768xf32>
    %35 = arith.addf %30, %34 : vector<12x768xf32>
    %36 = vector.extract_strided_slice %1 {offsets = [7, 0], sizes = [12, 60], strides = [1, 1]} : vector<20x60xbf16> to vector<12x60xbf16>
    %c7 = arith.constant 7 : index
    %c0_23 = arith.constant 0 : index
    %c0_24 = arith.constant 0 : index
    %37 = vector.load %arg2[%c7, %c0_23, %c0_24] : memref<9x60x768xbf16, #tpu.memory_space<vmem>>, vector<1x60x768xbf16>
    %38 = vector.shape_cast %37 : vector<1x60x768xbf16> to vector<60x768xbf16>
    %cst_25 = arith.constant dense<0.000000e+00> : vector<12x768xf32>
    %39 = tpu.matmul %36, %38, %cst_25 {dimension_numbers = #tpu.dot_dimension_numbers<[1], [0], [0], [1], [0, 0, 1, 1], [], []>} : vector<12x60xbf16>, vector<60x768xbf16>, vector<12x768xf32> -> vector<12x768xf32>
    %40 = arith.addf %35, %39 : vector<12x768xf32>
    %41 = vector.extract_strided_slice %1 {offsets = [8, 0], sizes = [12, 60], strides = [1, 1]} : vector<20x60xbf16> to vector<12x60xbf16>
    %c8 = arith.constant 8 : index
    %c0_26 = arith.constant 0 : index
    %c0_27 = arith.constant 0 : index
    %42 = vector.load %arg2[%c8, %c0_26, %c0_27] : memref<9x60x768xbf16, #tpu.memory_space<vmem>>, vector<1x60x768xbf16>
    %43 = vector.shape_cast %42 : vector<1x60x768xbf16> to vector<60x768xbf16>
    %cst_28 = arith.constant dense<0.000000e+00> : vector<12x768xf32>
    %44 = tpu.matmul %41, %43, %cst_28 {dimension_numbers = #tpu.dot_dimension_numbers<[1], [0], [0], [1], [0, 0, 1, 1], [], []>} : vector<12x60xbf16>, vector<60x768xbf16>, vector<12x768xf32> -> vector<12x768xf32>
    %45 = arith.addf %40, %44 : vector<12x768xf32>
    %c0_29 = arith.constant 0 : index
    %c0_30 = arith.constant 0 : index
    %46 = vector.load %arg3[%c0_29, %c0_30] : memref<1x768xf32, #tpu.memory_space<vmem>>, vector<1x768xf32>
    %47 = vector.broadcast %46 : vector<1x768xf32> to vector<12x768xf32>
    %48 = arith.addf %45, %47 : vector<12x768xf32>
    %cst_31 = arith.constant 0.000000e+00 : f32
    %49 = vector.broadcast %cst_31 : f32 to vector<12x768xf32>
    %50 = arith.maximumf %48, %49 : vector<12x768xf32>
    %51 = arith.truncf %50 : vector<12x768xf32> to vector<12x768xbf16>
    %c0_32 = arith.constant 0 : index
    %c0_33 = arith.constant 0 : index
    %52 = vector.load %arg4[%c0_32, %c0_33] : memref<768x384xbf16, #tpu.memory_space<vmem>>, vector<768x384xbf16>
    %cst_34 = arith.constant dense<0.000000e+00> : vector<12x384xf32>
    %53 = tpu.matmul %51, %52, %cst_34 {dimension_numbers = #tpu.dot_dimension_numbers<[1], [0], [0], [1], [0, 0, 1, 1], [], []>} : vector<12x768xbf16>, vector<768x384xbf16>, vector<12x384xf32> -> vector<12x384xf32>
    %c0_35 = arith.constant 0 : index
    %c0_36 = arith.constant 0 : index
    %54 = vector.load %arg5[%c0_35, %c0_36] : memref<1x384xf32, #tpu.memory_space<vmem>>, vector<1x384xf32>
    %55 = vector.broadcast %54 : vector<1x384xf32> to vector<12x384xf32>
    %56 = arith.addf %53, %55 : vector<12x384xf32>
    %cst_37 = arith.constant 0.000000e+00 : f32
    %57 = vector.broadcast %cst_37 : f32 to vector<12x384xf32>
    %58 = arith.maximumf %56, %57 : vector<12x384xf32>
    %cst_38 = arith.constant 0.000000e+00 : bf16
    %59 = vector.broadcast %cst_38 : bf16 to vector<20x384xbf16>
    %c0_39 = arith.constant 0 : index
    %c0_40 = arith.constant 0 : index
    %60 = vector.load %arg9[%c0_39, %c0_40] : memref<20x384xbf16, #tpu.memory_space<vmem>>, vector<20x384xbf16>
    tpu.vector_store %arg9[%c0_39, %c0_40], %59 {strides = array<i32>} : memref<20x384xbf16, #tpu.memory_space<vmem>>, vector<20x384xbf16>,
    %61 = arith.truncf %58 : vector<12x384xf32> to vector<12x384xbf16>
    %c4_41 = arith.constant 4 : index
    %c0_42 = arith.constant 0 : index
    %62 = vector.load %arg9[%c4_41, %c0_42] : memref<20x384xbf16, #tpu.memory_space<vmem>>, vector<12x384xbf16>
    tpu.vector_store %arg9[%c4_41, %c0_42], %61 {strides = array<i32>} : memref<20x384xbf16, #tpu.memory_space<vmem>>, vector<12x384xbf16>,
    %c0_43 = arith.constant 0 : index
    %c0_44 = arith.constant 0 : index
    %63 = vector.load %arg9[%c0_43, %c0_44] : memref<20x384xbf16, #tpu.memory_space<vmem>>, vector<16x384xbf16>
    %c0_45 = arith.constant 0 : index
    %c0_46 = arith.constant 0 : index
    %c0_47 = arith.constant 0 : index
    %64 = vector.load %arg6[%c0_45, %c0_46, %c0_47] : memref<5x384x48xbf16, #tpu.memory_space<vmem>>, vector<1x384x48xbf16>
    %65 = vector.shape_cast %64 : vector<1x384x48xbf16> to vector<384x48xbf16>
    %cst_48 = arith.constant dense<0.000000e+00> : vector<16x48xf32>
    %66 = tpu.matmul %63, %65, %cst_48 {dimension_numbers = #tpu.dot_dimension_numbers<[1], [0], [0], [1], [0, 0, 1, 1], [], []>} : vector<16x384xbf16>, vector<384x48xbf16>, vector<16x48xf32> -> vector<16x48xf32>
    %c1_49 = arith.constant 1 : index
    %c0_50 = arith.constant 0 : index
    %67 = vector.load %arg9[%c1_49, %c0_50] : memref<20x384xbf16, #tpu.memory_space<vmem>>, vector<16x384xbf16>
    %c1_51 = arith.constant 1 : index
    %c0_52 = arith.constant 0 : index
    %c0_53 = arith.constant 0 : index
    %68 = vector.load %arg6[%c1_51, %c0_52, %c0_53] : memref<5x384x48xbf16, #tpu.memory_space<vmem>>, vector<1x384x48xbf16>
    %69 = vector.shape_cast %68 : vector<1x384x48xbf16> to vector<384x48xbf16>
    %cst_54 = arith.constant dense<0.000000e+00> : vector<16x48xf32>
    %70 = tpu.matmul %67, %69, %cst_54 {dimension_numbers = #tpu.dot_dimension_numbers<[1], [0], [0], [1], [0, 0, 1, 1], [], []>} : vector<16x384xbf16>, vector<384x48xbf16>, vector<16x48xf32> -> vector<16x48xf32>
    %71 = arith.addf %66, %70 : vector<16x48xf32>
    %c2_55 = arith.constant 2 : index
    %c0_56 = arith.constant 0 : index
    %72 = vector.load %arg9[%c2_55, %c0_56] : memref<20x384xbf16, #tpu.memory_space<vmem>>, vector<16x384xbf16>
    %c2_57 = arith.constant 2 : index
    %c0_58 = arith.constant 0 : index
    %c0_59 = arith.constant 0 : index
    %73 = vector.load %arg6[%c2_57, %c0_58, %c0_59] : memref<5x384x48xbf16, #tpu.memory_space<vmem>>, vector<1x384x48xbf16>
    %74 = vector.shape_cast %73 : vector<1x384x48xbf16> to vector<384x48xbf16>
    %cst_60 = arith.constant dense<0.000000e+00> : vector<16x48xf32>
    %75 = tpu.matmul %72, %74, %cst_60 {dimension_numbers = #tpu.dot_dimension_numbers<[1], [0], [0], [1], [0, 0, 1, 1], [], []>} : vector<16x384xbf16>, vector<384x48xbf16>, vector<16x48xf32> -> vector<16x48xf32>
    %76 = arith.addf %71, %75 : vector<16x48xf32>
    %c3_61 = arith.constant 3 : index
    %c0_62 = arith.constant 0 : index
    %77 = vector.load %arg9[%c3_61, %c0_62] : memref<20x384xbf16, #tpu.memory_space<vmem>>, vector<16x384xbf16>
    %c3_63 = arith.constant 3 : index
    %c0_64 = arith.constant 0 : index
    %c0_65 = arith.constant 0 : index
    %78 = vector.load %arg6[%c3_63, %c0_64, %c0_65] : memref<5x384x48xbf16, #tpu.memory_space<vmem>>, vector<1x384x48xbf16>
    %79 = vector.shape_cast %78 : vector<1x384x48xbf16> to vector<384x48xbf16>
    %cst_66 = arith.constant dense<0.000000e+00> : vector<16x48xf32>
    %80 = tpu.matmul %77, %79, %cst_66 {dimension_numbers = #tpu.dot_dimension_numbers<[1], [0], [0], [1], [0, 0, 1, 1], [], []>} : vector<16x384xbf16>, vector<384x48xbf16>, vector<16x48xf32> -> vector<16x48xf32>
    %81 = arith.addf %76, %80 : vector<16x48xf32>
    %c4_67 = arith.constant 4 : index
    %c0_68 = arith.constant 0 : index
    %82 = vector.load %arg9[%c4_67, %c0_68] : memref<20x384xbf16, #tpu.memory_space<vmem>>, vector<16x384xbf16>
    %c4_69 = arith.constant 4 : index
    %c0_70 = arith.constant 0 : index
    %c0_71 = arith.constant 0 : index
    %83 = vector.load %arg6[%c4_69, %c0_70, %c0_71] : memref<5x384x48xbf16, #tpu.memory_space<vmem>>, vector<1x384x48xbf16>
    %84 = vector.shape_cast %83 : vector<1x384x48xbf16> to vector<384x48xbf16>
    %cst_72 = arith.constant dense<0.000000e+00> : vector<16x48xf32>
    %85 = tpu.matmul %82, %84, %cst_72 {dimension_numbers = #tpu.dot_dimension_numbers<[1], [0], [0], [1], [0, 0, 1, 1], [], []>} : vector<16x384xbf16>, vector<384x48xbf16>, vector<16x48xf32> -> vector<16x48xf32>
    %86 = arith.addf %81, %85 : vector<16x48xf32>
    %c0_73 = arith.constant 0 : index
    %c0_74 = arith.constant 0 : index
    %87 = vector.load %arg7[%c0_73, %c0_74] : memref<16x48xf32, #tpu.memory_space<vmem>>, vector<16x48xf32>
    %88 = arith.addf %86, %87 : vector<16x48xf32>
    %c0_75 = arith.constant 0 : index
    %c0_76 = arith.constant 0 : index
    %c0_77 = arith.constant 0 : index
    %89 = vector.load %arg8[%c0_75, %c0_76, %c0_77] : memref<1x16x48xf32, #tpu.memory_space<vmem>>, vector<1x16x48xf32>
    %90 = vector.shape_cast %89 : vector<1x16x48xf32> to vector<16x48xf32>
    %91 = vector.shape_cast %88 : vector<16x48xf32> to vector<1x16x48xf32>
    tpu.vector_store %arg8[%c0_75, %c0_76, %c0_77], %91 {strides = array<i32>} : memref<1x16x48xf32, #tpu.memory_space<vmem>>, vector<1x16x48xf32>,
    return
  }
  func.func @transform_0(%arg0: i32) -> (i32, i32, i32) {
    %c0_i32 = arith.constant 0 : i32
    %c0_i32_0 = arith.constant 0 : i32
    %c0_i32_1 = arith.constant 0 : i32
    return %arg0, %c0_i32, %c0_i32_0 : i32, i32, i32
  }
  func.func @transform_1(%arg0: i32) -> (i32, i32, i32) {
    %c0_i32 = arith.constant 0 : i32
    %c0_i32_0 = arith.constant 0 : i32
    %c0_i32_1 = arith.constant 0 : i32
    %c0_i32_2 = arith.constant 0 : i32
    return %c0_i32, %c0_i32_0, %c0_i32_1 : i32, i32, i32
  }
  func.func @transform_2(%arg0: i32) -> (i32, i32) {
    %c0_i32 = arith.constant 0 : i32
    %c0_i32_0 = arith.constant 0 : i32
    %c0_i32_1 = arith.constant 0 : i32
    return %c0_i32, %c0_i32_0 : i32, i32
  }
  func.func @transform_3(%arg0: i32) -> (i32, i32) {
    %c0_i32 = arith.constant 0 : i32
    %c0_i32_0 = arith.constant 0 : i32
    %c0_i32_1 = arith.constant 0 : i32
    return %c0_i32, %c0_i32_0 : i32, i32
  }
  func.func @transform_4(%arg0: i32) -> (i32, i32) {
    %c0_i32 = arith.constant 0 : i32
    %c0_i32_0 = arith.constant 0 : i32
    %c0_i32_1 = arith.constant 0 : i32
    return %c0_i32, %c0_i32_0 : i32, i32
  }
  func.func @transform_5(%arg0: i32) -> (i32, i32, i32) {
    %c0_i32 = arith.constant 0 : i32
    %c0_i32_0 = arith.constant 0 : i32
    %c0_i32_1 = arith.constant 0 : i32
    %c0_i32_2 = arith.constant 0 : i32
    return %c0_i32, %c0_i32_0, %c0_i32_1 : i32, i32, i32
  }
  func.func @transform_6(%arg0: i32) -> (i32, i32) {
    %c0_i32 = arith.constant 0 : i32
    %c0_i32_0 = arith.constant 0 : i32
    %c0_i32_1 = arith.constant 0 : i32
    return %c0_i32, %c0_i32_0 : i32, i32
  }
  func.func @transform_7(%arg0: i32) -> (i32, i32, i32) {
    %c0_i32 = arith.constant 0 : i32
    %c0_i32_0 = arith.constant 0 : i32
    %c0_i32_1 = arith.constant 0 : i32
    return %arg0, %c0_i32, %c0_i32_0 : i32, i32, i32
  }
}

</mosaic_0001>

<bundles_post_ra>
// kernel: tile.13
= control target key start
LH: loop header
LB: loop body
LE: loop exit
PB: predicated region body
PF: predicated region fallthrough
CT: control target
= control target key end

     0   :  { %s28_s0 = inlined_call_operand.vmem [shape: f32[64], index: 0, kind: input, shape index: {}]   ;;  %s29_s1 = inlined_call_operand.vmem [shape: f32[12,64], index: 1, kind: output, shape index: {}]  }
   0x1   :  { %v4_v0 = vld [vmem:[%s28_s0] ss:$0 sm:$0xff] }
   0x2   :  { %5 = vst [vmem:[%s29_s1] sm:$0xff] %v4_v0  ;;  %8 = vst [vmem:[%s29_s1 + $0x8] sm:$0xff] %v4_v0 }

// kernel: tile.14
= control target key start
LH: loop header
LB: loop body
LE: loop exit
PB: predicated region body
PF: predicated region fallthrough
CT: control target
= control target key end

     0   :  { %vm3_vm0 = vcmask 523264   ;;  %s59_s8 = smov 64   ;;  %vm10_vm1 = vcmask 1048064   ;;  %s94_s0 = inlined_call_operand.vmem [shape: f32[12,64], index: 0, kind: input, shape index: {}]   ;;  %s95_s1 = inlined_call_operand.vmem [shape: f32[1,768], index: 1, kind: output, shape index: {}]  }
   0x1   :  { %v52_v0 = vld [vmem:[%s94_s0 + $0x1] ss:$2 sm:$0x3f]   ;;  %v2_v1 = vld [vmem:[%s94_s0] ss:$2 sm:$0x3f]  }
   0x2   :  { %8 = vrot.lane.b32.xlu0 %v52_v0, %s59_s8  ;;  %4 = vst.msk [vmem:[#allocation0] ss:$8 sm:$0xf] %vm3_vm0, %v2_v1   ;;  %5 = vst.msk [vmem:[#allocation0] ss:$8 sm:$0x30] %vm3_vm0, %v2_v1  }
  0x74   :  { %v9_v2 = vpop.permute.xlu0 %8  }
  0x75   :  { %11 = vst.msk [vmem:[#allocation0] ss:$8 sm:$0xf] %vm10_vm1, %v9_v2   ;;  %12 = vst.msk [vmem:[#allocation0] ss:$8 sm:$0x30] %vm10_vm1, %v9_v2  }
  0x7c   :  { %v16_v3 = vld [vmem:[#allocation0] sm:$0x1]  ;;  %v20_v4 = vld [vmem:[#allocation0 + $0x8] sm:$0x1]  ;;  %v25_v5 = vld [vmem:[#allocation0 + $0x10] sm:$0x1] }
  0x7d   :  { %18 = vst [vmem:[%s95_s1] sm:$0x1] %v16_v3  ;;  %53 = vst [vmem:[%s95_s1 + $0x1] sm:$0x1] %v20_v4  ;;  %v31_v6 = vld [vmem:[#allocation0 + $0x18] sm:$0x1] }
  0x7e   :  { %54 = vst [vmem:[%s95_s1 + $0x2] sm:$0x1] %v25_v5  ;;  %v37_v7 = vld [vmem:[#allocation0 + $0x20] sm:$0x1]  ;;  %v43_v8 = vld [vmem:[#allocation0 + $0x28] sm:$0x1] }
  0x7f   :  { %55 = vst [vmem:[%s95_s1 + $0x3] sm:$0x1] %v31_v6  ;;  %56 = vst [vmem:[%s95_s1 + $0x4] sm:$0x1] %v37_v7 }
  0x80   :  { %57 = vst [vmem:[%s95_s1 + $0x5] sm:$0x1] %v43_v8 }

// kernel: tile.18
= control target key start
LH: loop header
LB: loop body
LE: loop exit
PB: predicated region body
PF: predicated region fallthrough
CT: control target
= control target key end

     0   :  { %s28_s0 = inlined_call_operand.vmem [shape: f32[32], index: 0, kind: input, shape index: {}]   ;;  %s29_s1 = inlined_call_operand.vmem [shape: f32[12,32], index: 1, kind: output, shape index: {}]  }
   0x1   :  { %v4_v0 = vld [vmem:[%s28_s0] ss:$0 sm:$0xff] }
   0x2   :  { %5 = vst [vmem:[%s29_s1] sm:$0xff] %v4_v0  ;;  %8 = vst [vmem:[%s29_s1 + $0x8] sm:$0xff] %v4_v0 }

// kernel: tile.19
= control target key start
LH: loop header
LB: loop body
LE: loop exit
PB: predicated region body
PF: predicated region fallthrough
CT: control target
= control target key end

     0   :  { %s49_s8 = smov 96   ;;  %vm3_vm0 = vcmask 261120   ;;  %s51_s15 = smov 64   ;;  %vm9_vm1 = vcmask 1048320   ;;  %vm15_vm2 = vcmask 785920   ;;  %vm21_vm3 = vcmask 523520   ;;  %s83_s0 = inlined_call_operand.vmem [shape: f32[12,32], index: 0, kind: input, shape index: {}]   ;;  %s84_s1 = inlined_call_operand.vmem [shape: f32[1,384], index: 1, kind: output, shape index: {}]  }
   0x1   :  { %v41_v0 = vld [vmem:[%s83_s0 + $0x3] ss:$4 sm:$0x7]   ;;  %v42_v1 = vld [vmem:[%s83_s0 + $0x2] ss:$4 sm:$0x7]  }
   0x2   :  { %7 = vrot.lane.b32.xlu0 %v41_v0, %s49_s8  ;;  %v43_v2 = vld [vmem:[%s83_s0 + $0x1] ss:$4 sm:$0x7]   ;;  %v2_v3 = vld [vmem:[%s83_s0] ss:$4 sm:$0x7]  }
   0x3   :  { %s50_s0 = smov 32   ;;  %4 = vst.msk [vmem:[#allocation0] ss:$8 sm:$0x7] %vm3_vm0, %v2_v3  }
   0x4   :  { %19 = vrot.lane.b32.xlu1 %v43_v2, %s50_s0 }
   0x6   :  { %13 = vrot.lane.b32.xlu0 %v42_v1, %s51_s15 }
  0x74   :  { %v8_v4 = vpop.permute.xlu0 %7  }
  0x75   :  { %10 = vst.msk [vmem:[#allocation0] ss:$8 sm:$0x7] %vm9_vm1, %v8_v4  }
  0x76   :  { %v20_v5 = vpop.permute.xlu1 %19  }
  0x78   :  { %v14_v6 = vpop.permute.xlu0 %13  }
  0x79   :  { %16 = vst.msk [vmem:[#allocation0] ss:$8 sm:$0x7] %vm15_vm2, %v14_v6  }
  0x7a   :  { %22 = vst.msk [vmem:[#allocation0] ss:$8 sm:$0x7] %vm21_vm3, %v20_v5  }
  0x81   :  { %v26_v7 = vld [vmem:[#allocation0] sm:$0x1]  ;;  %v30_v8 = vld [vmem:[#allocation0 + $0x8] sm:$0x1]  ;;  %v35_v9 = vld [vmem:[#allocation0 + $0x10] sm:$0x1] }
  0x82   :  { %28 = vst [vmem:[%s84_s1] sm:$0x1] %v26_v7  ;;  %44 = vst [vmem:[%s84_s1 + $0x1] sm:$0x1] %v30_v8 }
  0x83   :  { %45 = vst [vmem:[%s84_s1 + $0x2] sm:$0x1] %v35_v9 }

// kernel: srcnn1_forward.1
= control target key start
LH: loop header
LB: loop body
LE: loop exit
PB: predicated region body
PF: predicated region fallthrough
CT: control target
= control target key end

     0   :  { %s8071_s24 = smov 0   ;;  %s9923_s0 = inlined_call_operand.vmem [shape: bf16[2,20,60], index: 0, kind: input, shape index: {}]   ;;  %s9924_s1 = inlined_call_operand.vmem [shape: bf16[9,60,768], index: 1, kind: input, shape index: {}]   ;;  %s9925_s2 = inlined_call_operand.vmem [shape: f32[1,768], index: 2, kind: input, shape index: {}]   ;;  %s9926_s3 = inlined_call_operand.vmem [shape: bf16[768,384], index: 3, kind: input, shape index: {}]   ;;  %s9927_s4 = inlined_call_operand.vmem [shape: f32[1,384], index: 4, kind: input, shape index: {}]   ;;  %s9928_s5 = inlined_call_operand.vmem [shape: bf16[5,384,48], index: 5, kind: input, shape index: {}]   ;;  %s9929_s6 = inlined_call_operand.vmem [shape: f32[16,48], index: 6, kind: input, shape index: {}]   ;;  %s9930_s7 = inlined_call_operand.vmem [shape: f32[2,16,48], index: 7, kind: output, shape index: {}]  }
   0x1 LB: > { %s5973_s25 = sadd.s32 4294967295, %s8026_s24   ;;  %p5977_p0 = scmp.ge.s32.totalorder %s8026_s24, 1  ;;  %s8026_s24 = sphi %s8071_s24, %s17_s24  }
   0x2   : > { %p237_p1 = scmp.lt.s32.totalorder %s8026_s24, 3 }
   0x4   : > { %p238_p2 = pnand %p5977_p0, %p237_p1 }
   0x5   : > { %v7369_v0 = vld [vmem:[%s9924_s1 + $0xc4] ss:$24 sps:$4 sm:$0xff] (!%p238_p2)   ;;  %v7371_v1 = vld [vmem:[%s9924_s1 + $0xc0] ss:$24 sps:$4 sm:$0xff] (!%p238_p2)   ;;  %v8028_v2 = vmov (!%p238_p2), 0   ;;  %p269_p3 = scmp.lt.s32.totalorder (!%p238_p2), %s5973_s25, 1 }
   0x6   : > { %241 = sbr.rel (%p238_p2) target bundleno = 1256 (0x4e8), region = 48  ;;  %513 = vmatprep.mubr.bf16.mxu0 (!%p238_p2), %v8028_v2  ;;  %4309 = vst [vmem:[#allocation2] sm:$0xff] (!%p238_p2), %v8028_v2  ;;  %4310 = vst [vmem:[#allocation2 + $0x8] sm:$0xf] (!%p238_p2), %v8028_v2  ;;  %556 = vmatprep.mubr.bf16.mxu1 (!%p238_p2), %v8028_v2  ;;  %v7372_v3 = vld [vmem:[%s9924_s1 + $0xf4] ss:$24 sps:$4 sm:$0xff] (!%p238_p2)  }
   0x7   : > { %4312 = vst [vmem:[#allocation2 + $0x14] sm:$0xf] (!%p238_p2), %v8028_v2  ;;  %4313 = vst [vmem:[#allocation2 + $0x18] sm:$0x33] (!%p238_p2), %v8028_v2  ;;  %481 = vmatprep.subr.bf16.mxu0 (!%p238_p2), %v7369_v0  ;;  %v7374_v4 = vld [vmem:[%s9924_s1 + $0xf0] ss:$24 sps:$4 sm:$0xff] (!%p238_p2)  }
   0x8   : > { %4314 = vst [vmem:[#allocation2 + $0x20] sm:$0x3] (!%p238_p2), %v8028_v2  ;;  %482 = vmatpush1.bf16.msra.mxu0 (!%p238_p2), %v7371_v1  ;;  %v7375_v5 = vld [vmem:[%s9924_s1 + $0x124] ss:$24 sps:$4 sm:$0xff] (!%p238_p2)   ;;  %v7377_v7 = vld [vmem:[%s9924_s1 + $0x120] ss:$24 sps:$4 sm:$0xff] (!%p238_p2)  }
   0x9   : > { %483 = vmatprep.subr.bf16.mxu0 (!%p238_p2), %v7372_v3  ;;  %v7378_v6 = vld [vmem:[%s9924_s1 + $0x154] ss:$24 sps:$4 sm:$0x3f] (!%p238_p2)   ;;  %v7380_v8 = vld [vmem:[%s9924_s1 + $0x150] ss:$24 sps:$4 sm:$0x3f] (!%p238_p2)  }
   0xa   : > { %vm462_vm0 = vcmask (!%p238_p2), 1045504   ;;  %v7383_v15 = vld [vmem:[%s9924_s1 + $0xd4] ss:$24 sps:$4 sm:$0xff] (!%p238_p2)   ;;  %v7381_v19 = vld [vmem:[%s9924_s1 + $0xd0] ss:$24 sps:$4 sm:$0xff] (!%p238_p2)   ;;  %vm458_vm1 = vcmask (!%p238_p2), 490496  }
   0xb   : > { %v464_v14 = vsel (!%p238_p2), %vm462_vm0, %v7380_v8, 0  ;;  %v7387_v21 = vld [vmem:[%s9924_s1 + $0x104] ss:$24 sps:$4 sm:$0xff] (!%p238_p2)   ;;  %v7385_v23 = vld [vmem:[%s9924_s1 + $0x100] ss:$24 sps:$4 sm:$0xff] (!%p238_p2)   ;;  %vm2119_vm3 = vcmask (!%p238_p2), 1044480  }
   0xc   : > { %484 = vmatpush1.bf16.msra.mxu0 (!%p238_p2), %v7374_v4  ;;  %v7390_v24 = vld [vmem:[%s9924_s1 + $0x134] ss:$24 sps:$4 sm:$0xff] (!%p238_p2)   ;;  %v7388_v25 = vld [vmem:[%s9924_s1 + $0x130] ss:$24 sps:$4 sm:$0xff] (!%p238_p2)   ;;  %v7396_v32 = vld [vmem:[%s9924_s1 + $0x4] ss:$24 sps:$4 sm:$0xff] (!%p238_p2)  }
   0xd   : > { %s9934_s25 = smov (!%p269_p3, %s5973_s25), 1  ;;  %485 = vmatprep.subr.bf16.mxu0 %v7375_v5  ;;  %v7391_v26 = vld [vmem:[%s9924_s1 + $0x164] ss:$24 sps:$4 sm:$0x3f]   ;;  %v7420_v28 = vld [vmem:[%s9924_s1 + $0xc8] ss:$24 sps:$4 sm:$0xff]  }
   0xe   : > { %s7357_s13 = smul.u32 12, %s9934_s25  ;;  %v7418_v27 = vld [vmem:[%s9924_s1 + $0xcc] ss:$24 sps:$4 sm:$0xff]   ;;  %v7393_v29 = vld [vmem:[%s9924_s1 + $0x160] ss:$24 sps:$4 sm:$0x3f]  }
   0xf   : > { %524 = vmatprep.subr.bf16.mxu1 %v7418_v27  ;;  %v7424_v30 = vld [vmem:[%s9924_s1 + $0xfc] ss:$24 sps:$4 sm:$0xff]   ;;  %v7426_v31 = vld [vmem:[%s9924_s1 + $0xf8] ss:$24 sps:$4 sm:$0xff]   ;;  %v476_v33 = vsel %vm462_vm0, %v7393_v29, 0  ;;  %vm8030_vm5 = vmmov 0  }
  0x10   : > { %s8116_s22 = scalar_lea.vmem %s9923_s0, %s7357_s13  ;;  %486 = vmatpush1.bf16.msra.mxu0 %v7377_v7  ;;  %525 = vmatpush1.bf16.msra.mxu1 %v7420_v28  ;;  %v7430_v34 = vld [vmem:[%s9924_s1 + $0x12c] ss:$24 sps:$4 sm:$0xff]   ;;  %v7394_v36 = vld [vmem:[%s9924_s1] ss:$24 sps:$4 sm:$0xff]   ;;  %v7397_v43 = vld [vmem:[%s9924_s1 + $0x30] ss:$24 sps:$4 sm:$0xff]  }
  0x11   : > { %v280_v9 = vld [vmem:[%s8116_s22] sm:$0xf]  ;;  %v281_v10 = vld [vmem:[%s8116_s22 + $0x4] sm:$0xf]  ;;  %6030 = vmatprep.subr.msk.bf16.mxu0 %vm462_vm0, %v7378_v6  ;;  %526 = vmatprep.subr.bf16.mxu1 %v7424_v30  ;;  %v7399_v39 = vld [vmem:[%s9924_s1 + $0x34] ss:$24 sps:$4 sm:$0xff]  }
  0x12   : > { %v8120_v11 = vcombine.low %v280_v9, %v281_v10  ;;  %v7432_v38 = vld [vmem:[%s9924_s1 + $0x128] ss:$24 sps:$4 sm:$0xff]   ;;  %v7438_v40 = vld [vmem:[%s9924_s1 + $0x158] ss:$24 sps:$4 sm:$0x3f]   ;;  %vm4331_vm6 = vcmask 1041408  }
  0x13   : > { %v7436_v42 = vld [vmem:[%s9924_s1 + $0x15c] ss:$24 sps:$4 sm:$0x3f]   ;;  %v470_v44 = vsel %vm462_vm0, %v7438_v40, 0  ;;  %v7444_v45 = vld [vmem:[%s9924_s1 + $0xc] ss:$24 sps:$4 sm:$0xff]  }
  0x14   : > { %v8123_v12 = vshrl.u32 %v8120_v11, 16  ;;  %v8126_v13 = vshll.u32 %v8120_v11, 16  ;;  %488 = vmatpush1.bf16.msra.mxu0 %v464_v14  ;;  %527 = vmatpush1.bf16.msra.mxu1 %v7426_v31  ;;  %v7402_v46 = vld [vmem:[%s9924_s1 + $0x64] ss:$24 sps:$4 sm:$0xff]   ;;  %v7400_v47 = vld [vmem:[%s9924_s1 + $0x60] ss:$24 sps:$4 sm:$0xff]  }
  0x15   : > { %567 = vmatprep.subr.bf16.mxu0 %v7383_v15  ;;  %528 = vmatprep.subr.bf16.mxu1 %v7430_v34  ;;  %v7442_v48 = vld [vmem:[%s9924_s1 + $0x8] ss:$24 sps:$4 sm:$0xff]   ;;  %v7403_v49 = vld [vmem:[%s9924_s1 + $0x94] ss:$24 sps:$4 sm:$0x3f]   ;;  %vm4332_vm7 = vcmask 1045508  }
  0x16   : > { %v342_v16 = vrot.slane %v8126_v13, 1  ;;  %v1200_v17 = vrot.slane %v8123_v12, 1  ;;  %v1201_v18 = vrot.slane %v8126_v13, 2  ;;  %v1810_v35 = vrot.slane %v8123_v12, 2  ;;  %v7450_v50 = vld [vmem:[%s9924_s1 + $0x3c] ss:$24 sps:$4 sm:$0xff]   ;;  %vm9489_vm8 = vmor %vm4331_vm6, %vm4332_vm7 }
  0x17   : > { %v1811_v37 = vrot.slane %v8126_v13, 3  ;;  %v7405_v51 = vld [vmem:[%s9924_s1 + $0x90] ss:$24 sps:$4 sm:$0x3f]   ;;  %v7456_v53 = vld [vmem:[%s9924_s1 + $0x6c] ss:$24 sps:$4 sm:$0xff]  }
  0x18   : > { %v343_v20 = vor.u32 %v342_v16, %v8123_v12  ;;  %v8143_v22 = vor.u32 %v1201_v18, %v1200_v17  ;;  %529 = vmatpush1.bf16.msra.mxu1 %v7432_v38  ;;  %v7448_v52 = vld [vmem:[%s9924_s1 + $0x38] ss:$24 sps:$4 sm:$0xff]   ;;  %v727_v54 = vsel %vm462_vm0, %v7405_v51, 0  ;;  %v7408_v55 = vld [vmem:[%s9924_s1 + $0x14] ss:$24 sps:$4 sm:$0xff]   ;;  %v2425_v14 = vrot.slane %v8123_v12, 3 }
  0x19   : > { %v8196_v41 = vor.u32 %v1811_v37, %v1810_v35  ;;  %6032 = vmatprep.subr.msk.bf16.mxu1 %vm462_vm0, %v7436_v42  ;;  %v7406_v56 = vld [vmem:[%s9924_s1 + $0x10] ss:$24 sps:$4 sm:$0xff]   ;;  %v7411_v57 = vld [vmem:[%s9924_s1 + $0x44] ss:$24 sps:$4 sm:$0xff]   ;;  %v7409_v61 = vld [vmem:[%s9924_s1 + $0x40] ss:$24 sps:$4 sm:$0xff]  }
  0x1a   : > { %6031 = vmatmul.mubr.msk.bf16.vlgmr.msra.gmra.mrb[0].mxu0 %vm458_vm1, %v343_v20  ;;  %v7454_v58 = vld [vmem:[%s9924_s1 + $0x68] ss:$24 sps:$4 sm:$0xff]   ;;  %v7462_v59 = vld [vmem:[%s9924_s1 + $0x98] ss:$24 sps:$4 sm:$0x3f]   ;;  %v2426_v16 = vrot.slane %v8126_v13, 4 }
  0x1b   : > { %568 = vmatpush1.bf16.msra.mxu0 %v7381_v19  ;;  %599 = vmatprep.mubr.bf16.mxu0 %v8028_v2  ;;  %v7460_v60 = vld [vmem:[%s9924_s1 + $0x9c] ss:$24 sps:$4 sm:$0x3f]   ;;  %v733_v62 = vsel %vm462_vm0, %v7462_v59, 0  ;;  %v7468_v63 = vld [vmem:[%s9924_s1 + $0x18c] ss:$24 sps:$4 sm:$0xff]  }
  0x1c   : > { %569 = vmatprep.subr.bf16.mxu0 %v7387_v21  ;;  %531 = vmatpush1.bf16.msra.mxu1 %v470_v44  ;;  %v7414_v0 = vld [vmem:[%s9924_s1 + $0x74] ss:$24 sps:$4 sm:$0xff]   ;;  %v7412_v1 = vld [vmem:[%s9924_s1 + $0x70] ss:$24 sps:$4 sm:$0xff]   ;;  %v7423_v10 = vld [vmem:[%s9924_s1 + $0x184] ss:$24 sps:$4 sm:$0xff]   ;;  %v8311_v19 = vor.u32 %v2426_v16, %v2425_v14 }
  0x1d   : > { %787 = vmatprep.subr.bf16.mxu1 %v7444_v45  ;;  %v7415_v3 = vld [vmem:[%s9924_s1 + $0xa4] ss:$24 sps:$4 sm:$0x3f]   ;;  %v7466_v4 = vld [vmem:[%s9924_s1 + $0x188] ss:$24 sps:$4 sm:$0xff]   ;;  %vm5028_vm9 = vcmask 1046528  }
  0x1e   : > { %v7474_v5 = vld [vmem:[%s9924_s1 + $0x1bc] ss:$24 sps:$4 sm:$0xff]   ;;  %v7417_v6 = vld [vmem:[%s9924_s1 + $0xa0] ss:$24 sps:$4 sm:$0x3f]   ;;  %s6923_s19 = sshll.u32 %s9934_s25, 4 }
  0x1f   : > { %570 = vmatpush1.bf16.msra.mxu0 %v7385_v23  ;;  %6033 = vmatmul.mubr.msk.bf16.vlgmr.msra.gmra.mrb[0].mxu1 %vm458_vm1, %v343_v20  ;;  %v7472_v7 = vld [vmem:[%s9924_s1 + $0x1b8] ss:$24 sps:$4 sm:$0xff]   ;;  %v7480_v8 = vld [vmem:[%s9924_s1 + $0x1ec] ss:$24 sps:$4 sm:$0xff]   ;;  %v739_v9 = vsel %vm462_vm0, %v7417_v6, 0  ;;  %s278_s27 = scalar_lea.vmem %s9930_s7, %s6923_s19  ;;  %vm5915_vm12 = vcmask 392192  }
  0x20   : > { %571 = vmatprep.subr.bf16.mxu0 %v7390_v24  ;;  %788 = vmatpush1.bf16.msra.mxu1 %v7442_v48  ;;  %v7421_v15 = vld [vmem:[%s9924_s1 + $0x180] ss:$24 sps:$4 sm:$0xff]   ;;  %v7429_v12 = vld [vmem:[%s9924_s1 + $0x1b4] ss:$24 sps:$4 sm:$0xff]   ;;  %v7435_v24 = vld [vmem:[%s9924_s1 + $0x1e4] ss:$24 sps:$4 sm:$0xff]  }
  0x21   : > { %819 = vmatprep.mubr.bf16.mxu1 %v8028_v2  ;;  %789 = vmatprep.subr.bf16.mxu1 %v7450_v50  ;;  %v7478_v17 = vld [vmem:[%s9924_s1 + $0x1e8] ss:$24 sps:$4 sm:$0xff]   ;;  %v7486_v18 = vld [vmem:[%s9924_s1 + $0x218] ss:$24 sps:$4 sm:$0x3f]  }
  0x22   : > { %v7484_v13 = vld [vmem:[%s9924_s1 + $0x21c] ss:$24 sps:$4 sm:$0x3f]   ;;  %v1023_v21 = vsel %vm462_vm0, %v7486_v18, 0  ;;  %v7492_v23 = vld [vmem:[%s9924_s1 + $0x24c] ss:$24 sps:$4 sm:$0xff]  }
  0x23   : > { %572 = vmatpush1.bf16.msra.mxu0 %v7388_v25  ;;  %v7433_v25 = vld [vmem:[%s9924_s1 + $0x1e0] ss:$24 sps:$4 sm:$0xff]   ;;  %v7439_v28 = vld [vmem:[%s9924_s1 + $0x214] ss:$24 sps:$4 sm:$0x3f]  }
  0x24   : > { %6034 = vmatprep.subr.msk.bf16.mxu0 %vm462_vm0, %v7391_v26  ;;  %790 = vmatpush1.bf16.msra.mxu1 %v7448_v52  ;;  %v8337_v26 = vrot.slane %v8120_v11, 1  ;;  %v7490_v27 = vld [vmem:[%s9924_s1 + $0x248] ss:$24 sps:$4 sm:$0xff]   ;;  %v7498_v29 = vld [vmem:[%s9924_s1 + $0x27c] ss:$24 sps:$4 sm:$0xff]  }
  0x25   : > { %791 = vmatprep.subr.bf16.mxu1 %v7456_v53  ;;  %v7441_v30 = vld [vmem:[%s9924_s1 + $0x210] ss:$24 sps:$4 sm:$0x3f]   ;;  %v7447_v34 = vld [vmem:[%s9924_s1 + $0x194] ss:$24 sps:$4 sm:$0xff]  }
  0x26   : > { %v7496_v31 = vld [vmem:[%s9924_s1 + $0x278] ss:$24 sps:$4 sm:$0xff]   ;;  %v7453_v37 = vld [vmem:[%s9924_s1 + $0x1c4] ss:$24 sps:$4 sm:$0xff]   ;;  %v7459_v44 = vld [vmem:[%s9924_s1 + $0x1f4] ss:$24 sps:$4 sm:$0xff]  }
  0x27   : > { %574 = vmatpush1.bf16.msra.mxu0 %v476_v33  ;;  %v1017_v33 = vsel %vm462_vm0, %v7441_v30, 0  ;;  %v7445_v35 = vld [vmem:[%s9924_s1 + $0x190] ss:$24 sps:$4 sm:$0xff]   ;;  %v7451_v40 = vld [vmem:[%s9924_s1 + $0x1c0] ss:$24 sps:$4 sm:$0xff]  }
  0x28   : > { %744 = vmatprep.subr.bf16.mxu0 %v7396_v32  ;;  %792 = vmatpush1.bf16.msra.mxu1 %v7454_v58  ;;  %v7504_v32 = vld [vmem:[%s9924_s1 + $0x2ac] ss:$24 sps:$4 sm:$0xff]   ;;  %v7510_v38 = vld [vmem:[%s9924_s1 + $0x2d8] ss:$24 sps:$4 sm:$0x3f]  }
  0x29   : > { %6062 = vmatprep.subr.msk.bf16.mxu1 %vm462_vm0, %v7460_v60  ;;  %v1327_v42 = vsel %vm462_vm0, %v7510_v38, 0  ;;  %v7457_v45 = vld [vmem:[%s9924_s1 + $0x1f0] ss:$24 sps:$4 sm:$0xff]   ;;  %v7522_v48 = vld [vmem:[%s9924_s1 + $0x33c] ss:$24 sps:$4 sm:$0xff]  }
  0x2a   : > { %6035 = vmatmul.mubr.msk.bf16.vlgmr.msra.gmra.mrb[4].mxu0 %vm458_vm1, %v343_v20  ;;  %v7427_v20 = vld [vmem:[%s9924_s1 + $0x1b0] ss:$24 sps:$4 sm:$0xff]   ;;  %v7528_v51 = vld [vmem:[%s9924_s1 + $0x36c] ss:$24 sps:$4 sm:$0xff]   ;;  %vm1809_vm2 = vsmask.f32 5376 }
  0x2b   : > { %745 = vmatpush1.bf16.msra.mxu0 %v7394_v36  ;;  %776 = vmatprep.mubr.bf16.mxu0 %v8028_v2  ;;  %v7502_v36 = vld [vmem:[%s9924_s1 + $0x2a8] ss:$24 sps:$4 sm:$0xff]   ;;  %v7520_v50 = vld [vmem:[%s9924_s1 + $0x338] ss:$24 sps:$4 sm:$0xff]   ;;  %v7471_v53 = vld [vmem:[%s9924_s1 + $0x244] ss:$24 sps:$4 sm:$0xff]  }
  0x2c   : > { %746 = vmatprep.subr.bf16.mxu0 %v7399_v39  ;;  %794 = vmatpush1.bf16.msra.mxu1 %v733_v62  ;;  %v7508_v39 = vld [vmem:[%s9924_s1 + $0x2dc] ss:$24 sps:$4 sm:$0x3f]   ;;  %v7475_v59 = vld [vmem:[%s9924_s1 + $0x270] ss:$24 sps:$4 sm:$0xff]  }
  0x2d   : > { %1077 = vmatprep.subr.bf16.mxu1 %v7468_v63  ;;  %v7532_v58 = vld [vmem:[%s9924_s1 + $0x39c] ss:$24 sps:$4 sm:$0x3f]   ;;  %v7481_v63 = vld [vmem:[%s9924_s1 + $0x2a0] ss:$24 sps:$4 sm:$0xff]  }
  0x2e   : > { %v7483_v62 = vld [vmem:[%s9924_s1 + $0x2a4] ss:$24 sps:$4 sm:$0xff]   ;;  %v7489_v6 = vld [vmem:[%s9924_s1 + $0x2d0] ss:$24 sps:$4 sm:$0x3f]  }
  0x2f   : > { %747 = vmatpush1.bf16.msra.mxu0 %v7397_v43  ;;  %6063 = vmatmul.mubr.msk.bf16.vlgmr.msra.gmra.mrb[0].mxu1 %vm458_vm1, %v8120_v11  ;;  %v7516_v43 = vld [vmem:[%s9924_s1 + $0x30c] ss:$24 sps:$4 sm:$0xff]   ;;  %v7550_v16 = vld [vmem:[%s9924_s1 + $0x428] ss:$24 sps:$4 sm:$0xff]   ;;  %v7571_v30 = vld [vmem:[%s9924_s1 + $0x4bc] ss:$24 sps:$4 sm:$0xff]  }
  0x30   : > { %748 = vmatprep.subr.bf16.mxu0 %v7402_v46  ;;  %1078 = vmatpush1.bf16.msra.mxu1 %v7466_v4  ;;  %v7463_v46 = vld [vmem:[%s9924_s1 + $0x224] ss:$24 sps:$4 sm:$0x3f]   ;;  %v7495_v14 = vld [vmem:[%s9924_s1 + $0x254] ss:$24 sps:$4 sm:$0xff]  }
  0x31   : > { %1109 = vmatprep.mubr.bf16.mxu1 %v8028_v2  ;;  %1079 = vmatprep.subr.bf16.mxu1 %v7474_v5  ;;  %v7546_v4 = vld [vmem:[%s9924_s1 + $0x3fc] ss:$24 sps:$4 sm:$0xff]   ;;  %v8468_v5 = vld [vmem:[%s8116_s22 + $0x8] sm:$0x3]  ;;  %vm2424_vm4 = vsmask.f32 4352 }
  0x32   : > { %v7501_v18 = vld [vmem:[%s9924_s1 + $0x284] ss:$24 sps:$4 sm:$0xff]   ;;  %v7583_v38 = vld [vmem:[%s9924_s1 + $0x518] ss:$24 sps:$4 sm:$0x3f]  }
  0x33   : > { %749 = vmatpush1.bf16.msra.mxu0 %v7400_v47  ;;  %v7514_v47 = vld [vmem:[%s9924_s1 + $0x308] ss:$24 sps:$4 sm:$0xff]   ;;  %vm4474_vm10 = vsmask.f32 7424  ;;  %vm5328_vm11 = vsmask.f32 6400 }
  0x34   : > { %6060 = vmatprep.subr.msk.bf16.mxu0 %vm462_vm0, %v7403_v49  ;;  %1080 = vmatpush1.bf16.msra.mxu1 %v7472_v7  ;;  %v7465_v49 = vld [vmem:[%s9924_s1 + $0x220] ss:$24 sps:$4 sm:$0x3f]  }
  0x35   : > { %1081 = vmatprep.subr.bf16.mxu1 %v7480_v8  ;;  %v1029_v52 = vsel %vm462_vm0, %v7465_v49, 0  ;;  %v7544_v7 = vld [vmem:[%s9924_s1 + $0x3f8] ss:$24 sps:$4 sm:$0xff]   ;;  %v8481_v8 = vcombine.low %v8468_v5, %v8468_v5 }
  0x36   : > { %v7537_v49 = vld [vmem:[%s9924_s1 + $0x390] ss:$24 sps:$4 sm:$0x3f]  }
  0x37   : > { %751 = vmatpush1.bf16.msra.mxu0 %v727_v54  ;;  %v7469_v54 = vld [vmem:[%s9924_s1 + $0x240] ss:$24 sps:$4 sm:$0xff]  }
  0x38   : > { %830 = vmatprep.subr.bf16.mxu0 %v7408_v55  ;;  %1082 = vmatpush1.bf16.msra.mxu1 %v7478_v17  ;;  %v7526_v55 = vld [vmem:[%s9924_s1 + $0x368] ss:$24 sps:$4 sm:$0xff]   ;;  %v1814_v17 = vshll.u32 %v8481_v8, 16 }
  0x39   : > { %6116 = vmatprep.subr.msk.bf16.mxu1 %vm462_vm0, %v7484_v13  ;;  %v7556_v13 = vld [vmem:[%s9924_s1 + $0x45c] ss:$24 sps:$4 sm:$0x3f]  }
  0x3a   : > { %6061 = vmatmul.mubr.msk.bf16.vlgmr.msra.gmra.mrb[0].mxu0 %vm458_vm1, %v8120_v11 }
  0x3b   : > { %831 = vmatpush1.bf16.msra.mxu0 %v7406_v56  ;;  %862 = vmatprep.mubr.bf16.mxu0 %v8028_v2  ;;  %v7534_v56 = vld [vmem:[%s9924_s1 + $0x398] ss:$24 sps:$4 sm:$0x3f]  }
  0x3c   : > { %832 = vmatprep.subr.bf16.mxu0 %v7411_v57  ;;  %1084 = vmatpush1.bf16.msra.mxu1 %v1023_v21  ;;  %v7477_v57 = vld [vmem:[%s9924_s1 + $0x274] ss:$24 sps:$4 sm:$0xff]   ;;  %v1629_v60 = vsel %vm462_vm0, %v7534_v56, 0  ;;  %v7499_v21 = vld [vmem:[%s9924_s1 + $0x280] ss:$24 sps:$4 sm:$0xff]  }
  0x3d   : > { %1381 = vmatprep.subr.bf16.mxu1 %v7492_v23  ;;  %v7541_v56 = vld [vmem:[%s9924_s1 + $0x310] ss:$24 sps:$4 sm:$0xff]  }
  0x3f   : > { %833 = vmatpush1.bf16.msra.mxu0 %v7409_v61  ;;  %6117 = vmatmul.mubr.msk.bf16.vlgmr.msra.gmra.mrb[0].mxu1 %vm458_vm1, %v8337_v26  ;;  %v7540_v61 = vld [vmem:[%s9924_s1 + $0x3cc] ss:$24 sps:$4 sm:$0xff]  }
  0x40   : > { %834 = vmatprep.subr.bf16.mxu0 %v7414_v0  ;;  %1382 = vmatpush1.bf16.msra.mxu1 %v7490_v27  ;;  %v8456_v0 = vrot.slane %v8120_v11, 2  ;;  %v7511_v27 = vld [vmem:[%s9924_s1 + $0x2e4] ss:$24 sps:$4 sm:$0x3f]  }
  0x41   : > { %1413 = vmatprep.mubr.bf16.mxu1 %v8028_v2  ;;  %1383 = vmatprep.subr.bf16.mxu1 %v7498_v29 }
  0x43   : > { %835 = vmatpush1.bf16.msra.mxu0 %v7412_v1  ;;  %v7487_v1 = vld [vmem:[%s9924_s1 + $0x2d4] ss:$24 sps:$4 sm:$0x3f]  }
  0x44   : > { %6064 = vmatprep.subr.msk.bf16.mxu0 %vm462_vm0, %v7415_v3  ;;  %1384 = vmatpush1.bf16.msra.mxu1 %v7496_v31  ;;  %v7538_v3 = vld [vmem:[%s9924_s1 + $0x3c8] ss:$24 sps:$4 sm:$0xff]  }
  0x45   : > { %1385 = vmatprep.subr.bf16.mxu1 %v7504_v32  ;;  %v7513_v31 = vld [vmem:[%s9924_s1 + $0x2e0] ss:$24 sps:$4 sm:$0x3f]   ;;  %v7577_v32 = vld [vmem:[%s9924_s1 + $0x4ec] ss:$24 sps:$4 sm:$0xff]  }
  0x47   : > { %837 = vmatpush1.bf16.msra.mxu0 %v739_v9  ;;  %v7552_v9 = vld [vmem:[%s9924_s1 + $0x42c] ss:$24 sps:$4 sm:$0xff]  }
  0x48   : > { %1034 = vmatprep.subr.bf16.mxu0 %v7423_v10  ;;  %1386 = vmatpush1.bf16.msra.mxu1 %v7502_v36  ;;  %v1321_v10 = vsel %vm462_vm0, %v7489_v6, 0  ;;  %v7575_v36 = vld [vmem:[%s9924_s1 + $0x4e8] ss:$24 sps:$4 sm:$0xff]   ;;  %v7613_v6 = vld [vmem:[%s9924_s1 + $0x60c] ss:$24 sps:$4 sm:$0xff]  }
  0x49   : > { %6170 = vmatprep.subr.msk.bf16.mxu1 %vm462_vm0, %v7508_v39  ;;  %v7581_v39 = vld [vmem:[%s9924_s1 + $0x51c] ss:$24 sps:$4 sm:$0x3f]  }
  0x4a   : > { %6065 = vmatmul.mubr.msk.bf16.vlgmr.msra.gmra.mrb[4].mxu0 %vm458_vm1, %v8120_v11 }
  0x4b   : > { %1035 = vmatpush1.bf16.msra.mxu0 %v7421_v15  ;;  %1066 = vmatprep.mubr.bf16.mxu0 %v8028_v2  ;;  %v7493_v15 = vld [vmem:[%s9924_s1 + $0x250] ss:$24 sps:$4 sm:$0xff]  }
  0x4c   : > { %1036 = vmatprep.subr.bf16.mxu0 %v7429_v12  ;;  %1388 = vmatpush1.bf16.msra.mxu1 %v1327_v42  ;;  %v7558_v12 = vld [vmem:[%s9924_s1 + $0x458] ss:$24 sps:$4 sm:$0x3f]   ;;  %v2120_v42 = vrot.slane %v8120_v11, 3 }
  0x4d   : > { %1683 = vmatprep.subr.bf16.mxu1 %v7516_v43  ;;  %v1942_v23 = vsel %vm462_vm0, %v7558_v12, 0  ;;  %v2121_v43 = vrot.slane %v8481_v8, 3  ;;  %v7529_v11 = vld [vmem:[%s9924_s1 + $0x360] ss:$24 sps:$4 sm:$0xff]  }
  0x4e   : > { %v7623_v12 = vld [vmem:[%s9924_s1 + $0x668] ss:$24 sps:$4 sm:$0xff]  }
  0x4f   : > { %1037 = vmatpush1.bf16.msra.mxu0 %v7427_v20  ;;  %6171 = vmatmul.mubr.msk.bf16.vlgmr.msra.gmra.mrb[0].mxu1 %vm458_vm1, %v8143_v22  ;;  %v1816_v20 = vrot.slane %v1814_v17, 3 }
  0x50   : > { %1038 = vmatprep.subr.bf16.mxu0 %v7435_v24  ;;  %1684 = vmatpush1.bf16.msra.mxu1 %v7514_v47  ;;  %v7564_v24 = vld [vmem:[%s9924_s1 + $0x48c] ss:$24 sps:$4 sm:$0xff]   ;;  %v8595_v47 = vsel %vm2119_vm3, %v2120_v42, %v2121_v43  ;;  %v7614_v42 = vld [vmem:[%s9924_s1 + $0x480] ss:$24 sps:$4 sm:$0xff]  }
  0x51   : > { %1715 = vmatprep.mubr.bf16.mxu1 %v8028_v2  ;;  %1685 = vmatprep.subr.bf16.mxu1 %v7522_v48  ;;  %v8533_v29 = vsel %vm1809_vm2, %v8196_v41, %v1816_v20  ;;  %v7569_v41 = vld [vmem:[%s9924_s1 + $0x4b8] ss:$24 sps:$4 sm:$0xff]   ;;  %v7595_v48 = vld [vmem:[%s9924_s1 + $0x57c] ss:$24 sps:$4 sm:$0xff]  }
  0x52   : > { %v7566_v20 = vld [vmem:[%s9924_s1 + $0x3c0] ss:$24 sps:$4 sm:$0xff]   ;;  %v7622_v43 = vld [vmem:[%s9924_s1 + $0x4b4] ss:$24 sps:$4 sm:$0xff]  }
  0x53   : > { %1039 = vmatpush1.bf16.msra.mxu0 %v7433_v25  ;;  %v7507_v25 = vld [vmem:[%s9924_s1 + $0x2b4] ss:$24 sps:$4 sm:$0xff]  }
  0x54   : > { %6114 = vmatprep.subr.msk.bf16.mxu0 %vm462_vm0, %v7439_v28  ;;  %1686 = vmatpush1.bf16.msra.mxu1 %v7520_v50  ;;  %v7562_v28 = vld [vmem:[%s9924_s1 + $0x488] ss:$24 sps:$4 sm:$0xff]   ;;  %v7593_v50 = vld [vmem:[%s9924_s1 + $0x578] ss:$24 sps:$4 sm:$0xff]  }
  0x55   : > { %1687 = vmatprep.subr.bf16.mxu1 %v7528_v51  ;;  %v8608_v51 = vld [vmem:[#allocation2] sm:$0xff] }
  0x57   : > { %1041 = vmatpush1.bf16.msra.mxu0 %v1017_v33  ;;  %v1333_v33 = vsel %vm462_vm0, %v7513_v31, 0  ;;  %v7586_v31 = vld [vmem:[%s9924_s1 + $0x450] ss:$24 sps:$4 sm:$0x3f]  }
  0x58   : > { %1120 = vmatprep.subr.bf16.mxu0 %v7447_v34  ;;  %1688 = vmatpush1.bf16.msra.mxu1 %v7526_v55  ;;  %v7519_v34 = vld [vmem:[%s9924_s1 + $0x304] ss:$24 sps:$4 sm:$0xff]   ;;  %v7543_v55 = vld [vmem:[%s9924_s1 + $0x314] ss:$24 sps:$4 sm:$0xff]  }
  0x59   : > { %6224 = vmatprep.subr.msk.bf16.mxu1 %vm462_vm0, %v7532_v58  ;;  %v7549_v58 = vld [vmem:[%s9924_s1 + $0x344] ss:$24 sps:$4 sm:$0xff]  }
  0x5a   : > { %6115 = vmatmul.mubr.msk.bf16.vlgmr.msra.gmra.mrb[0].mxu0 %vm458_vm1, %v8337_v26 }
  0x5b   : > { %1121 = vmatpush1.bf16.msra.mxu0 %v7445_v35  ;;  %1152 = vmatprep.mubr.bf16.mxu0 %v8028_v2  ;;  %v7517_v35 = vld [vmem:[%s9924_s1 + $0x300] ss:$24 sps:$4 sm:$0xff]  }
  0x5c   : > { %1122 = vmatprep.subr.bf16.mxu0 %v7453_v37  ;;  %1690 = vmatpush1.bf16.msra.mxu1 %v1629_v60  ;;  %v7525_v37 = vld [vmem:[%s9924_s1 + $0x334] ss:$24 sps:$4 sm:$0xff]  }
  0x5d   : > { %1996 = vmatprep.subr.bf16.mxu1 %v7540_v61  ;;  %v7607_v61 = vld [vmem:[%s9924_s1 + $0x5d8] ss:$24 sps:$4 sm:$0x3f]  }
  0x5f   : > { %1123 = vmatpush1.bf16.msra.mxu0 %v7451_v40  ;;  %6225 = vmatmul.mubr.msk.bf16.vlgmr.msra.gmra.mrb[0].mxu1 %vm458_vm1, %v8456_v0  ;;  %v7523_v40 = vld [vmem:[%s9924_s1 + $0x330] ss:$24 sps:$4 sm:$0xff]  }
  0x60   : > { %1124 = vmatprep.subr.bf16.mxu0 %v7459_v44  ;;  %1997 = vmatpush1.bf16.msra.mxu1 %v7538_v3  ;;  %v2247_v44 = vsel %vm462_vm0, %v7583_v38, 0  ;;  %v7555_v3 = vld [vmem:[%s9924_s1 + $0x374] ss:$24 sps:$4 sm:$0xff]   ;;  %v7610_v38 = vld [vmem:[%s9924_s1 + $0x460] ss:$24 sps:$4 sm:$0x3f]  }
  0x61   : > { %2028 = vmatprep.mubr.bf16.mxu1 %v8028_v2  ;;  %1998 = vmatprep.subr.bf16.mxu1 %v7546_v4  ;;  %v2558_v4 = vsel %vm462_vm0, %v7607_v61, 0  ;;  %v7650_v61 = vld [vmem:[%s9924_s1 + $0x544] ss:$24 sps:$4 sm:$0xff]  }
  0x63   : > { %1125 = vmatpush1.bf16.msra.mxu0 %v7457_v45  ;;  %v7589_v45 = vld [vmem:[%s9924_s1 + $0x54c] ss:$24 sps:$4 sm:$0xff]  }
  0x64   : > { %6118 = vmatprep.subr.msk.bf16.mxu0 %vm462_vm0, %v7463_v46  ;;  %1999 = vmatpush1.bf16.msra.mxu1 %v7544_v7  ;;  %v7587_v46 = vld [vmem:[%s9924_s1 + $0x548] ss:$24 sps:$4 sm:$0xff]  }
  0x65   : > { %2000 = vmatprep.subr.bf16.mxu1 %v7552_v9  ;;  %v7611_v7 = vld [vmem:[%s9924_s1 + $0x608] ss:$24 sps:$4 sm:$0xff]   ;;  %v7559_v9 = vld [vmem:[%s9924_s1 + $0x3a4] ss:$24 sps:$4 sm:$0x3f]  }
  0x67   : > { %1127 = vmatpush1.bf16.msra.mxu0 %v1029_v52  ;;  %v2428_v52 = vshrl.u32 %v8481_v8, 16  ;;  %v7553_v8 = vld [vmem:[%s9924_s1 + $0x370] ss:$24 sps:$4 sm:$0xff]  }
  0x68   : > { %1338 = vmatprep.subr.bf16.mxu0 %v7471_v53  ;;  %2001 = vmatpush1.bf16.msra.mxu1 %v7550_v16  ;;  %v7601_v53 = vld [vmem:[%s9924_s1 + $0x5ac] ss:$24 sps:$4 sm:$0xff]   ;;  %v7617_v16 = vld [vmem:[%s9924_s1 + $0x638] ss:$24 sps:$4 sm:$0xff]  }
  0x69   : > { %6279 = vmatprep.subr.msk.bf16.mxu1 %vm462_vm0, %v7556_v13  ;;  %v2430_v60 = vrot.slane %v2428_v52, 3  ;;  %v7631_v13 = vld [vmem:[%s9924_s1 + $0x698] ss:$24 sps:$4 sm:$0x3f]  }
  0x6a   : > { %6119 = vmatmul.mubr.msk.bf16.vlgmr.msra.gmra.mrb[4].mxu0 %vm458_vm1, %v8337_v26  ;;  %v7505_v26 = vld [vmem:[%s9924_s1 + $0x2b0] ss:$24 sps:$4 sm:$0xff]  }
  0x6b   : > { %1339 = vmatpush1.bf16.msra.mxu0 %v7469_v54  ;;  %1370 = vmatprep.mubr.bf16.mxu0 %v8028_v2  ;;  %v1623_v54 = vsel %vm462_vm0, %v7537_v49, 0 }
  0x6c   : > { %1340 = vmatprep.subr.bf16.mxu0 %v7477_v57  ;;  %2003 = vmatpush1.bf16.msra.mxu1 %v1942_v23  ;;  %v2431_v57 = vrot.slane %v1814_v17, 4  ;;  %v7629_v23 = vld [vmem:[%s9924_s1 + $0x69c] ss:$24 sps:$4 sm:$0x3f]  }
  0x6d   : > { %2301 = vmatprep.subr.bf16.mxu1 %v7564_v24  ;;  %v7572_v24 = vld [vmem:[%s9924_s1 + $0x3f0] ss:$24 sps:$4 sm:$0xff]  }
  0x6f   : > { %1341 = vmatpush1.bf16.msra.mxu0 %v7475_v59  ;;  %6280 = vmatmul.mubr.msk.bf16.vlgmr.msra.gmra.mrb[0].mxu1 %vm458_vm1, %v8533_v29  ;;  %v7599_v59 = vld [vmem:[%s9924_s1 + $0x5a8] ss:$24 sps:$4 sm:$0xff]  }
  0x70   : > { %1342 = vmatprep.subr.bf16.mxu0 %v7483_v62  ;;  %2302 = vmatpush1.bf16.msra.mxu1 %v7562_v28  ;;  %v7605_v62 = vld [vmem:[%s9924_s1 + $0x5dc] ss:$24 sps:$4 sm:$0x3f]   ;;  %v8018_v28 = vld [vmem:[%s8116_s22 + $0x4] sm:$0xf] }
  0x71   : > { %2333 = vmatprep.mubr.bf16.mxu1 %v8028_v2  ;;  %2303 = vmatprep.subr.bf16.mxu1 %v7571_v30  ;;  %v7584_v30 = vld [vmem:[%s9924_s1 + $0x454] ss:$24 sps:$4 sm:$0x3f]  }
  0x73   : > { %1343 = vmatpush1.bf16.msra.mxu0 %v7481_v63  ;;  %v7547_v63 = vld [vmem:[%s9924_s1 + $0x340] ss:$24 sps:$4 sm:$0xff]  }
  0x74   : > { %6168 = vmatprep.subr.msk.bf16.mxu0 %vm462_vm0, %v7487_v1  ;;  %2304 = vmatpush1.bf16.msra.mxu1 %v7569_v41  ;;  %v2432_v1 = vor.u32 %v2431_v57, %v2430_v60  ;;  %v7592_v41 = vld [vmem:[%s9924_s1 + $0x3d4] ss:$24 sps:$4 sm:$0xff]   ;;  %v7639_v57 = vld [vmem:[%s9924_s1 + $0x4c0] ss:$24 sps:$4 sm:$0xff]  }
  0x75   : > { %2305 = vmatprep.subr.bf16.mxu1 %v7577_v32  ;;  %v7590_v32 = vld [vmem:[%s9924_s1 + $0x3d0] ss:$24 sps:$4 sm:$0xff]   ;;  %v7645_v60 = vld [vmem:[%s9924_s1 + $0x524] ss:$24 sps:$4 sm:$0x3f]  }
  0x77   : > { %1345 = vmatpush1.bf16.msra.mxu0 %v1321_v10  ;;  %v8661_v10 = vsel %vm2424_vm4, %v8311_v19, %v2432_v1  ;;  %v7568_v19 = vld [vmem:[%s9924_s1 + $0x3c4] ss:$24 sps:$4 sm:$0xff]   ;;  %v7651_v1 = vld [vmem:[%s9924_s1 + $0x570] ss:$24 sps:$4 sm:$0xff]  }
  0x78   : > { %1424 = vmatprep.subr.bf16.mxu0 %v7495_v14  ;;  %2306 = vmatpush1.bf16.msra.mxu1 %v7575_v36  ;;  %v7561_v14 = vld [vmem:[%s9924_s1 + $0x3a0] ss:$24 sps:$4 sm:$0x3f]   ;;  %v7602_v36 = vld [vmem:[%s9924_s1 + $0x430] ss:$24 sps:$4 sm:$0xff]  }
  0x79   : > { %6333 = vmatprep.subr.msk.bf16.mxu1 %vm462_vm0, %v7581_v39  ;;  %v1635_v17 = vsel %vm462_vm0, %v7561_v14, 0  ;;  %v7616_v39 = vld [vmem:[%s9924_s1 + $0x484] ss:$24 sps:$4 sm:$0xff]   ;;  %v7668_v14 = vld [vmem:[%s9924_s1 + $0x5b4] ss:$24 sps:$4 sm:$0xff]  }
  0x7a   : > { %6169 = vmatmul.mubr.msk.bf16.vlgmr.msra.gmra.mrb[0].mxu0 %vm458_vm1, %v8143_v22 }
  0x7b   : > { %1425 = vmatpush1.bf16.msra.mxu0 %v7493_v15  ;;  %1456 = vmatprep.mubr.bf16.mxu0 %v8028_v2  ;;  %v7619_v15 = vld [vmem:[%s9924_s1 + $0x63c] ss:$24 sps:$4 sm:$0xff]  }
  0x7c   : > { %1426 = vmatprep.subr.bf16.mxu0 %v7501_v18  ;;  %2308 = vmatpush1.bf16.msra.mxu1 %v2247_v44  ;;  %v7625_v18 = vld [vmem:[%s9924_s1 + $0x66c] ss:$24 sps:$4 sm:$0xff]   ;;  %v7620_v44 = vld [vmem:[%s9924_s1 + $0x4b0] ss:$24 sps:$4 sm:$0xff]  }
  0x7d   : > { %2612 = vmatprep.subr.bf16.mxu1 %v7589_v45  ;;  %v7628_v45 = vld [vmem:[%s9924_s1 + $0x4e4] ss:$24 sps:$4 sm:$0xff]  }
  0x7f   : > { %1427 = vmatpush1.bf16.msra.mxu0 %v7499_v21  ;;  %6334 = vmatmul.mubr.msk.bf16.vlgmr.msra.gmra.mrb[0].mxu1 %vm458_vm1, %v8595_v47  ;;  %v7574_v21 = vld [vmem:[%s9924_s1 + $0x3f4] ss:$24 sps:$4 sm:$0xff]  }
  0x80   : > { %1428 = vmatprep.subr.bf16.mxu0 %v7507_v25  ;;  %2613 = vmatpush1.bf16.msra.mxu1 %v7587_v46  ;;  %v7580_v25 = vld [vmem:[%s9924_s1 + $0x424] ss:$24 sps:$4 sm:$0xff]   ;;  %v7626_v46 = vld [vmem:[%s9924_s1 + $0x4e0] ss:$24 sps:$4 sm:$0xff]  }
  0x81   : > { %2644 = vmatprep.mubr.bf16.mxu1 %v8608_v51  ;;  %2614 = vmatprep.subr.bf16.mxu1 %v7595_v48  ;;  %v7632_v48 = vld [vmem:[%s9924_s1 + $0x514] ss:$24 sps:$4 sm:$0x3f]  }
  0x83   : > { %1429 = vmatpush1.bf16.msra.mxu0 %v7505_v26  ;;  %v2860_v26 = vsel %vm462_vm0, %v7631_v13, 0  ;;  %v7680_v13 = vld [vmem:[%s9924_s1 + $0x664] ss:$24 sps:$4 sm:$0xff]  }
  0x84   : > { %6172 = vmatprep.subr.msk.bf16.mxu0 %vm462_vm0, %v7511_v27  ;;  %2615 = vmatpush1.bf16.msra.mxu1 %v7593_v50  ;;  %v7578_v27 = vld [vmem:[%s9924_s1 + $0x420] ss:$24 sps:$4 sm:$0xff]  }
  0x85   : > { %2616 = vmatprep.subr.bf16.mxu1 %v7601_v53 }
  0x87   : > { %1431 = vmatpush1.bf16.msra.mxu0 %v1333_v33  ;;  %v7598_v33 = vld [vmem:[%s9924_s1 + $0x404] ss:$24 sps:$4 sm:$0xff]  }
  0x88   : > { %1640 = vmatprep.subr.bf16.mxu0 %v7519_v34  ;;  %2617 = vmatpush1.bf16.msra.mxu1 %v7599_v59  ;;  %v7596_v34 = vld [vmem:[%s9924_s1 + $0x400] ss:$24 sps:$4 sm:$0xff]   ;;  %v7642_v59 = vld [vmem:[%s9924_s1 + $0x4f0] ss:$24 sps:$4 sm:$0xff]  }
  0x89   : > { %6387 = vmatprep.subr.msk.bf16.mxu1 %vm462_vm0, %v7605_v62  ;;  %v7648_v62 = vld [vmem:[%s9924_s1 + $0x540] ss:$24 sps:$4 sm:$0xff]  }
  0x8a   : > { %6173 = vmatmul.mubr.msk.bf16.vlgmr.msra.gmra.mrb[4].mxu0 %vm458_vm1, %v8143_v22  ;;  %v7531_v22 = vld [vmem:[%s9924_s1 + $0x364] ss:$24 sps:$4 sm:$0xff]  }
  0x8b   : > { %1641 = vmatpush1.bf16.msra.mxu0 %v7517_v35  ;;  %1672 = vmatprep.mubr.bf16.mxu0 %v8028_v2  ;;  %v7535_v2 = vld [vmem:[%s9924_s1 + $0x394] ss:$24 sps:$4 sm:$0x3f]  }
  0x8c   : > { %1642 = vmatprep.subr.bf16.mxu0 %v7525_v37  ;;  %2619 = vmatpush1.bf16.msra.mxu1 %v2558_v4  ;;  %v7604_v35 = vld [vmem:[%s9924_s1 + $0x434] ss:$24 sps:$4 sm:$0xff]   ;;  %v7608_v37 = vld [vmem:[%s9924_s1 + $0x464] ss:$24 sps:$4 sm:$0x3f]  }
  0x8d   : > { %2914 = vmatprep.subr.bf16.mxu1 %v7613_v6  ;;  %v7654_v4 = vld [vmem:[%s9924_s1 + $0x5a0] ss:$24 sps:$4 sm:$0xff]   ;;  %v7657_v6 = vld [vmem:[%s9924_s1 + $0x5d4] ss:$24 sps:$4 sm:$0x3f]  }
  0x8f   : > { %1643 = vmatpush1.bf16.msra.mxu0 %v7523_v40  ;;  %6388 = vmatmul.mubr.msk.bf16.vlgmr.msra.gmra.mrb[0].mxu1 %vm458_vm1, %v8661_v10  ;;  %v1948_v40 = vsel %vm462_vm0, %v7610_v38, 0  ;;  %v7692_v38 = vld [vmem:[%s9924_s1 + $0x674] ss:$24 sps:$4 sm:$0xff]  }
  0x90   : > { %1644 = vmatprep.subr.bf16.mxu0 %v7531_v22  ;;  %2915 = vmatpush1.bf16.msra.mxu1 %v7611_v7  ;;  %v7634_v22 = vld [vmem:[%s9924_s1 + $0x510] ss:$24 sps:$4 sm:$0x3f]  }
  0x91   : > { %2946 = vmatprep.mubr.bf16.mxu1 %v8608_v51  ;;  %2916 = vmatprep.subr.bf16.mxu1 %v7619_v15  ;;  %v2241_v49 = vsel %vm462_vm0, %v7634_v22, 0  ;;  %v7660_v7 = vld [vmem:[%s9924_s1 + $0x550] ss:$24 sps:$4 sm:$0xff]  }
  0x92   : > { %v7666_v15 = vld [vmem:[%s9924_s1 + $0x5b0] ss:$24 sps:$4 sm:$0xff]  }
  0x93   : > { %1645 = vmatpush1.bf16.msra.mxu0 %v7529_v11  ;;  %v7647_v11 = vld [vmem:[%s9924_s1 + $0x520] ss:$24 sps:$4 sm:$0x3f]   ;;  %v7714_v22 = vld [vmem:[%s9926_s3 + $0x90] ss:$12 sps:$4 sm:$0xff]  }
  0x94   : > { %6222 = vmatprep.subr.msk.bf16.mxu0 %vm462_vm0, %v7535_v2  ;;  %2917 = vmatpush1.bf16.msra.mxu1 %v7617_v16  ;;  %v7659_v2 = vld [vmem:[%s9924_s1 + $0x5d0] ss:$24 sps:$4 sm:$0x3f]   ;;  %v2253_v50 = vsel %vm462_vm0, %v7647_v11, 0 }
  0x95   : > { %2918 = vmatprep.subr.bf16.mxu1 %v7625_v18  ;;  %v2552_v52 = vsel %vm462_vm0, %v7659_v2, 0  ;;  %v7669_v16 = vld [vmem:[%s9924_s1 + $0x5e4] ss:$24 sps:$4 sm:$0x3f]   ;;  %v7675_v18 = vld [vmem:[%s9924_s1 + $0x630] ss:$24 sps:$4 sm:$0xff]  }
  0x96   : > { %v7723_v11 = vld [vmem:[%s9926_s3 + $0xc8] ss:$12 sps:$4 sm:$0xff]   ;;  %v7719_v2 = vld [vmem:[%s9926_s3 + $0xac] ss:$12 sps:$4 sm:$0xff]  }
  0x97   : > { %1647 = vmatpush1.bf16.msra.mxu0 %v1623_v54  ;;  %v7638_v54 = vld [vmem:[%s9924_s1 + $0x494] ss:$24 sps:$4 sm:$0xff]  }
  0x98   : > { %1726 = vmatprep.subr.bf16.mxu0 %v7543_v55  ;;  %2919 = vmatpush1.bf16.msra.mxu1 %v7623_v12  ;;  %v7636_v55 = vld [vmem:[%s9924_s1 + $0x490] ss:$24 sps:$4 sm:$0xff]   ;;  %v8019_v12 = vld [vmem:[#allocation2] sm:$0xff] }
  0x99   : > { %6442 = vmatprep.subr.msk.bf16.mxu1 %vm462_vm0, %v7629_v23  ;;  %v7678_v23 = vld [vmem:[%s9924_s1 + $0x660] ss:$24 sps:$4 sm:$0xff]  }
  0x9a   : > { %6223 = vmatmul.mubr.msk.bf16.vlgmr.msra.gmra.mrb[0].mxu0 %vm458_vm1, %v8456_v0 }
  0x9b   : > { %1727 = vmatpush1.bf16.msra.mxu0 %v7541_v56  ;;  %1758 = vmatprep.mubr.bf16.mxu0 %v8608_v51  ;;  %v7641_v56 = vld [vmem:[%s9924_s1 + $0x4c4] ss:$24 sps:$4 sm:$0xff]  }
  0x9c   : > { %1728 = vmatprep.subr.bf16.mxu0 %v7549_v58  ;;  %2921 = vmatpush1.bf16.msra.mxu1 %v2860_v26  ;;  %v7644_v58 = vld [vmem:[%s9924_s1 + $0x4f4] ss:$24 sps:$4 sm:$0xff]   ;;  %v7683_v26 = vld [vmem:[%s9924_s1 + $0x690] ss:$24 sps:$4 sm:$0x3f]  }
  0x9f   : > { %1729 = vmatpush1.bf16.msra.mxu0 %v7547_v63  ;;  %v7653_v63 = vld [vmem:[%s9924_s1 + $0x574] ss:$24 sps:$4 sm:$0xff]  }
  0xa0   : > { %1730 = vmatprep.subr.bf16.mxu0 %v7555_v3  ;;  %v7656_v3 = vld [vmem:[%s9924_s1 + $0x5a4] ss:$24 sps:$4 sm:$0xff]  }
  0xa3   : > { %1731 = vmatpush1.bf16.msra.mxu0 %v7553_v8  ;;  %v7665_v8 = vld [vmem:[%s9924_s1 + $0x584] ss:$24 sps:$4 sm:$0xff]  }
  0xa4   : > { %6226 = vmatprep.subr.msk.bf16.mxu0 %vm462_vm0, %v7559_v9  ;;  %v7663_v9 = vld [vmem:[%s9924_s1 + $0x580] ss:$24 sps:$4 sm:$0xff]  }
  0xa7   : > { %1733 = vmatpush1.bf16.msra.mxu0 %v1635_v17  ;;  %v7677_v17 = vld [vmem:[%s9924_s1 + $0x634] ss:$24 sps:$4 sm:$0xff]  }
  0xa8   : > { %1953 = vmatprep.subr.bf16.mxu0 %v7568_v19  ;;  %v7674_v19 = vld [vmem:[%s9924_s1 + $0x604] ss:$24 sps:$4 sm:$0xff]  }
  0xaa   : > { %6227 = vmatmul.mubr.msk.bf16.vlgmr.msra.gmra.mrb[4].mxu0 %vm458_vm1, %v8456_v0  ;;  %v8714_v0 = vcombine.low %v8018_v28, %v8468_v5  ;;  %v1936_v5 = vsel %vm462_vm0, %v7586_v31, 0  ;;  %v7686_v28 = vld [vmem:[%s9924_s1 + $0x614] ss:$24 sps:$4 sm:$0xff]   ;;  %v2854_v31 = vsel %vm462_vm0, %v7683_v26, 0 }
  0xab   : > { %1954 = vmatpush1.bf16.msra.mxu0 %v7566_v20  ;;  %1985 = vmatprep.mubr.bf16.mxu0 %v8608_v51  ;;  %v7696_v20 = vld [vmem:[%s9926_s3] ss:$12 sps:$4 sm:$0xff]  }
  0xac   : > { %1955 = vmatprep.subr.bf16.mxu0 %v7574_v21  ;;  %6443 = vmatmul.mubr.msk.bf16.vlgmr.msra.gmra.mrb[0].mxu1 %vm458_vm1, %v8714_v0  ;;  %v7698_v21 = vld [vmem:[%s9926_s3 + $0x4] ss:$12 sps:$4 sm:$0xff]  }
  0xad   : > { %4051 = vmatprep.subr.bf16.mxu1 %v7698_v21 }
  0xae   : > { %4052 = vmatpush1.bf16.msra.mxu1 %v7696_v20 }
  0xaf   : > { %1956 = vmatpush1.bf16.msra.mxu0 %v7572_v24  ;;  %v7681_v24 = vld [vmem:[%s9924_s1 + $0x694] ss:$24 sps:$4 sm:$0x3f]  }
  0xb0   : > { %1957 = vmatprep.subr.bf16.mxu0 %v7580_v25  ;;  %v7699_v25 = vld [vmem:[%s9926_s3 + $0x18] ss:$12 sps:$4 sm:$0xff]  }
  0xb3   : > { %1958 = vmatpush1.bf16.msra.mxu0 %v7578_v27  ;;  %v7704_v27 = vld [vmem:[%s9926_s3 + $0x34] ss:$12 sps:$4 sm:$0xff]  }
  0xb4   : > { %6277 = vmatprep.subr.msk.bf16.mxu0 %vm462_vm0, %v7584_v30  ;;  %v7702_v30 = vld [vmem:[%s9926_s3 + $0x30] ss:$12 sps:$4 sm:$0xff]  }
  0xb7   : > { %1960 = vmatpush1.bf16.msra.mxu0 %v1936_v5  ;;  %v7707_v5 = vld [vmem:[%s9926_s3 + $0x4c] ss:$12 sps:$4 sm:$0xff]  }
  0xb8   : > { %2039 = vmatprep.subr.bf16.mxu0 %v7592_v41  ;;  %v7695_v41 = vld [vmem:[%s9924_s1 + $0x6a0] ss:$24 sps:$4 sm:$0x3f]  }
  0xba   : > { %6278 = vmatmul.mubr.msk.bf16.vlgmr.msra.gmra.mrb[0].mxu0 %vm458_vm1, %v8533_v29 }
  0xbb   : > { %2040 = vmatpush1.bf16.msra.mxu0 %v7590_v32  ;;  %2071 = vmatprep.mubr.bf16.mxu0 %v8608_v51  ;;  %v7684_v32 = vld [vmem:[%s9924_s1 + $0x610] ss:$24 sps:$4 sm:$0xff]  }
  0xbc   : > { %2041 = vmatprep.subr.bf16.mxu0 %v7598_v33  ;;  %v7689_v33 = vld [vmem:[%s9924_s1 + $0x644] ss:$24 sps:$4 sm:$0xff]  }
  0xbf   : > { %2042 = vmatpush1.bf16.msra.mxu0 %v7596_v34  ;;  %v2866_v34 = vsel %vm462_vm0, %v7695_v41, 0 }
  0xc0   : > { %2043 = vmatprep.subr.bf16.mxu0 %v7604_v35  ;;  %v7705_v35 = vld [vmem:[%s9926_s3 + $0x48] ss:$12 sps:$4 sm:$0xff]  }
  0xc3   : > { %2044 = vmatpush1.bf16.msra.mxu0 %v7602_v36  ;;  %v7687_v36 = vld [vmem:[%s9924_s1 + $0x640] ss:$24 sps:$4 sm:$0xff]  }
  0xc4   : > { %6281 = vmatprep.subr.msk.bf16.mxu0 %vm462_vm0, %v7608_v37  ;;  %v7710_v37 = vld [vmem:[%s9926_s3 + $0x64] ss:$12 sps:$4 sm:$0xff]  }
  0xc7   : > { %2046 = vmatpush1.bf16.msra.mxu0 %v1948_v40  ;;  %v7713_v40 = vld [vmem:[%s9926_s3 + $0x7c] ss:$12 sps:$4 sm:$0xff]  }
  0xc8   : > { %2258 = vmatprep.subr.bf16.mxu0 %v7616_v39  ;;  %v7708_v39 = vld [vmem:[%s9926_s3 + $0x60] ss:$12 sps:$4 sm:$0xff]  }
  0xca   : > { %6282 = vmatmul.mubr.msk.bf16.vlgmr.msra.gmra.mrb[4].mxu0 %vm458_vm1, %v8533_v29  ;;  %v7671_v29 = vld [vmem:[%s9924_s1 + $0x5e0] ss:$24 sps:$4 sm:$0x3f]  }
  0xcb   : > { %2259 = vmatpush1.bf16.msra.mxu0 %v7614_v42  ;;  %2290 = vmatprep.mubr.bf16.mxu0 %v8608_v51  ;;  %v2564_v53 = vsel %vm462_vm0, %v7671_v29, 0  ;;  %v7690_v42 = vld [vmem:[%s9924_s1 + $0x670] ss:$24 sps:$4 sm:$0xff]  }
  0xcc   : > { %2260 = vmatprep.subr.bf16.mxu0 %v7622_v43  ;;  %v7693_v43 = vld [vmem:[%s9924_s1 + $0x6a4] ss:$24 sps:$4 sm:$0x3f]   ;;  %v7724_v29 = vld [vmem:[%s9926_s3 + $0x8] ss:$12 sps:$4 sm:$0xff]  }
  0xcf   : > { %2261 = vmatpush1.bf16.msra.mxu0 %v7620_v44  ;;  %v7711_v44 = vld [vmem:[%s9926_s3 + $0x78] ss:$12 sps:$4 sm:$0xff]  }
  0xd0   : > { %2262 = vmatprep.subr.bf16.mxu0 %v7628_v45  ;;  %v7716_v45 = vld [vmem:[%s9926_s3 + $0x94] ss:$12 sps:$4 sm:$0xff]  }
  0xd3   : > { %2263 = vmatpush1.bf16.msra.mxu0 %v7626_v46  ;;  %v7717_v46 = vld [vmem:[%s9926_s3 + $0xa8] ss:$12 sps:$4 sm:$0xff]  }
  0xd4   : > { %6331 = vmatprep.subr.msk.bf16.mxu0 %vm462_vm0, %v7632_v48  ;;  %v7728_v48 = vld [vmem:[%s9926_s3 + $0xe0] ss:$12 sps:$4 sm:$0xff]  }
  0xd7   : > { %2265 = vmatpush1.bf16.msra.mxu0 %v2241_v49  ;;  %v7722_v49 = vld [vmem:[%s9926_s3 + $0xc4] ss:$12 sps:$4 sm:$0xff]  }
  0xd8   : > { %2344 = vmatprep.subr.bf16.mxu0 %v7638_v54  ;;  %v7727_v54 = vld [vmem:[%s9926_s3 + $0xdc] ss:$12 sps:$4 sm:$0xff]  }
  0xda   : > { %6332 = vmatmul.mubr.msk.bf16.vlgmr.msra.gmra.mrb[0].mxu0 %vm458_vm1, %v8595_v47 }
  0xdb   : > { %2345 = vmatpush1.bf16.msra.mxu0 %v7636_v55  ;;  %2376 = vmatprep.mubr.bf16.mxu0 %v8608_v51  ;;  %v7725_v55 = vld [vmem:[%s9926_s3 + $0xd8] ss:$12 sps:$4 sm:$0xff]  }
  0xdc   : > { %2346 = vmatprep.subr.bf16.mxu0 %v7641_v56  ;;  %v7738_v56 = vld [vmem:[%s9926_s3 + $0x110] ss:$12 sps:$4 sm:$0xff]  }
  0xdf   : > { %2347 = vmatpush1.bf16.msra.mxu0 %v7639_v57  ;;  %v7732_v57 = vld [vmem:[%s9926_s3 + $0xf4] ss:$12 sps:$4 sm:$0xff]  }
  0xe0   : > { %2348 = vmatprep.subr.bf16.mxu0 %v7644_v58  ;;  %v7739_v58 = vld [vmem:[%s9926_s3 + $0x50] ss:$12 sps:$4 sm:$0xff]  }
  0xe3   : > { %2349 = vmatpush1.bf16.msra.mxu0 %v7642_v59  ;;  %v7730_v59 = vld [vmem:[%s9926_s3 + $0xf0] ss:$12 sps:$4 sm:$0xff]  }
  0xe4   : > { %6335 = vmatprep.subr.msk.bf16.mxu0 %vm462_vm0, %v7645_v60  ;;  %v7743_v60 = vld [vmem:[%s9926_s3 + $0x128] ss:$12 sps:$4 sm:$0xff]  }
  0xe7   : > { %2351 = vmatpush1.bf16.msra.mxu0 %v2253_v50  ;;  %v7729_v50 = vld [vmem:[%s9926_s3 + $0x20] ss:$12 sps:$4 sm:$0xff]  }
  0xe8   : > { %2569 = vmatprep.subr.bf16.mxu0 %v7650_v61  ;;  %v7737_v61 = vld [vmem:[%s9926_s3 + $0x10c] ss:$12 sps:$4 sm:$0xff]  }
  0xea   : > { %6336 = vmatmul.mubr.msk.bf16.vlgmr.msra.gmra.mrb[4].mxu0 %vm458_vm1, %v8595_v47  ;;  %v7662_v47 = vld [vmem:[%s9924_s1 + $0x554] ss:$24 sps:$4 sm:$0xff]  }
  0xeb   : > { %2570 = vmatpush1.bf16.msra.mxu0 %v7648_v62  ;;  %2601 = vmatprep.mubr.bf16.mxu0 %v8608_v51  ;;  %v7744_v62 = vld [vmem:[%s9926_s3 + $0x68] ss:$12 sps:$4 sm:$0xff]  }
  0xec   : > { %2571 = vmatprep.subr.bf16.mxu0 %v7653_v63  ;;  %v7735_v63 = vld [vmem:[%s9926_s3 + $0x108] ss:$12 sps:$4 sm:$0xff]  }
  0xef   : > { %2572 = vmatpush1.bf16.msra.mxu0 %v7651_v1  ;;  %v7748_v1 = vld [vmem:[%s9926_s3 + $0x140] ss:$12 sps:$4 sm:$0xff]  }
  0xf0   : > { %2573 = vmatprep.subr.bf16.mxu0 %v7656_v3  ;;  %v7742_v3 = vld [vmem:[%s9926_s3 + $0x124] ss:$12 sps:$4 sm:$0xff]  }
  0xf3   : > { %2574 = vmatpush1.bf16.msra.mxu0 %v7654_v4  ;;  %v7749_v4 = vld [vmem:[%s9926_s3 + $0x80] ss:$12 sps:$4 sm:$0xff]  }
  0xf4   : > { %6385 = vmatprep.subr.msk.bf16.mxu0 %vm462_vm0, %v7657_v6  ;;  %v7740_v6 = vld [vmem:[%s9926_s3 + $0x120] ss:$12 sps:$4 sm:$0xff]  }
  0xf7   : > { %2576 = vmatpush1.bf16.msra.mxu0 %v2552_v52  ;;  %v7720_v52 = vld [vmem:[%s9926_s3 + $0xc0] ss:$12 sps:$4 sm:$0xff]  }
  0xf8   : > { %2655 = vmatprep.subr.bf16.mxu0 %v7662_v47  ;;  %v7747_v47 = vld [vmem:[%s9926_s3 + $0x13c] ss:$12 sps:$4 sm:$0xff]  }
  0xfa   : > { %6386 = vmatmul.mubr.msk.bf16.vlgmr.msra.gmra.mrb[0].mxu0 %vm458_vm1, %v8661_v10 }
  0xfb   : > { %2656 = vmatpush1.bf16.msra.mxu0 %v7660_v7  ;;  %2687 = vmatprep.mubr.bf16.mxu0 %v8608_v51  ;;  %v7672_v51 = vld [vmem:[%s9924_s1 + $0x600] ss:$24 sps:$4 sm:$0xff]  }
  0xfc   : > { %2657 = vmatprep.subr.bf16.mxu0 %v7665_v8  ;;  %v7745_v7 = vld [vmem:[%s9926_s3 + $0x138] ss:$12 sps:$4 sm:$0xff]   ;;  %v7752_v8 = vld [vmem:[%s9926_s3 + $0x154] ss:$12 sps:$4 sm:$0xff]  }
  0xff   : > { %2658 = vmatpush1.bf16.msra.mxu0 %v7663_v9  ;;  %v7753_v9 = vld [vmem:[%s9926_s3 + $0x158] ss:$12 sps:$4 sm:$0xff]  }
 0x100   : > { %2659 = vmatprep.subr.bf16.mxu0 %v7668_v14  ;;  %v7750_v14 = vld [vmem:[%s9926_s3 + $0x150] ss:$12 sps:$4 sm:$0xff]  }
 0x103   : > { %2660 = vmatpush1.bf16.msra.mxu0 %v7666_v15  ;;  %v7754_v15 = vld [vmem:[%s9926_s3 + $0x98] ss:$12 sps:$4 sm:$0xff]  }
 0x104   : > { %6389 = vmatprep.subr.msk.bf16.mxu0 %vm462_vm0, %v7669_v16  ;;  %v7757_v16 = vld [vmem:[%s9926_s3 + $0x16c] ss:$12 sps:$4 sm:$0xff]  }
 0x107   : > { %2662 = vmatpush1.bf16.msra.mxu0 %v2564_v53  ;;  %v7733_v53 = vld [vmem:[%s9926_s3 + $0xf8] ss:$12 sps:$4 sm:$0xff]  }
 0x108   : > { %2871 = vmatprep.subr.bf16.mxu0 %v7674_v19  ;;  %v7758_v19 = vld [vmem:[%s9926_s3 + $0x170] ss:$12 sps:$4 sm:$0xff]  }
 0x10a   : > { %6390 = vmatmul.mubr.msk.bf16.vlgmr.msra.gmra.mrb[4].mxu0 %vm458_vm1, %v8661_v10  ;;  %v7701_v10 = vld [vmem:[%s9926_s3 + $0x1c] ss:$12 sps:$4 sm:$0xff]  }
 0x10b   : > { %2872 = vmatpush1.bf16.msra.mxu0 %v7672_v51  ;;  %2903 = vmatprep.mubr.bf16.mxu0 %v8019_v12  ;;  %v7755_v51 = vld [vmem:[%s9926_s3 + $0x168] ss:$12 sps:$4 sm:$0xff]  }
 0x10c   : > { %2873 = vmatprep.subr.bf16.mxu0 %v7677_v17  ;;  %4053 = vmatprep.subr.bf16.mxu1 %v7701_v10  ;;  %v7759_v17 = vld [vmem:[%s9926_s3 + $0xb0] ss:$12 sps:$4 sm:$0xff]   ;;  %v3012_v10 = vld [vmem:[%s9925_s2] sm:$0x3f] }
 0x10d   : > { %4054 = vmatpush1.bf16.msra.mxu1 %v7699_v25 }
 0x10e   : > { %4055 = vmatprep.subr.bf16.mxu1 %v7704_v27 }
 0x10f   : > { %2874 = vmatpush1.bf16.msra.mxu0 %v7675_v18  ;;  %v3014_v18 = vlaneseq }
 0x110   : > { %2875 = vmatprep.subr.bf16.mxu0 %v7680_v13  ;;  %v7763_v13 = vld [vmem:[%s9926_s3 + $0x248] ss:$12 sps:$4 sm:$0xff]  }
 0x111   : > { %4056 = vmatpush1.bf16.msra.mxu1 %v7702_v30  ;;  %v9079_v20 = vshrl.u32 %v3014_v18, 7 }
 0x112   : > { %4057 = vmatprep.subr.bf16.mxu1 %v7707_v5 }
 0x113   : > { %2876 = vmatpush1.bf16.msra.mxu0 %v7678_v23  ;;  %v3024_v21 = vsub.s32 2, %v9079_v20  ;;  %v3028_v23 = vsub.s32 3, %v9079_v20 }
 0x114   : > { %6440 = vmatprep.subr.msk.bf16.mxu0 %vm462_vm0, %v7681_v24 }
 0x115   : > { %4058 = vmatpush1.bf16.msra.mxu1 %v7705_v35  ;;  %v3025_v24 = vrot.slane %v3012_v10, %v3024_v21  ;;  %v3029_v25 = vrot.slane %v3012_v10, %v3028_v23 }
 0x116   : > { %4059 = vmatprep.subr.bf16.mxu1 %v7710_v37 }
 0x117   : > { %2878 = vmatpush1.bf16.msra.mxu0 %v2854_v31 }
 0x118   : > { %2957 = vmatprep.subr.bf16.mxu0 %v7686_v28 }
 0x119   : > { %4060 = vmatpush1.bf16.msra.mxu1 %v7708_v39  ;;  %v3016_v39 = vsub.s32 0, %v9079_v20 }
 0x11a   : > { %6441 = vmatmul.mubr.msk.bf16.vlgmr.msra.gmra.mrb[0].mxu0 %vm458_vm1, %v8714_v0  ;;  %4061 = vmatprep.subr.bf16.mxu1 %v7713_v40  ;;  %v3020_v40 = vsub.s32 1, %v9079_v20 }
 0x11b   : > { %2958 = vmatpush1.bf16.msra.mxu0 %v7684_v32  ;;  %2989 = vmatprep.mubr.bf16.mxu0 %v8019_v12  ;;  %v7762_v12 = vld [vmem:[%s9926_s3 + $0x184] ss:$12 sps:$4 sm:$0xff]  }
 0x11c   : > { %2959 = vmatprep.subr.bf16.mxu0 %v7689_v33 }
 0x11d   : > { %4062 = vmatpush1.bf16.msra.mxu1 %v7711_v44 }
 0x11e   : > { %4063 = vmatprep.subr.bf16.mxu1 %v7716_v45 }
 0x11f   : > { %2960 = vmatpush1.bf16.msra.mxu0 %v7687_v36 }
 0x120   : > { %2961 = vmatprep.subr.bf16.mxu0 %v7692_v38 }
 0x121   : > { %4064 = vmatpush1.bf16.msra.mxu1 %v7714_v22 }
 0x122   : > { %4065 = vmatprep.subr.bf16.mxu1 %v7719_v2 }
 0x123   : > { %2962 = vmatpush1.bf16.msra.mxu0 %v7690_v42  ;;  %v3017_v42 = vrot.slane %v3012_v10, %v3016_v39 }
 0x124   : > { %6444 = vmatprep.subr.msk.bf16.mxu0 %vm462_vm0, %v7693_v43  ;;  %v3021_v43 = vrot.slane %v3012_v10, %v3020_v40 }
 0x125   : > { %4066 = vmatpush1.bf16.msra.mxu1 %v7717_v46 }
 0x126   : > { %4067 = vmatprep.subr.bf16.mxu1 %v7722_v49 }
 0x127   : > { %2964 = vmatpush1.bf16.msra.mxu0 %v2866_v34 }
 0x128   : > { %6928 = vmatprep.subr.bf16.mxu0 %v7723_v11 }
 0x129   : > { %4068 = vmatpush1.bf16.msra.mxu1 %v7720_v52 }
 0x12a   : > { %6445 = vmatmul.mubr.msk.bf16.vlgmr.msra.gmra.mrb[4].mxu0 %vm458_vm1, %v8714_v0  ;;  %v7734_v0 = vld [vmem:[%s9926_s3 + $0x38] ss:$12 sps:$4 sm:$0xff]   ;;  %4069 = vmatprep.subr.bf16.mxu1 %v7727_v54 }
 0x12b   : > { %6929 = vmatpush3.bf16.msra.mxu0 %v7724_v29 }
 0x12c   : > { %6930 = vmatprep.subr.bf16.mxu0 %v7728_v48 }
 0x12d   : > { %4070 = vmatpush1.bf16.msra.mxu1 %v7725_v55  ;;  %v7760_v55 = vld [vmem:[%s9926_s3 + $0x180] ss:$12 sps:$4 sm:$0xff]  }
 0x12e   : > { %4071 = vmatprep.subr.bf16.mxu1 %v7732_v57  ;;  %v3032_v57 = vsub.s32 4, %v9079_v20 }
 0x12f   : > { %6931 = vmatpush3.bf16.msra.mxu0 %v7729_v50 }
 0x130   : > { %6932 = vmatprep.subr.bf16.mxu0 %v7733_v53 }
 0x131   : > { %4072 = vmatpush1.bf16.msra.mxu1 %v7730_v59  ;;  %v7768_v59 = vld [vmem:[%s9926_s3 + $0x260] ss:$12 sps:$4 sm:$0xff]  }
 0x132   : > { %4073 = vmatprep.subr.bf16.mxu1 %v7737_v61  ;;  %v7765_v61 = vld [vmem:[%s9926_s3 + $0x198] ss:$12 sps:$4 sm:$0xff]  }
 0x133   : > { %6933 = vmatpush3.bf16.msra.mxu0 %v7734_v0 }
 0x134   : > { %6934 = vmatprep.subr.bf16.mxu0 %v7738_v56  ;;  %v7764_v56 = vld [vmem:[%s9926_s3 + $0x188] ss:$12 sps:$4 sm:$0xff]  }
 0x135   : > { %4074 = vmatpush1.bf16.msra.mxu1 %v7735_v63  ;;  %v3033_v63 = vrot.slane %v3012_v10, %v3032_v57  ;;  %v7818_v57 = vld [vmem:[%s9926_s3 + $0x2d0] ss:$12 sps:$4 sm:$0xff]  }
 0x136   : > { %4075 = vmatprep.subr.bf16.mxu1 %v7742_v3  ;;  %v7773_v3 = vld [vmem:[%s9926_s3 + $0x278] ss:$12 sps:$4 sm:$0xff]  }
 0x137   : > { %6935 = vmatpush3.bf16.msra.mxu0 %v7739_v58  ;;  %v7767_v58 = vld [vmem:[%s9926_s3 + $0x19c] ss:$12 sps:$4 sm:$0xff]  }
 0x138   : > { %6936 = vmatprep.subr.bf16.mxu0 %v7743_v60  ;;  %v3036_v60 = vsub.s32 5, %v9079_v20 }
 0x139   : > { %4076 = vmatpush1.bf16.msra.mxu1 %v7740_v6 }
 0x13a   : > { %4077 = vmatprep.subr.bf16.mxu1 %v7747_v47  ;;  %v7770_v47 = vld [vmem:[%s9926_s3 + $0x1b0] ss:$12 sps:$4 sm:$0xff]  }
 0x13b   : > { %6937 = vmatpush3.bf16.msra.mxu0 %v7744_v62  ;;  %v7769_v62 = vld [vmem:[%s9926_s3 + $0x1a0] ss:$12 sps:$4 sm:$0xff]  }
 0x13c   : > { %6938 = vmatprep.subr.bf16.mxu0 %v7748_v1  ;;  %v7772_v1 = vld [vmem:[%s9926_s3 + $0x1b4] ss:$12 sps:$4 sm:$0xff]  }
 0x13d   : > { %4078 = vmatpush1.bf16.msra.mxu1 %v7745_v7  ;;  %v7774_v7 = vld [vmem:[%s9926_s3 + $0x1b8] ss:$12 sps:$4 sm:$0xff]  }
 0x13e   : > { %4079 = vmatprep.subr.bf16.mxu1 %v7752_v8 }
 0x13f   : > { %6939 = vmatpush3.bf16.msra.mxu0 %v7749_v4  ;;  %v3037_v4 = vrot.slane %v3012_v10, %v3036_v60  ;;  %v7826_v60 = vld [vmem:[%s9926_s3 + $0x304] ss:$12 sps:$4 sm:$0xff]  }
 0x140   : > { %6940 = vmatprep.subr.bf16.mxu0 %v7753_v9 }
 0x141   : > { %4080 = vmatpush1.bf16.msra.mxu1 %v7750_v14  ;;  %v7777_v14 = vld [vmem:[%s9926_s3 + $0x1cc] ss:$12 sps:$4 sm:$0xff]  }
 0x142   : > { %4081 = vmatprep.subr.bf16.mxu1 %v7757_v16 }
 0x143   : > { %6941 = vmatpush3.bf16.msra.mxu0 %v7754_v15  ;;  %v7778_v15 = vld [vmem:[%s9926_s3 + $0x290] ss:$12 sps:$4 sm:$0xff]  }
 0x144   : > { %6942 = vmatprep.subr.bf16.mxu0 %v7758_v19 }
 0x145   : > { %4082 = vmatpush1.bf16.msra.mxu1 %v7755_v51 }
 0x146   : > { %4094 = vmatprep.subr.bf16.mxu1 %v7762_v12  ;;  %v7775_v12 = vld [vmem:[%s9926_s3 + $0x1c8] ss:$12 sps:$4 sm:$0xff]  }
 0x147   : > { %6943 = vmatpush3.bf16.msra.mxu0 %v7759_v17 }
 0x148   : > { %6950 = vmatprep.subr.bf16.mxu0 %v7763_v13  ;;  %v7779_v13 = vld [vmem:[%s9926_s3 + $0x1d0] ss:$12 sps:$4 sm:$0xff]  }
 0x17f   : > { %v2948_v26 = vpop.f32.mrb[0].mxu1 }
 0x180   : > { %v3046_v27 = vadd.f32 %v3025_v24, %v2948_v26  ;;  %v2950_v28 = vpop.f32.mrb[1].mxu1 }
 0x181   : > { %v3047_v30 = vadd.f32 %v3029_v25, %v2950_v28  ;;  %v2952_v31 = vpop.f32.mrb[2].mxu1 }
 0x182   : > { %v3058_v41 = vmax.f32 %v3046_v27, 0.0  ;;  %v3052_v5 = vadd.f32 %v3025_v24, %v2952_v31  ;;  %v2954_v32 = vpop.f32.mrb[3].mxu1  ;;  %v7782_v24 = vld [vmem:[%s9926_s3 + $0x1e4] ss:$12 sps:$4 sm:$0xff]   ;;  %v7780_v31 = vld [vmem:[%s9926_s3 + $0x1e0] ss:$12 sps:$4 sm:$0xff]  }
 0x183   : > { %v3059_v33 = vmax.f32 %v3047_v30, 0.0  ;;  %v3053_v34 = vadd.f32 %v3029_v25, %v2954_v32  ;;  %v7783_v25 = vld [vmem:[%s9926_s3 + $0x2a8] ss:$12 sps:$4 sm:$0xff]   ;;  %v7788_v32 = vld [vmem:[%s9926_s3 + $0x2c0] ss:$12 sps:$4 sm:$0xff]  }
 0x184   : > { %v3064_v35 = vmax.f32 %v3052_v5, 0.0  ;;  %v7787_v5 = vld [vmem:[%s9926_s3 + $0x1fc] ss:$12 sps:$4 sm:$0xff]  }
 0x185   : > { %v3065_v36 = vmax.f32 %v3053_v34, 0.0  ;;  %v7789_v34 = vld [vmem:[%s9926_s3 + $0x200] ss:$12 sps:$4 sm:$0xff]  }
 0x186   : > { %v9088_v37 = vpack.c.bf16 %v3064_v35, %v3058_v41  ;;  %v7784_v41 = vld [vmem:[%s9926_s3 + $0x1e8] ss:$12 sps:$4 sm:$0xff]  }
 0x187   : > { %v3071_v38 = vpack.c.bf16 %v3065_v36, %v3059_v33  ;;  %v7785_v33 = vld [vmem:[%s9926_s3 + $0x1f8] ss:$12 sps:$4 sm:$0xff]   ;;  %v7792_v35 = vld [vmem:[%s9926_s3 + $0x214] ss:$12 sps:$4 sm:$0xff]  }
 0x188   : > { %v7793_v36 = vld [vmem:[%s9926_s3 + $0x2d8] ss:$12 sps:$4 sm:$0xff]  }
 0x1ed   : > { %v2905_v44 = vpop.f32.mrb[0].mxu0 }
 0x1ee   : > { %v3044_v45 = vadd.f32 %v3017_v42, %v2905_v44  ;;  %v2907_v22 = vpop.f32.mrb[1].mxu0  ;;  %v7798_v44 = vld [vmem:[%s9926_s3 + $0x2f0] ss:$12 sps:$4 sm:$0xff]  }
 0x1ef   : > { %v3045_v11 = vadd.f32 %v3021_v43, %v2907_v22  ;;  %v2909_v2 = vpop.f32.mrb[2].mxu0  ;;  %v7799_v22 = vld [vmem:[%s9926_s3 + $0x230] ss:$12 sps:$4 sm:$0xff]  }
 0x1f0   : > { %v3050_v29 = vadd.f32 %v3017_v42, %v2909_v2  ;;  %v2911_v46 = vpop.f32.mrb[3].mxu0  ;;  %v3056_v49 = vmax.f32 %v3044_v45, 0.0  ;;  %v7794_v42 = vld [vmem:[%s9926_s3 + $0x218] ss:$12 sps:$4 sm:$0xff]   ;;  %v7795_v45 = vld [vmem:[%s9926_s3 + $0x228] ss:$12 sps:$4 sm:$0xff]  }
 0x1f1   : > { %v3051_v48 = vadd.f32 %v3021_v43, %v2911_v46  ;;  %v3057_v52 = vmax.f32 %v3045_v11, 0.0  ;;  %v7797_v43 = vld [vmem:[%s9926_s3 + $0x22c] ss:$12 sps:$4 sm:$0xff]   ;;  %v7802_v11 = vld [vmem:[%s9926_s3 + $0x244] ss:$12 sps:$4 sm:$0xff]  }
 0x1f2   : > { %v3062_v50 = vmax.f32 %v3050_v29, 0.0  ;;  %v7800_v2 = vld [vmem:[%s9926_s3 + $0x240] ss:$12 sps:$4 sm:$0xff]   ;;  %v7805_v29 = vld [vmem:[%s9926_s3 + $0x25c] ss:$12 sps:$4 sm:$0xff]  }
 0x1f3   : > { %v3063_v53 = vmax.f32 %v3051_v48, 0.0  ;;  %v7803_v46 = vld [vmem:[%s9926_s3 + $0x258] ss:$12 sps:$4 sm:$0xff]   ;;  %v7808_v48 = vld [vmem:[%s9926_s3 + $0x274] ss:$12 sps:$4 sm:$0xff]  }
 0x1f4   : > { %v3068_v54 = vpack.c.bf16 %v3062_v50, %v3056_v49  ;;  %v7806_v49 = vld [vmem:[%s9926_s3 + $0x270] ss:$12 sps:$4 sm:$0xff]   ;;  %v7811_v50 = vld [vmem:[%s9926_s3 + $0x28c] ss:$12 sps:$4 sm:$0xff]  }
 0x1f5   : > { %v3069_v0 = vpack.c.bf16 %v3063_v53, %v3057_v52  ;;  %v7809_v52 = vld [vmem:[%s9926_s3 + $0x288] ss:$12 sps:$4 sm:$0xff]   ;;  %v7814_v53 = vld [vmem:[%s9926_s3 + $0x2a4] ss:$12 sps:$4 sm:$0xff]  }
 0x1f7   : > { %4083 = vmatprep.mubr.bf16.mxu1 %v3069_v0  ;;  %4212 = vmatprep.mubr.bf16.mxu0 %v3069_v0  ;;  %v7817_v0 = vld [vmem:[%s9926_s3 + $0x2bc] ss:$12 sps:$4 sm:$0xff]  }
 0x1f8   : > { %4084 = vmatmul.mubr.bf16.vlgmr.msra.gmra.mrb[4].mxu1 %v3068_v54  ;;  %4213 = vmatmul.mubr.bf16.vlgmr.msra.gmra.mrb[8].mxu0 %v3068_v54  ;;  %v7812_v54 = vld [vmem:[%s9926_s3 + $0x2a0] ss:$12 sps:$4 sm:$0xff]  }
 0x1f9   : > { %4095 = vmatpush1.bf16.msra.mxu1 %v7760_v55  ;;  %6951 = vmatpush3.bf16.msra.mxu0 %v7764_v56  ;;  %v7815_v55 = vld [vmem:[%s9926_s3 + $0x2b8] ss:$12 sps:$4 sm:$0xff]   ;;  %v7820_v56 = vld [vmem:[%s9926_s3 + $0x2d4] ss:$12 sps:$4 sm:$0xff]  }
 0x1fa   : > { %4126 = vmatprep.mubr.bf16.mxu1 %v3071_v38  ;;  %4253 = vmatprep.mubr.bf16.mxu0 %v3071_v38  ;;  %v7790_v38 = vld [vmem:[%s9926_s3 + $0x210] ss:$12 sps:$4 sm:$0xff]  }
 0x1fb   : > { %4096 = vmatprep.subr.bf16.mxu1 %v7767_v58  ;;  %6952 = vmatprep.subr.bf16.mxu0 %v7768_v59  ;;  %v7823_v58 = vld [vmem:[%s9926_s3 + $0x2ec] ss:$12 sps:$4 sm:$0xff]   ;;  %v7821_v59 = vld [vmem:[%s9926_s3 + $0x2e8] ss:$12 sps:$4 sm:$0xff]  }
 0x1fd   : > { %4097 = vmatpush1.bf16.msra.mxu1 %v7765_v61  ;;  %6953 = vmatpush3.bf16.msra.mxu0 %v7769_v62  ;;  %v2991_v6 = vpop.f32.mrb[4].mxu0  ;;  %v7824_v61 = vld [vmem:[%s9926_s3 + $0x300] ss:$12 sps:$4 sm:$0xff]   ;;  %v7829_v62 = vld [vmem:[%s9926_s3 + $0x31c] ss:$12 sps:$4 sm:$0xff]  }
 0x1fe   : > { %v3048_v8 = vadd.f32 %v3033_v63, %v2991_v6  ;;  %v2993_v9 = vpop.f32.mrb[5].mxu0  ;;  %4098 = vmatprep.subr.bf16.mxu1 %v7772_v1  ;;  %6954 = vmatprep.subr.bf16.mxu0 %v7773_v3  ;;  %v7832_v1 = vld [vmem:[%s9926_s3 + $0x334] ss:$12 sps:$4 sm:$0xff]   ;;  %v7830_v3 = vld [vmem:[%s9926_s3 + $0x330] ss:$12 sps:$4 sm:$0xff]  }
 0x1ff   : > { %v3049_v16 = vadd.f32 %v3037_v4, %v2993_v9  ;;  %v2995_v19 = vpop.f32.mrb[6].mxu0  ;;  %v7838_v6 = vld [vmem:[%s9926_s3 + $0x364] ss:$12 sps:$4 sm:$0xff]   ;;  %v7844_v9 = vld [vmem:[%s9926_s3 + $0x394] ss:$12 sps:$4 sm:$0xff]  }
 0x200   : > { %v3054_v51 = vadd.f32 %v3033_v63, %v2995_v19  ;;  %v2997_v17 = vpop.f32.mrb[7].mxu0  ;;  %v3060_v10 = vmax.f32 %v3048_v8, 0.0  ;;  %v7827_v63 = vld [vmem:[%s9926_s3 + $0x318] ss:$12 sps:$4 sm:$0xff]  }
 0x201   : > { %v3055_v18 = vadd.f32 %v3037_v4, %v2997_v17  ;;  %4099 = vmatpush1.bf16.msra.mxu1 %v7770_v47  ;;  %6955 = vmatpush3.bf16.msra.mxu0 %v7774_v7  ;;  %v3061_v26 = vmax.f32 %v3049_v16, 0.0  ;;  %v7833_v4 = vld [vmem:[%s9926_s3 + $0x348] ss:$12 sps:$4 sm:$0xff]   ;;  %v7836_v47 = vld [vmem:[%s9926_s3 + $0x360] ss:$12 sps:$4 sm:$0xff]  }
 0x202   : > { %v3066_v23 = vmax.f32 %v3054_v51, 0.0  ;;  %4100 = vmatprep.subr.bf16.mxu1 %v7777_v14  ;;  %6956 = vmatprep.subr.bf16.mxu0 %v7778_v15  ;;  %v7841_v7 = vld [vmem:[%s9926_s3 + $0x37c] ss:$12 sps:$4 sm:$0xff]   ;;  %v7839_v8 = vld [vmem:[%s9926_s3 + $0x378] ss:$12 sps:$4 sm:$0xff]  }
 0x203   : > { %v3067_v27 = vmax.f32 %v3055_v18, 0.0  ;;  %v7842_v14 = vld [vmem:[%s9926_s3 + $0x390] ss:$12 sps:$4 sm:$0xff]   ;;  %v7847_v15 = vld [vmem:[%s9926_s3 + $0x3ac] ss:$12 sps:$4 sm:$0xff]  }
 0x204   : > { %v9146_v28 = vpack.c.bf16 %v3066_v23, %v3060_v10  ;;  %v7845_v16 = vld [vmem:[%s9926_s3 + $0x3a8] ss:$12 sps:$4 sm:$0xff]   ;;  %v7850_v19 = vld [vmem:[%s9926_s3 + $0x3c4] ss:$12 sps:$4 sm:$0xff]   ;;  %v7848_v51 = vld [vmem:[%s9926_s3 + $0x3c0] ss:$12 sps:$4 sm:$0xff]  }
 0x205   : > { %v9148_v30 = vpack.c.bf16 %v3067_v27, %v3061_v26  ;;  %4101 = vmatpush1.bf16.msra.mxu1 %v7775_v12  ;;  %6957 = vmatpush3.bf16.msra.mxu0 %v7779_v13  ;;  %v7853_v17 = vld [vmem:[%s9926_s3 + $0x3dc] ss:$12 sps:$4 sm:$0xff]   ;;  %v7851_v18 = vld [vmem:[%s9926_s3 + $0x3d8] ss:$12 sps:$4 sm:$0xff]   ;;  %v7856_v12 = vld [vmem:[%s9926_s3 + $0x3f4] ss:$12 sps:$4 sm:$0xff]  }
 0x206   : > { %4102 = vmatprep.subr.bf16.mxu1 %v7782_v24  ;;  %6958 = vmatprep.subr.bf16.mxu0 %v7783_v25  ;;  %v7854_v13 = vld [vmem:[%s9926_s3 + $0x3f0] ss:$12 sps:$4 sm:$0xff]   ;;  %v7859_v10 = vld [vmem:[%s9926_s3 + $0x40c] ss:$12 sps:$4 sm:$0xff]   ;;  %v7857_v23 = vld [vmem:[%s9926_s3 + $0x408] ss:$12 sps:$4 sm:$0xff]  }
 0x207   : > { %v7862_v24 = vld [vmem:[%s9926_s3 + $0x424] ss:$12 sps:$4 sm:$0xff]   ;;  %v7860_v25 = vld [vmem:[%s9926_s3 + $0x420] ss:$12 sps:$4 sm:$0xff]   ;;  %v7865_v26 = vld [vmem:[%s9926_s3 + $0x43c] ss:$12 sps:$4 sm:$0xff]  }
 0x208   : > { %v7863_v27 = vld [vmem:[%s9926_s3 + $0x438] ss:$12 sps:$4 sm:$0xff]  }
 0x209   : > { %4103 = vmatpush1.bf16.msra.mxu1 %v7780_v31  ;;  %6959 = vmatpush3.bf16.msra.mxu0 %v7784_v41  ;;  %v7868_v31 = vld [vmem:[%s9926_s3 + $0x454] ss:$12 sps:$4 sm:$0xff]   ;;  %v7866_v41 = vld [vmem:[%s9926_s3 + $0x450] ss:$12 sps:$4 sm:$0xff]  }
 0x20a   : > { %4104 = vmatprep.subr.bf16.mxu1 %v7787_v5  ;;  %6960 = vmatprep.subr.bf16.mxu0 %v7788_v32  ;;  %v7871_v5 = vld [vmem:[%s9926_s3 + $0x46c] ss:$12 sps:$4 sm:$0xff]   ;;  %v7869_v32 = vld [vmem:[%s9926_s3 + $0x468] ss:$12 sps:$4 sm:$0xff]  }
 0x20d   : > { %4105 = vmatpush1.bf16.msra.mxu1 %v7785_v33  ;;  %6961 = vmatpush3.bf16.msra.mxu0 %v7789_v34  ;;  %v7888_v33 = vld [vmem:[%s9928_s5 + $0x100] sm:$0xff]  }
 0x20e   : > { %4106 = vmatprep.subr.bf16.mxu1 %v7792_v35  ;;  %6962 = vmatprep.subr.bf16.mxu0 %v7793_v36  ;;  %v7889_v34 = vld [vmem:[%s9928_s5 + $0xc0] sm:$0xff]   ;;  %v7872_v35 = vld [vmem:[%s9926_s3 + $0x3c8] ss:$12 sps:$4 sm:$0xff]  }
 0x20f   : > { %v7873_v36 = vld [vmem:[%s9926_s3 + $0x308] ss:$12 sps:$4 sm:$0xff]  }
 0x211   : > { %4107 = vmatpush1.bf16.msra.mxu1 %v7790_v38  ;;  %6963 = vmatpush3.bf16.msra.mxu0 %v7794_v42  ;;  %v7874_v38 = vld [vmem:[%s9926_s3 + $0x3e0] ss:$12 sps:$4 sm:$0xff]  }
 0x212   : > { %4108 = vmatprep.subr.bf16.mxu1 %v7797_v43  ;;  %6964 = vmatprep.subr.bf16.mxu0 %v7798_v44  ;;  %v7875_v42 = vld [vmem:[%s9926_s3 + $0x320] ss:$12 sps:$4 sm:$0xff]   ;;  %v7876_v43 = vld [vmem:[%s9926_s3 + $0x3f8] ss:$12 sps:$4 sm:$0xff]  }
 0x213   : > { %v7877_v44 = vld [vmem:[%s9926_s3 + $0x338] ss:$12 sps:$4 sm:$0xff]  }
 0x215   : > { %4109 = vmatpush1.bf16.msra.mxu1 %v7795_v45  ;;  %6965 = vmatpush3.bf16.msra.mxu0 %v7799_v22  ;;  %v7878_v45 = vld [vmem:[%s9926_s3 + $0x410] ss:$12 sps:$4 sm:$0xff]   ;;  %v7880_v22 = vld [vmem:[%s9926_s3 + $0x428] ss:$12 sps:$4 sm:$0xff]  }
 0x216   : > { %4110 = vmatprep.subr.bf16.mxu1 %v7802_v11  ;;  %6994 = vmatprep.subr.bf16.mxu0 %v7888_v33  ;;  %v7881_v11 = vld [vmem:[%s9926_s3 + $0x368] ss:$12 sps:$4 sm:$0xff]  }
 0x218   : > { %4254 = vmatmul.mubr.bf16.vlgmr.msra.gmra.mrb[12].mxu0 %v9088_v37 }
 0x219   : > { %4111 = vmatpush1.bf16.msra.mxu1 %v7800_v2  ;;  %6995 = vmatpush3.bf16.msra.mxu0 %v7889_v34  ;;  %v7882_v2 = vld [vmem:[%s9926_s3 + $0x440] ss:$12 sps:$4 sm:$0xff]  }
 0x21a   : > { %4112 = vmatprep.subr.bf16.mxu1 %v7805_v29  ;;  %v7883_v29 = vld [vmem:[%s9926_s3 + $0x380] ss:$12 sps:$4 sm:$0xff]  }
 0x21d   : > { %4113 = vmatpush1.bf16.msra.mxu1 %v7803_v46  ;;  %v7884_v46 = vld [vmem:[%s9926_s3 + $0x458] ss:$12 sps:$4 sm:$0xff]  }
 0x21e   : > { %4114 = vmatprep.subr.bf16.mxu1 %v7808_v48  ;;  %v7885_v48 = vld [vmem:[%s9926_s3 + $0x398] ss:$12 sps:$4 sm:$0xff]  }
 0x221   : > { %4115 = vmatpush1.bf16.msra.mxu1 %v7806_v49  ;;  %v7886_v49 = vld [vmem:[%s9926_s3 + $0x470] ss:$12 sps:$4 sm:$0xff]  }
 0x222   : > { %4116 = vmatprep.subr.bf16.mxu1 %v7811_v50  ;;  %v7887_v50 = vld [vmem:[%s9926_s3 + $0x3b0] ss:$12 sps:$4 sm:$0xff]  }
 0x225   : > { %4117 = vmatpush1.bf16.msra.mxu1 %v7809_v52  ;;  %v7890_v52 = vld [vmem:[%s9928_s5 + $0x108] sm:$0xff]  }
 0x226   : > { %4118 = vmatprep.subr.bf16.mxu1 %v7814_v53  ;;  %v7891_v53 = vld [vmem:[%s9928_s5 + $0xc8] sm:$0xff]   ;;  %6996 = vmatprep.subr.bf16.mxu0 %v7890_v52 }
 0x227   : > { %6997 = vmatpush3.bf16.msra.mxu0 %v7891_v53 }
 0x229   : > { %4119 = vmatpush1.bf16.msra.mxu1 %v7812_v54 }
 0x22a   : > { %4120 = vmatprep.subr.bf16.mxu1 %v7817_v0 }
 0x22d   : > { %4121 = vmatpush1.bf16.msra.mxu1 %v7815_v55  ;;  %v7892_v55 = vld [vmem:[%s9928_s5 + $0x110] sm:$0xff]  }
 0x22e   : > { %4122 = vmatprep.subr.bf16.mxu1 %v7820_v56  ;;  %6998 = vmatprep.subr.bf16.mxu0 %v7892_v55 }
 0x231   : > { %4123 = vmatpush1.bf16.msra.mxu1 %v7818_v57 }
 0x232   : > { %4124 = vmatprep.subr.bf16.mxu1 %v7823_v58 }
 0x235   : > { %4125 = vmatpush1.bf16.msra.mxu1 %v7821_v59 }
 0x236   : > { %4137 = vmatprep.subr.bf16.mxu1 %v7826_v60  ;;  %v7894_v60 = vld [vmem:[%s9928_s5 + $0x118] sm:$0xff]  }
 0x238   : > { %4127 = vmatmul.mubr.bf16.vlgmr.msra.gmra.mrb[4].mxu1 %v9088_v37  ;;  %v7835_v37 = vld [vmem:[%s9926_s3 + $0x34c] ss:$12 sps:$4 sm:$0xff]  }
 0x239   : > { %4138 = vmatpush1.bf16.msra.mxu1 %v7824_v61  ;;  %4169 = vmatprep.mubr.bf16.mxu1 %v9148_v30  ;;  %v7895_v61 = vld [vmem:[%s9928_s5 + $0xd8] sm:$0xff]  }
 0x23a   : > { %4139 = vmatprep.subr.bf16.mxu1 %v7829_v62  ;;  %v7896_v62 = vld [vmem:[%s9928_s5 + $0x120] sm:$0xff]  }
 0x23d   : > { %4140 = vmatpush1.bf16.msra.mxu1 %v7827_v63  ;;  %v7897_v63 = vld [vmem:[%s9928_s5 + $0xe0] sm:$0xff]  }
 0x23e   : > { %4141 = vmatprep.subr.bf16.mxu1 %v7832_v1  ;;  %v7898_v1 = vld [vmem:[%s9928_s5 + $0x128] sm:$0xff]  }
 0x241   : > { %4142 = vmatpush1.bf16.msra.mxu1 %v7830_v3  ;;  %v7899_v3 = vld [vmem:[%s9928_s5 + $0xe8] sm:$0xff]  }
 0x242   : > { %4143 = vmatprep.subr.bf16.mxu1 %v7835_v37  ;;  %v7900_v37 = vld [vmem:[%s9928_s5 + $0x130] sm:$0xff]  }
 0x245   : > { %4144 = vmatpush1.bf16.msra.mxu1 %v7833_v4  ;;  %v7901_v4 = vld [vmem:[%s9928_s5 + $0xf0] sm:$0xff]  }
 0x246   : > { %4145 = vmatprep.subr.bf16.mxu1 %v7838_v6  ;;  %v7902_v6 = vld [vmem:[%s9928_s5 + $0x138] sm:$0xff]  }
 0x249   : > { %4146 = vmatpush1.bf16.msra.mxu1 %v7836_v47  ;;  %v7903_v47 = vld [vmem:[%s9928_s5 + $0xf8] sm:$0xff]  }
 0x24a   : > { %4147 = vmatprep.subr.bf16.mxu1 %v7841_v7  ;;  %v7905_v7 = vld [vmem:[%s9928_s5 + $0x40] sm:$0xff]  }
 0x24d   : > { %4148 = vmatpush1.bf16.msra.mxu1 %v7839_v8  ;;  %v3266_v8 = vld [vmem:[%s9927_s4] sm:$0x7] }
 0x24e   : > { %4149 = vmatprep.subr.bf16.mxu1 %v7844_v9  ;;  %v8029_v9 = vmov 0.0   ;;  %v3275_v33 = vrot.slane %v3266_v8, %v3020_v40 }
 0x251   : > { %4150 = vmatpush1.bf16.msra.mxu1 %v7842_v14  ;;  %v3279_v14 = vrot.slane %v3266_v8, %v3024_v21 }
 0x252   : > { %4151 = vmatprep.subr.bf16.mxu1 %v7847_v15  ;;  %v7908_v15 = vld [vmem:[%s9928_s5 + $0x140] sm:$0xff]  }
 0x255   : > { %4152 = vmatpush1.bf16.msra.mxu1 %v7845_v16 }
 0x256   : > { %4153 = vmatprep.subr.bf16.mxu1 %v7850_v19 }
 0x259   : > { %4154 = vmatpush1.bf16.msra.mxu1 %v7848_v51 }
 0x25a   : > { %4155 = vmatprep.subr.bf16.mxu1 %v7853_v17 }
 0x25d   : > { %4156 = vmatpush1.bf16.msra.mxu1 %v7851_v18 }
 0x25e   : > { %4157 = vmatprep.subr.bf16.mxu1 %v7856_v12 }
 0x261   : > { %4158 = vmatpush1.bf16.msra.mxu1 %v7854_v13  ;;  %v7911_v13 = vld [vmem:[%s9928_s5 + $0x148] sm:$0xff]  }
 0x262   : > { %4159 = vmatprep.subr.bf16.mxu1 %v7859_v10 }
 0x265   : > { %4160 = vmatpush1.bf16.msra.mxu1 %v7857_v23 }
 0x266   : > { %4161 = vmatprep.subr.bf16.mxu1 %v7862_v24 }
 0x269   : > { %4162 = vmatpush1.bf16.msra.mxu1 %v7860_v25  ;;  %v7914_v25 = vld [vmem:[%s9928_s5 + $0x150] sm:$0xff]  }
 0x26a   : > { %4163 = vmatprep.subr.bf16.mxu1 %v7865_v26  ;;  %v7917_v26 = vld [vmem:[%s9928_s5 + $0x158] sm:$0xff]  }
 0x26d   : > { %4164 = vmatpush1.bf16.msra.mxu1 %v7863_v27  ;;  %v7920_v27 = vld [vmem:[%s9928_s5 + $0x160] sm:$0xff]  }
 0x26e   : > { %4165 = vmatprep.subr.bf16.mxu1 %v7868_v31  ;;  %v7923_v31 = vld [vmem:[%s9928_s5 + $0x168] sm:$0xff]  }
 0x271   : > { %4166 = vmatpush1.bf16.msra.mxu1 %v7866_v41  ;;  %v7926_v41 = vld [vmem:[%s9928_s5 + $0x170] sm:$0xff]  }
 0x272   : > { %4167 = vmatprep.subr.bf16.mxu1 %v7871_v5  ;;  %v7929_v5 = vld [vmem:[%s9928_s5 + $0x178] sm:$0xff]  }
 0x275   : > { %4168 = vmatpush1.bf16.msra.mxu1 %v7869_v32  ;;  %v3271_v32 = vrot.slane %v3266_v8, %v3016_v39 }
 0x276   : > { %6972 = vmatprep.subr.bf16.mxu1 %v7872_v35 }
 0x278   : > { %4170 = vmatmul.mubr.bf16.vlgmr.msra.gmra.mrb[4].mxu1 %v9146_v28 }
 0x279   : > { %6973 = vmatpush3.bf16.msra.mxu1 %v7873_v36  ;;  %4294 = vmatprep.mubr.bf16.mxu1 %v9148_v30  ;;  %v7879_v30 = vld [vmem:[%s9926_s3 + $0x350] ss:$12 sps:$4 sm:$0xff]  }
 0x27a   : > { %6974 = vmatprep.subr.bf16.mxu1 %v7874_v38 }
 0x27d   : > { %6975 = vmatpush3.bf16.msra.mxu1 %v7875_v42 }
 0x27e   : > { %6976 = vmatprep.subr.bf16.mxu1 %v7876_v43 }
 0x281   : > { %6977 = vmatpush3.bf16.msra.mxu1 %v7877_v44 }
 0x282   : > { %6978 = vmatprep.subr.bf16.mxu1 %v7878_v45 }
 0x285   : > { %6979 = vmatpush3.bf16.msra.mxu1 %v7879_v30 }
 0x286   : > { %6980 = vmatprep.subr.bf16.mxu1 %v7880_v22 }
 0x289   : > { %6981 = vmatpush3.bf16.msra.mxu1 %v7881_v11 }
 0x28a   : > { %6982 = vmatprep.subr.bf16.mxu1 %v7882_v2 }
 0x28d   : > { %6983 = vmatpush3.bf16.msra.mxu1 %v7883_v29 }
 0x28e   : > { %6984 = vmatprep.subr.bf16.mxu1 %v7884_v46 }
 0x291   : > { %6985 = vmatpush3.bf16.msra.mxu1 %v7885_v48 }
 0x292   : > { %6986 = vmatprep.subr.bf16.mxu1 %v7886_v49 }
 0x295   : > { %6987 = vmatpush3.bf16.msra.mxu1 %v7887_v50  ;;  %v4402_v50 = vld [vmem:[#allocation2 + $0x18] sm:$0x11] }
 0x296   : > { %7149 = vmatprep.subr.bf16.mxu1 %v8029_v9  ;;  %v9497_v52 = vcombine.high %v4402_v50, %v4402_v50  ;;  %v6645_v53 = vcombine.low %v4402_v50, %v4402_v50 }
 0x298   : > { %4295 = vmatmul.mubr.bf16.vlgmr.msra.gmra.mrb[8].mxu1 %v9146_v28  ;;  %v7893_v28 = vld [vmem:[%s9928_s5 + $0xd0] sm:$0xff]   ;;  %v4483_v55 = vshll.u32 %v6645_v53, 16 }
 0x299   : > { %6999 = vmatpush3.bf16.msra.mxu0 %v7893_v28  ;;  %7150 = vmatpush3.bf16.msra.mxu1 %v7908_v15 }
 0x29a   : > { %7000 = vmatprep.subr.bf16.mxu0 %v7894_v60  ;;  %7151 = vmatprep.subr.bf16.mxu1 %v8029_v9 }
 0x29b   : > { %7165 = vmatprep.mubr.msk.bf16.mxu1 %vm8030_vm5, %v8029_v9 }
 0x29d   : > { %7001 = vmatpush3.bf16.msra.mxu0 %v7895_v61  ;;  %7152 = vmatpush3.bf16.msra.mxu1 %v7911_v13  ;;  %v7913_v13 = vld [vmem:[%s9928_s5 + $0x10] sm:$0xff]  }
 0x29e   : > { %7002 = vmatprep.subr.bf16.mxu0 %v7896_v62  ;;  %7153 = vmatprep.subr.bf16.mxu1 %v8029_v9 }
 0x2a1   : > { %7003 = vmatpush3.bf16.msra.mxu0 %v7897_v63  ;;  %7154 = vmatpush3.bf16.msra.mxu1 %v7914_v25  ;;  %v4485_v63 = vrot.slane %v4483_v55, 1  ;;  %v7915_v25 = vld [vmem:[%s9928_s5 + $0x58] sm:$0xff]  }
 0x2a2   : > { %7004 = vmatprep.subr.bf16.mxu0 %v7898_v1  ;;  %7155 = vmatprep.subr.bf16.mxu1 %v8029_v9 }
 0x2a5   : > { %7005 = vmatpush3.bf16.msra.mxu0 %v7899_v3  ;;  %7156 = vmatpush3.bf16.msra.mxu1 %v7917_v26 }
 0x2a6   : > { %7006 = vmatprep.subr.bf16.mxu0 %v7900_v37  ;;  %7157 = vmatprep.subr.bf16.mxu1 %v8029_v9 }
 0x2a9   : > { %7007 = vmatpush3.bf16.msra.mxu0 %v7901_v4  ;;  %7158 = vmatpush3.bf16.msra.mxu1 %v7920_v27 }
 0x2aa   : > { %7008 = vmatprep.subr.bf16.mxu0 %v7902_v6  ;;  %7159 = vmatprep.subr.bf16.mxu1 %v8029_v9 }
 0x2ad   : > { %7009 = vmatpush3.bf16.msra.mxu0 %v7903_v47  ;;  %7160 = vmatpush3.bf16.msra.mxu1 %v7923_v31 }
 0x2ae   : > { %7025 = vmatprep.subr.bf16.mxu0 %v7905_v7  ;;  %7161 = vmatprep.subr.bf16.mxu1 %v8029_v9 }
 0x2b1   : > { %7162 = vmatpush3.bf16.msra.mxu1 %v7926_v41  ;;  %v7916_v41 = vld [vmem:[%s9928_s5 + $0x18] sm:$0xff]  }
 0x2b2   : > { %7163 = vmatprep.subr.bf16.mxu1 %v8029_v9 }
 0x2b5   : > { %7164 = vmatpush3.bf16.msra.mxu1 %v7929_v5 }
 0x2b6   : > { %7169 = vmatprep.subr.bf16.mxu1 %v8029_v9 }
 0x2cb   : > { %v6944_v54 = vpop.f32.mrb[8].mxu0 }
 0x2cc   : > { %v6945_v0 = vpop.f32.mrb[9].mxu0 }
 0x2cd   : > { %v6946_v56 = vadd.f32 %v6945_v0, %v6944_v54  ;;  %v6947_v57 = vpop.f32.mrb[10].mxu0  ;;  %v4495_v0 = vshll.u32 %v9497_v52, 16 }
 0x2ce   : > { %v6948_v58 = vpop.f32.mrb[11].mxu0 }
 0x2cf   : > { %v6949_v59 = vadd.f32 %v6948_v58, %v6947_v57  ;;  %v4215_v51 = vadd.f32 %v6946_v56, %v3279_v14  ;;  %v4497_v62 = vrot.slane %v4495_v0, 1 }
 0x2d1   : > { %v4218_v10 = vadd.f32 %v6949_v59, %v3279_v14  ;;  %v5030_v59 = vrot.slane %v6645_v53, 1  ;;  %v7907_v14 = vld [vmem:[%s9928_s5] sm:$0xff]  }
 0x2eb   : > { %v6966_v16 = vpop.f32.mrb[12].mxu0 }
 0x2ec   : > { %v6967_v19 = vpop.f32.mrb[13].mxu0 }
 0x2ed   : > { %v6968_v17 = vadd.f32 %v6967_v19, %v6966_v16  ;;  %v6969_v18 = vpop.f32.mrb[14].mxu0  ;;  %v7909_v19 = vld [vmem:[%s9928_s5 + $0x48] sm:$0xff]  }
 0x2ee   : > { %v6970_v12 = vpop.f32.mrb[15].mxu0 }
 0x2ef   : > { %v9454_v23 = vadd.f32 %v6968_v17, %v4215_v51  ;;  %v6971_v21 = vadd.f32 %v6970_v12, %v6969_v18  ;;  %v7910_v51 = vld [vmem:[%s9928_s5 + $0x8] sm:$0xff]   ;;  %v7912_v17 = vld [vmem:[%s9928_s5 + $0x50] sm:$0xff]  }
 0x2f1   : > { %v9456_v24 = vadd.f32 %v6971_v21, %v4218_v10 }
 0x34b   : > { %v4171_v34 = vpop.f32.mrb[4].mxu1 }
 0x34c   : > { %v7249_v35 = vadd.f32 %v4171_v34, %v3271_v32  ;;  %v4173_v36 = vpop.f32.mrb[5].mxu1 }
 0x34d   : > { %v7250_v38 = vadd.f32 %v4173_v36, %v3275_v33  ;;  %v4175_v42 = vpop.f32.mrb[6].mxu1 }
 0x34e   : > { %v4303_v43 = vmax.f32 %v7249_v35, 0.0  ;;  %v7251_v44 = vadd.f32 %v4175_v42, %v3271_v32  ;;  %v4177_v45 = vpop.f32.mrb[7].mxu1  ;;  %v7921_v42 = vld [vmem:[%s9928_s5 + $0x68] sm:$0xff]  }
 0x34f   : > { %v4304_v30 = vmax.f32 %v7250_v38, 0.0  ;;  %v7252_v22 = vadd.f32 %v4177_v45, %v3275_v33  ;;  %v7918_v33 = vld [vmem:[%s9928_s5 + $0x60] sm:$0xff]  }
 0x350   : > { %v4306_v11 = vmax.f32 %v7251_v44, 0.0  ;;  %v7922_v44 = vld [vmem:[%s9928_s5 + $0x28] sm:$0xff]  }
 0x351   : > { %v6924_v2 = vpack.c.bf16 %v4304_v30, %v4303_v43  ;;  %v4307_v29 = vmax.f32 %v7252_v22, 0.0  ;;  %v7924_v30 = vld [vmem:[%s9928_s5 + $0x70] sm:$0xff]   ;;  %v9558_v22 = vld [vmem:[#allocation2 + $0x20] ss:$0 sps:$4 sm:$0x33]  }
 0x352   : > { %v5375_v20 = vshll.u32 %v9558_v22, 16 }
 0x353   : > { %v4334_v46 = vrot.slane %v6924_v2, 6  ;;  %v6926_v39 = vpack.c.bf16 %v4307_v29, %v4306_v11  ;;  %v7925_v11 = vld [vmem:[%s9928_s5 + $0x30] sm:$0xff]   ;;  %v7927_v2 = vld [vmem:[%s9928_s5 + $0x78] sm:$0xff]   ;;  %v7933_v29 = vld [vmem:[#allocation2 + $0x20] ss:$0 sps:$4 sm:$0x11]  }
 0x354   : > { %v4507_v50 = vshll.u32 %v7933_v29, 16 }
 0x355   : > { %v4336_v40 = vrot.slane %v4334_v46, 4  ;;  %4346 = vst [vmem:[#allocation2] sm:$0xcc] %v4334_v46  ;;  %v4337_v48 = vrot.slane %v6926_v39, 6  ;;  %v5372_v39 = vshrl.u32 %v9558_v22, 16 }
 0x357   : > { %v9495_v49 = vsel %vm9489_vm8, %v4336_v40, %v4337_v48  ;;  %v7928_v40 = vld [vmem:[%s9928_s5 + $0x38] sm:$0xff]   ;;  %v7930_v48 = vld [vmem:[%s9928_s5 + $0x1c0] sm:$0xff]  }
 0x35c   : > { %v4350_v54 = vld [vmem:[#allocation2] sm:$0xff] }
 0x35d   : > { %v9500_v56 = vld [vmem:[#allocation2] sm:$0xee]  ;;  %v6643_v57 = vcombine.high %v4350_v54, %v9495_v49  ;;  %v9504_v28 = vcombine.low %v4350_v54, %v9495_v49 }
 0x35e   : > { %v9508_v58 = vcombine.low %v9500_v56, %v9495_v49  ;;  %v9568_v46 = vcombine.high %v9500_v56, %v9495_v49 }
 0x35f   : > { %v4490_v60 = vshll.u32 %v6643_v57, 16  ;;  %v4478_v61 = vshll.u32 %v9504_v28, 16  ;;  %v4488_v3 = vshrl.u32 %v6643_v57, 16  ;;  %v4476_v4 = vshrl.u32 %v9504_v28, 16 }
 0x360   : > { %v5029_v1 = vrot.slane %v9508_v58, 1 }
 0x361   : > { %v4492_v37 = vrot.slane %v4490_v60, 1  ;;  %v4480_v6 = vrot.slane %v4478_v61, 1  ;;  %v5033_v60 = vrot.slane %v9497_v52, 1  ;;  %v5374_v61 = vrot.slane %v5372_v39, 1 }
 0x362   : > { %v9514_v47 = vsel %vm5028_vm9, %v5029_v1, %v5030_v59  ;;  %v5032_v59 = vrot.slane %v9568_v46, 1 }
 0x363   : > { %v4493_v7 = vor.u32 %v4492_v37, %v4488_v3  ;;  %v4481_v8 = vor.u32 %v4480_v6, %v4476_v4  ;;  %v4509_v4 = vrot.slane %v4507_v50, 1  ;;  %v7935_v6 = vld [vmem:[%s9928_s5 + $0x1c8] sm:$0xff]   ;;  %v7956_v50 = vld [vmem:[%s9928_s5 + $0x280] sm:$0xff]  }
 0x365   : > { %v4498_v15 = vsel %vm4474_vm10, %v4493_v7, %v4497_v62  ;;  %v4486_v16 = vsel %vm4474_vm10, %v4481_v8, %v4485_v63  ;;  %v5377_v62 = vrot.slane %v5375_v20, 2  ;;  %v7931_v63 = vld [vmem:[%s9928_s5 + $0x180] sm:$0xff]  }
 0x366   : > { %4690 = vmatprep.mubr.bf16.mxu0 %v4498_v15 }
 0x367   : > { %4691 = vmatmul.mubr.bf16.vlgmr.msra.gmra.mrb[16].mxu0 %v4486_v16  ;;  %v5034_v16 = vsel %vm5028_vm9, %v5032_v59, %v5033_v60  ;;  %v7960_v59 = vld [vmem:[%s9928_s5 + $0x288] sm:$0xff]  }
 0x368   : > { %7026 = vmatpush3.bf16.msra.mxu0 %v7907_v14  ;;  %4919 = vmatprep.mubr.bf16.mxu0 %v6643_v57  ;;  %v5036_v57 = vrot.slane %v7933_v29, 1  ;;  %v7952_v29 = vld [vmem:[%s9928_s5 + $0xb0] sm:$0xff]  }
 0x369   : > { %7027 = vmatprep.subr.bf16.mxu0 %v7909_v19 }
 0x36b   : > { %v6988_v18 = vpop.f32.mrb[8].mxu1 }
 0x36c   : > { %v6989_v12 = vpop.f32.mrb[9].mxu1  ;;  %7028 = vmatpush3.bf16.msra.mxu0 %v7910_v51  ;;  %v5378_v51 = vor.u32 %v5377_v62, %v5374_v61  ;;  %v7959_v61 = vld [vmem:[%s9928_s5 + $0x200] sm:$0xff]   ;;  %v7961_v62 = vld [vmem:[%s9928_s5 + $0x248] sm:$0xff]  }
 0x36d   : > { %v6990_v10 = vadd.f32 %v6989_v12, %v6988_v18  ;;  %v6991_v21 = vpop.f32.mrb[10].mxu1  ;;  %7029 = vmatprep.subr.bf16.mxu0 %v7912_v17  ;;  %v7934_v18 = vld [vmem:[%s9928_s5 + $0x80] sm:$0xff]   ;;  %v7936_v12 = vld [vmem:[%s9928_s5 + $0x188] sm:$0xff]  }
 0x36e   : > { %v6992_v26 = vpop.f32.mrb[11].mxu1 }
 0x36f   : > { %v4297_v27 = vadd.f32 %v6990_v10, %v9454_v23  ;;  %v6993_v31 = vadd.f32 %v6992_v26, %v6991_v21  ;;  %v7919_v23 = vld [vmem:[%s9928_s5 + $0x20] sm:$0xff]   ;;  %v7939_v26 = vld [vmem:[%s9928_s5 + $0x190] sm:$0xff]  }
 0x370   : > { %7030 = vmatpush3.bf16.msra.mxu0 %v7913_v13 }
 0x371   : > { %v4305_v5 = vmax.f32 %v4297_v27, 0.0  ;;  %v4300_v32 = vadd.f32 %v6993_v31, %v9456_v24  ;;  %7031 = vmatprep.subr.bf16.mxu0 %v7915_v25  ;;  %v7937_v25 = vld [vmem:[%s9928_s5 + $0x88] sm:$0xff]   ;;  %v7941_v27 = vld [vmem:[%s9928_s5 + $0x1d8] sm:$0xff]   ;;  %v7940_v31 = vld [vmem:[%s9928_s5 + $0x90] sm:$0xff]  }
 0x373   : > { %v6925_v34 = vpack.c.bf16 %v4305_v5, %v4305_v5  ;;  %v4308_v35 = vmax.f32 %v4300_v32, 0.0  ;;  %v7944_v5 = vld [vmem:[%s9928_s5 + $0x1e0] sm:$0xff]   ;;  %v7943_v32 = vld [vmem:[%s9928_s5 + $0x98] sm:$0xff]  }
 0x374   : > { %7032 = vmatpush3.bf16.msra.mxu0 %v7916_v41  ;;  %v7942_v41 = vld [vmem:[%s9928_s5 + $0x198] sm:$0xff]  }
 0x375   : > { %v4335_v36 = vrot.slane %v6925_v34, 6  ;;  %v6927_v38 = vpack.c.bf16 %v4308_v35, %v4308_v35  ;;  %7033 = vmatprep.subr.bf16.mxu0 %v7918_v33  ;;  %v7945_v33 = vld [vmem:[%s9928_s5 + $0x1a0] sm:$0xff]   ;;  %v7947_v34 = vld [vmem:[%s9928_s5 + $0x1e8] sm:$0xff]   ;;  %v9644_v35 = vld [vmem:[#allocation2 + $0x18] sm:$0x33] }
 0x377   : > { %v4339_v24 = vrot.slane %v4335_v36, 4  ;;  %4347 = vst [vmem:[#allocation2 + $0x8] sm:$0xc] %v4335_v36  ;;  %v4340_v43 = vrot.slane %v6927_v38, 6  ;;  %v7948_v36 = vld [vmem:[%s9928_s5 + $0x1a8] sm:$0xff]   ;;  %v9654_v38 = vcombine.high %v9644_v35, %v9644_v35 }
 0x378   : > { %7034 = vmatpush3.bf16.msra.mxu0 %v7919_v23  ;;  %v7946_v23 = vld [vmem:[%s9928_s5 + $0xa0] sm:$0xff]  }
 0x379   : > { %v4341_v45 = vsel %vm9489_vm8, %v4339_v24, %v4340_v43  ;;  %7035 = vmatprep.subr.bf16.mxu0 %v7921_v42  ;;  %v7950_v42 = vld [vmem:[%s9928_s5 + $0x1f0] sm:$0xff]   ;;  %v7949_v24 = vld [vmem:[%s9928_s5 + $0xa8] sm:$0xff]  }
 0x37a   : > { %4349 = vst [vmem:[#allocation2 + $0x14] sm:$0xf] %v4341_v45  ;;  %v7951_v43 = vld [vmem:[%s9928_s5 + $0x1b0] sm:$0xff]   ;;  %v5350_v45 = vshll.u32 %v9568_v46, 16 }
 0x37c   : > { %7036 = vmatpush3.bf16.msra.mxu0 %v7922_v44  ;;  %v5347_v44 = vshrl.u32 %v9568_v46, 16  ;;  %v7954_v46 = vld [vmem:[%s9928_s5 + $0x1b8] sm:$0xff]   ;;  %v5352_v20 = vrot.slane %v5350_v45, 2 }
 0x37d   : > { %7037 = vmatprep.subr.bf16.mxu0 %v7924_v30  ;;  %v5355_v30 = vshrl.u32 %v9654_v38, 16 }
 0x37e   : > { %v4351_v53 = vld [vmem:[#allocation2 + $0x8] sm:$0xf]  ;;  %v5349_v39 = vrot.slane %v5347_v44, 1 }
 0x37f   : > { %v4970_v0 = vld [vmem:[#allocation2 + $0x8] sm:$0xe] }
 0x380   : > { %7038 = vmatpush3.bf16.msra.mxu0 %v7925_v11  ;;  %v5358_v11 = vshll.u32 %v9654_v38, 16  ;;  %v7986_v44 = vld [vmem:[%s9928_s5 + $0x348] sm:$0xff]  }
 0x381   : > { %7039 = vmatprep.subr.bf16.mxu0 %v7927_v2  ;;  %v9578_v54 = vld [vmem:[#allocation2 + $0x14] sm:$0xf]  ;;  %v7953_v2 = vld [vmem:[%s9928_s5 + $0x1f8] sm:$0xff]  }
 0x382   : > { %v9581_v55 = vcombine.low %v4351_v53, %v9578_v54  ;;  %v6746_v56 = vcombine.low %v4970_v0, %v9578_v54  ;;  %v7955_v53 = vld [vmem:[%s9928_s5 + $0xb8] sm:$0xff]   ;;  %v7957_v0 = vld [vmem:[%s9928_s5 + $0x240] sm:$0xff]  }
 0x384   : > { %7040 = vmatpush3.bf16.msra.mxu0 %v7928_v40  ;;  %v4502_v1 = vshll.u32 %v9581_v55, 16  ;;  %v5035_v3 = vrot.slane %v6746_v56, 1  ;;  %v5364_v37 = vshrl.u32 %v6746_v56, 16  ;;  %v5367_v7 = vshll.u32 %v6746_v56, 16 }
 0x385   : > { %7056 = vmatprep.subr.bf16.mxu0 %v7930_v48  ;;  %v4500_v52 = vshrl.u32 %v9581_v55, 16  ;;  %v5357_v40 = vrot.slane %v5355_v30, 1  ;;  %v5360_v48 = vrot.slane %v5358_v11, 2  ;;  %v5353_v56 = vor.u32 %v5352_v20, %v5349_v39  ;;  %v7985_v30 = vld [vmem:[%s9928_s5 + $0x2c0] sm:$0xff]   ;;  %v7989_v11 = vld [vmem:[%s9928_s5 + $0x350] sm:$0xff]   ;;  %v7993_v39 = vld [vmem:[%s9928_s5 + $0x318] sm:$0xff]  }
 0x386   : > { %v4504_v8 = vrot.slane %v4502_v1, 1  ;;  %v9595_v14 = vsel %vm5028_vm9, %v5035_v3, %v5036_v57  ;;  %v5366_v15 = vrot.slane %v5364_v37, 1  ;;  %v5369_v19 = vrot.slane %v5367_v7, 2  ;;  %v7964_v1 = vld [vmem:[%s9928_s5 + $0x250] sm:$0xff]   ;;  %v7966_v3 = vld [vmem:[%s9928_s5 + $0x298] sm:$0xff]   ;;  %v7970_v7 = vld [vmem:[%s9928_s5 + $0x260] sm:$0xff]  }
 0x387   : > { %4920 = vmatmul.mubr.bf16.vlgmr.msra.gmra.mrb[20].mxu0 %v9504_v28  ;;  %v7938_v28 = vld [vmem:[%s9928_s5 + $0x1d0] sm:$0xff]   ;;  %v5361_v57 = vor.u32 %v5360_v48, %v5357_v40  ;;  %v7967_v37 = vld [vmem:[%s9928_s5 + $0x258] sm:$0xff]   ;;  %v7995_v20 = vld [vmem:[%s9928_s5 + $0x360] sm:$0xff]  }
 0x388   : > { %7057 = vmatpush3.bf16.msra.mxu0 %v7931_v63  ;;  %5217 = vmatprep.mubr.bf16.mxu0 %v5034_v16  ;;  %v4505_v17 = vor.u32 %v4504_v8, %v4500_v52  ;;  %v5370_v13 = vor.u32 %v5369_v19, %v5366_v15  ;;  %v7963_v63 = vld [vmem:[%s9928_s5 + $0x290] sm:$0xff]   ;;  %v7972_v52 = vld [vmem:[%s9928_s5 + $0x2a8] sm:$0xff]   ;;  %v9741_v8 = vcombine.low %v9644_v35, %v9644_v35  ;;  %v7971_v15 = vld [vmem:[%s9928_s5 + $0x220] sm:$0xff]  }
 0x389   : > { %7058 = vmatprep.subr.bf16.mxu0 %v7935_v6  ;;  %v5362_v60 = vsel %vm5328_vm11, %v5353_v56, %v5361_v57  ;;  %v7968_v6 = vld [vmem:[%s9928_s5 + $0x218] sm:$0xff]   ;;  %v7973_v16 = vld [vmem:[%s9928_s5 + $0x268] sm:$0xff]   ;;  %v7975_v19 = vld [vmem:[%s9928_s5 + $0x2b0] sm:$0xff]  }
 0x38a   : > { %v4510_v10 = vsel %vm4474_vm10, %v4505_v17, %v4509_v4  ;;  %v9610_v21 = vsel %vm5328_vm11, %v5370_v13, %v5378_v51  ;;  %v7969_v4 = vld [vmem:[%s9928_s5 + $0x2a0] sm:$0xff]   ;;  %v5330_v51 = vshrl.u32 %v9508_v58, 16  ;;  %v5333_v17 = vshll.u32 %v9508_v58, 16  ;;  %v7976_v13 = vld [vmem:[%s9928_s5 + $0x270] sm:$0xff]   ;;  %v7978_v58 = vld [vmem:[%s9928_s5 + $0x2b8] sm:$0xff]  }
 0x38b   : > { %7166 = vmatmul.mubr.bf16.vlgmr.msra.gmra.mrb[12].mxu1 %v4510_v10  ;;  %v9767_v10 = vld [vmem:[#allocation2] sm:$0xcc]  ;;  %v7994_v40 = vld [vmem:[%s9928_s5 + $0x2d8] sm:$0xff]   ;;  %v8001_v56 = vld [vmem:[%s9928_s5 + $0x370] sm:$0xff]  }
 0x38c   : > { %7170 = vmatpush3.bf16.msra.mxu1 %v7934_v18  ;;  %7059 = vmatpush3.bf16.msra.mxu0 %v7936_v12  ;;  %v5338_v18 = vshrl.u32 %v9741_v8, 16  ;;  %v5341_v12 = vshll.u32 %v9741_v8, 16  ;;  %v7996_v48 = vld [vmem:[%s9928_s5 + $0x320] sm:$0xff]   ;;  %v8000_v57 = vld [vmem:[%s9928_s5 + $0x2e8] sm:$0xff]  }
 0x38d   : > { %7171 = vmatprep.subr.bf16.mxu1 %v8029_v9  ;;  %7060 = vmatprep.subr.bf16.mxu0 %v7938_v28  ;;  %v7974_v28 = vld [vmem:[%s9928_s5 + $0x228] sm:$0xff]  }
 0x38e   : > { %7185 = vmatprep.mubr.msk.bf16.mxu1 %vm8030_vm5, %v8029_v9 }
 0x390   : > { %7172 = vmatpush3.bf16.msra.mxu1 %v7937_v25  ;;  %7061 = vmatpush3.bf16.msra.mxu0 %v7939_v26  ;;  %v5332_v25 = vrot.slane %v5330_v51, 1  ;;  %v5335_v26 = vrot.slane %v5333_v17, 2  ;;  %v5678_v51 = vrot.slane %v9558_v22, 2 }
 0x391   : > { %7173 = vmatprep.subr.bf16.mxu1 %v8029_v9  ;;  %7062 = vmatprep.subr.bf16.mxu0 %v7941_v27  ;;  %v5340_v27 = vrot.slane %v5338_v18, 1 }
 0x394   : > { %7174 = vmatpush3.bf16.msra.mxu1 %v7940_v31  ;;  %7063 = vmatpush3.bf16.msra.mxu0 %v7942_v41  ;;  %v5343_v31 = vrot.slane %v5341_v12, 2  ;;  %v7977_v41 = vld [vmem:[%s9928_s5 + $0x230] sm:$0xff]  }
 0x395   : > { %7175 = vmatprep.subr.bf16.mxu1 %v8029_v9  ;;  %7064 = vmatprep.subr.bf16.mxu0 %v7944_v5  ;;  %v7979_v5 = vld [vmem:[%s9928_s5 + $0x278] sm:$0xff]  }
 0x396   : > { %v5344_v35 = vor.u32 %v5343_v31, %v5340_v27 }
 0x398   : > { %7176 = vmatpush3.bf16.msra.mxu1 %v7943_v32  ;;  %7065 = vmatpush3.bf16.msra.mxu0 %v7945_v33  ;;  %v6895_v32 = vcombine.high %v9767_v10, %v9495_v49  ;;  %v7982_v33 = vld [vmem:[%s9928_s5 + $0x340] sm:$0xff]  }
 0x399   : > { %7177 = vmatprep.subr.bf16.mxu1 %v8029_v9  ;;  %7066 = vmatprep.subr.bf16.mxu0 %v7947_v34  ;;  %v5336_v34 = vor.u32 %v5335_v26, %v5332_v25 }
 0x39c   : > { %7178 = vmatpush3.bf16.msra.mxu1 %v7946_v23  ;;  %7067 = vmatpush3.bf16.msra.mxu0 %v7948_v36  ;;  %v7980_v23 = vld [vmem:[%s9928_s5 + $0x238] sm:$0xff]   ;;  %v7984_v36 = vld [vmem:[%s9928_s5 + $0x300] sm:$0xff]  }
 0x39d   : > { %7179 = vmatprep.subr.bf16.mxu1 %v8029_v9  ;;  %7068 = vmatprep.subr.bf16.mxu0 %v7950_v42  ;;  %v5674_v42 = vrot.slane %v6895_v32, 2 }
 0x3a0   : > { %7180 = vmatpush3.bf16.msra.mxu1 %v7949_v24  ;;  %7069 = vmatpush3.bf16.msra.mxu0 %v7951_v43  ;;  %v5675_v24 = vrot.slane %v9654_v38, 2  ;;  %v5345_v43 = vsel %vm5328_vm11, %v5336_v34, %v5344_v35  ;;  %v7987_v38 = vld [vmem:[%s9928_s5 + $0x308] sm:$0xff]  }
 0x3a1   : > { %7181 = vmatprep.subr.bf16.mxu1 %v8029_v9  ;;  %7070 = vmatprep.subr.bf16.mxu0 %v7953_v2  ;;  %v7988_v2 = vld [vmem:[%s9928_s5 + $0x2c8] sm:$0xff]  }
 0x3a2   : > { %v5676_v45 = vsel %vm462_vm0, %v5674_v42, %v5675_v24 }
 0x3a4   : > { %7182 = vmatpush3.bf16.msra.mxu1 %v7952_v29  ;;  %7071 = vmatpush3.bf16.msra.mxu0 %v7954_v46  ;;  %v7990_v29 = vld [vmem:[%s9928_s5 + $0x310] sm:$0xff]   ;;  %v7992_v46 = vld [vmem:[%s9928_s5 + $0x358] sm:$0xff]  }
 0x3a5   : > { %7183 = vmatprep.subr.bf16.mxu1 %v8029_v9  ;;  %7087 = vmatprep.subr.bf16.mxu0 %v7956_v50  ;;  %v7998_v50 = vld [vmem:[%s9928_s5 + $0x368] sm:$0xff]  }
 0x3a7   : > { %5218 = vmatmul.mubr.bf16.vlgmr.msra.gmra.mrb[24].mxu0 %v9514_v47  ;;  %v7962_v47 = vld [vmem:[%s9928_s5 + $0x208] sm:$0xff]  }
 0x3a8   : > { %7184 = vmatpush3.bf16.msra.mxu1 %v7955_v53  ;;  %7088 = vmatpush3.bf16.msra.mxu0 %v7957_v0  ;;  %v7997_v53 = vld [vmem:[%s9928_s5 + $0x2e0] sm:$0xff]   ;;  %v7999_v0 = vld [vmem:[%s9928_s5 + $0x328] sm:$0xff]  }
 0x3a9   : > { %7189 = vmatprep.subr.bf16.mxu1 %v8029_v9  ;;  %5559 = vmatprep.mubr.bf16.mxu0 %v5362_v60  ;;  %v8004_v60 = vld [vmem:[%s9928_s5 + $0x378] sm:$0xff]  }
 0x3aa   : > { %7089 = vmatprep.subr.bf16.mxu0 %v7960_v59  ;;  %v8002_v59 = vld [vmem:[%s9928_s5 + $0x330] sm:$0xff]  }
 0x3ab   : > { %7186 = vmatmul.mubr.bf16.vlgmr.msra.gmra.mrb[16].mxu1 %v9581_v55  ;;  %v7965_v55 = vld [vmem:[%s9928_s5 + $0x210] sm:$0xff]  }
 0x3ac   : > { %7190 = vmatpush3.bf16.msra.mxu1 %v7959_v61  ;;  %7090 = vmatpush3.bf16.msra.mxu0 %v7961_v62  ;;  %v6894_v61 = vcombine.low %v9767_v10, %v9495_v49  ;;  %v8003_v62 = vld [vmem:[%s9928_s5 + $0x2f0] sm:$0xff]   ;;  %v8006_v49 = vld [vmem:[%s9928_s5 + $0x2f8] sm:$0xff]  }
 0x3ad   : > { %7191 = vmatprep.subr.bf16.mxu1 %v8029_v9  ;;  %7091 = vmatprep.subr.bf16.mxu0 %v7963_v63  ;;  %v8005_v63 = vld [vmem:[%s9928_s5 + $0x338] sm:$0xff]  }
 0x3ae   : > { %7205 = vmatprep.mubr.msk.bf16.mxu1 %vm8030_vm5, %v8029_v9 }
 0x3b0   : > { %7192 = vmatpush3.bf16.msra.mxu1 %v7962_v47  ;;  %7092 = vmatpush3.bf16.msra.mxu0 %v7964_v1  ;;  %v5671_v47 = vrot.slane %v6894_v61, 2  ;;  %v5672_v1 = vrot.slane %v9741_v8, 2  ;;  %v5612_v8 = vld [vmem:[#allocation2 + $0x8] sm:$0xc] }
 0x3b1   : > { %7193 = vmatprep.subr.bf16.mxu1 %v8029_v9  ;;  %7093 = vmatprep.subr.bf16.mxu0 %v7966_v3 }
 0x3b2   : > { %v5673_v3 = vsel %vm462_vm0, %v5671_v47, %v5672_v1 }
 0x3b4   : > { %7194 = vmatpush3.bf16.msra.mxu1 %v7965_v55  ;;  %7094 = vmatpush3.bf16.msra.mxu0 %v7967_v37  ;;  %v8008_v55 = vld [vmem:[%s9928_s5 + $0x380] sm:$0xff]   ;;  %v8009_v37 = vld [vmem:[%s9928_s5 + $0x388] sm:$0xff]  }
 0x3b5   : > { %7195 = vmatprep.subr.bf16.mxu1 %v8029_v9  ;;  %7095 = vmatprep.subr.bf16.mxu0 %v7969_v4  ;;  %v8010_v4 = vld [vmem:[%s9928_s5 + $0x390] sm:$0xff]  }
 0x3b8   : > { %7196 = vmatpush3.bf16.msra.mxu1 %v7968_v6  ;;  %7096 = vmatpush3.bf16.msra.mxu0 %v7970_v7  ;;  %v8012_v6 = vld [vmem:[%s9928_s5 + $0x3a0] sm:$0xff]   ;;  %v8013_v7 = vld [vmem:[%s9928_s5 + $0x3a8] sm:$0xff]  }
 0x3b9   : > { %7197 = vmatprep.subr.bf16.mxu1 %v8029_v9  ;;  %7097 = vmatprep.subr.bf16.mxu0 %v7972_v52  ;;  %v8014_v52 = vld [vmem:[%s9928_s5 + $0x3b0] sm:$0xff]  }
 0x3bc   : > { %7198 = vmatpush3.bf16.msra.mxu1 %v7971_v15  ;;  %7098 = vmatpush3.bf16.msra.mxu0 %v7973_v16  ;;  %v6896_v15 = vcombine.low %v5612_v8, %v9578_v54  ;;  %v8015_v16 = vld [vmem:[%s9928_s5 + $0x3b8] sm:$0xff]  }
 0x3bd   : > { %7199 = vmatprep.subr.bf16.mxu1 %v8029_v9  ;;  %7099 = vmatprep.subr.bf16.mxu0 %v7975_v19 }
 0x3be   : > { %v5677_v19 = vrot.slane %v6896_v15, 2 }
 0x3c0   : > { %7200 = vmatpush3.bf16.msra.mxu1 %v7974_v28  ;;  %7100 = vmatpush3.bf16.msra.mxu0 %v7976_v13  ;;  %v5679_v17 = vsel %vm462_vm0, %v5677_v19, %v5678_v51 }
 0x3c1   : > { %7201 = vmatprep.subr.bf16.mxu1 %v8029_v9  ;;  %7101 = vmatprep.subr.bf16.mxu0 %v7978_v58 }
 0x3c4   : > { %7202 = vmatpush3.bf16.msra.mxu1 %v7977_v41  ;;  %7102 = vmatpush3.bf16.msra.mxu0 %v7979_v5 }
 0x3c5   : > { %7203 = vmatprep.subr.bf16.mxu1 %v8029_v9  ;;  %7118 = vmatprep.subr.bf16.mxu0 %v7982_v33 }
 0x3c7   : > { %5560 = vmatmul.mubr.bf16.vlgmr.msra.gmra.mrb[28].mxu0 %v5345_v43 }
 0x3c8   : > { %7204 = vmatpush3.bf16.msra.mxu1 %v7980_v23  ;;  %7119 = vmatpush3.bf16.msra.mxu0 %v7984_v36 }
 0x3c9   : > { %7209 = vmatprep.subr.bf16.mxu1 %v8029_v9  ;;  %5859 = vmatprep.mubr.bf16.mxu0 %v5676_v45 }
 0x3ca   : > { %7120 = vmatprep.subr.bf16.mxu0 %v7986_v44 }
 0x3cb   : > { %7206 = vmatmul.mubr.bf16.vlgmr.msra.gmra.mrb[20].mxu1 %v9595_v14  ;;  %v7991_v14 = vld [vmem:[%s9928_s5 + $0x2d0] sm:$0xff]  }
 0x3cc   : > { %7210 = vmatpush3.bf16.msra.mxu1 %v7985_v30  ;;  %7121 = vmatpush3.bf16.msra.mxu0 %v7987_v38 }
 0x3cd   : > { %7211 = vmatprep.subr.bf16.mxu1 %v8029_v9  ;;  %7122 = vmatprep.subr.bf16.mxu0 %v7989_v11 }
 0x3ce   : > { %7225 = vmatprep.mubr.msk.bf16.mxu1 %vm8030_vm5, %v8029_v9 }
 0x3d0   : > { %7212 = vmatpush3.bf16.msra.mxu1 %v7988_v2  ;;  %7123 = vmatpush3.bf16.msra.mxu0 %v7990_v29 }
 0x3d1   : > { %7213 = vmatprep.subr.bf16.mxu1 %v8029_v9  ;;  %7124 = vmatprep.subr.bf16.mxu0 %v7992_v46 }
 0x3d4   : > { %7214 = vmatpush3.bf16.msra.mxu1 %v7991_v14  ;;  %7125 = vmatpush3.bf16.msra.mxu0 %v7993_v39 }
 0x3d5   : > { %7215 = vmatprep.subr.bf16.mxu1 %v8029_v9  ;;  %7126 = vmatprep.subr.bf16.mxu0 %v7995_v20 }
 0x3d8   : > { %7216 = vmatpush3.bf16.msra.mxu1 %v7994_v40  ;;  %7127 = vmatpush3.bf16.msra.mxu0 %v7996_v48 }
 0x3d9   : > { %7217 = vmatprep.subr.bf16.mxu1 %v8029_v9  ;;  %7128 = vmatprep.subr.bf16.mxu0 %v7998_v50 }
 0x3dc   : > { %7218 = vmatpush3.bf16.msra.mxu1 %v7997_v53  ;;  %7129 = vmatpush3.bf16.msra.mxu0 %v7999_v0 }
 0x3dd   : > { %7219 = vmatprep.subr.bf16.mxu1 %v8029_v9  ;;  %7130 = vmatprep.subr.bf16.mxu0 %v8001_v56 }
 0x3e0   : > { %7220 = vmatpush3.bf16.msra.mxu1 %v8000_v57  ;;  %7131 = vmatpush3.bf16.msra.mxu0 %v8002_v59 }
 0x3e1   : > { %7221 = vmatprep.subr.bf16.mxu1 %v8029_v9  ;;  %7132 = vmatprep.subr.bf16.mxu0 %v8004_v60 }
 0x3e4   : > { %7222 = vmatpush3.bf16.msra.mxu1 %v8003_v62  ;;  %7133 = vmatpush3.bf16.msra.mxu0 %v8005_v63 }
 0x3e5   : > { %7223 = vmatprep.subr.bf16.mxu1 %v8029_v9 }
 0x3e7   : > { %5860 = vmatmul.mubr.bf16.vlgmr.msra.gmra.mrb[32].mxu0 %v5673_v3 }
 0x3e8   : > { %7224 = vmatpush3.bf16.msra.mxu1 %v8006_v49 }
 0x3e9   : > { %7229 = vmatprep.subr.bf16.mxu1 %v8029_v9 }
 0x3eb   : > { %7226 = vmatmul.mubr.bf16.vlgmr.msra.gmra.mrb[24].mxu1 %v9610_v21  ;;  %v8011_v21 = vld [vmem:[%s9928_s5 + $0x398] sm:$0xff]  }
 0x3ec   : > { %7230 = vmatpush3.bf16.msra.mxu1 %v8008_v55  ;;  %7245 = vmatprep.mubr.msk.bf16.mxu1 %vm8030_vm5, %v8029_v9 }
 0x3ed   : > { %7231 = vmatprep.subr.bf16.mxu1 %v8029_v9 }
 0x3f0   : > { %7232 = vmatpush3.bf16.msra.mxu1 %v8009_v37 }
 0x3f1   : > { %7233 = vmatprep.subr.bf16.mxu1 %v8029_v9 }
 0x3f4   : > { %7234 = vmatpush3.bf16.msra.mxu1 %v8010_v4 }
 0x3f5   : > { %7235 = vmatprep.subr.bf16.mxu1 %v8029_v9 }
 0x3f8   : > { %7236 = vmatpush3.bf16.msra.mxu1 %v8011_v21 }
 0x3f9   : > { %7237 = vmatprep.subr.bf16.mxu1 %v8029_v9 }
 0x3fc   : > { %7238 = vmatpush3.bf16.msra.mxu1 %v8012_v6 }
 0x3fd   : > { %7239 = vmatprep.subr.bf16.mxu1 %v8029_v9 }
 0x400   : > { %7240 = vmatpush3.bf16.msra.mxu1 %v8013_v7 }
 0x401   : > { %7241 = vmatprep.subr.bf16.mxu1 %v8029_v9 }
 0x404   : > { %7242 = vmatpush3.bf16.msra.mxu1 %v8014_v52 }
 0x405   : > { %7243 = vmatprep.subr.bf16.mxu1 %v8029_v9 }
 0x408   : > { %7244 = vmatpush3.bf16.msra.mxu1 %v8015_v16 }
 0x40b   : > { %7246 = vmatmul.mubr.bf16.vlgmr.msra.gmra.mrb[28].mxu1 %v5679_v17  ;;  %v5911_v17 = vld [vmem:[%s9929_s6] sm:$0xff] }
 0x43a   : > { %v7010_v18 = vpop.f32.mrb[16].mxu0 }
 0x43b   : > { %v7011_v12 = vpop.f32.mrb[17].mxu0 }
 0x43c   : > { %v7012_v28 = vadd.f32 %v7011_v12, %v7010_v18  ;;  %v7013_v13 = vpop.f32.mrb[18].mxu0 }
 0x43d   : > { %v7014_v58 = vpop.f32.mrb[19].mxu0 }
 0x43e   : > { %v7015_v54 = vadd.f32 %v7014_v58, %v7013_v13  ;;  %v5912_v58 = vld [vmem:[%s9929_s6 + $0x8] sm:$0xff] }
 0x45a   : > { %v7041_v10 = vpop.f32.mrb[20].mxu0 }
 0x45b   : > { %v7042_v25 = vpop.f32.mrb[21].mxu0 }
 0x45c   : > { %v7043_v26 = vadd.f32 %v7042_v25, %v7041_v10  ;;  %v7044_v27 = vpop.f32.mrb[22].mxu0 }
 0x45d   : > { %v7045_v31 = vpop.f32.mrb[23].mxu0 }
 0x45e   : > { %v4733_v41 = vpop.f32.mrb[12].mxu1  ;;  %v7046_v9 = vadd.f32 %v7045_v31, %v7044_v27 }
 0x45f   : > { %v4734_v5 = vadd.f32 %v7012_v28, %v4733_v41  ;;  %v7167_v32 = vpop.f32.mrb[13].mxu1 }
 0x460   : > { %v4736_v22 = vpop.f32.mrb[14].mxu1 }
 0x461   : > { %v4737_v33 = vadd.f32 %v7015_v54, %v4736_v22  ;;  %v7168_v34 = vpop.f32.mrb[15].mxu1  ;;  %v4922_v35 = vadd.f32 %v7043_v26, %v4734_v5 }
 0x463   : > { %v4925_v23 = vadd.f32 %v7046_v9, %v4737_v33 }
 0x47a   : > { %v7072_v36 = vpop.f32.mrb[24].mxu0 }
 0x47b   : > { %v7073_v42 = vpop.f32.mrb[25].mxu0 }
 0x47c   : > { %v7074_v24 = vadd.f32 %v7073_v42, %v7072_v36  ;;  %v7075_v43 = vpop.f32.mrb[26].mxu0 }
 0x47d   : > { %v7076_v44 = vpop.f32.mrb[27].mxu0 }
 0x47e   : > { %v4962_v45 = vpop.f32.mrb[16].mxu1  ;;  %v7077_v30 = vadd.f32 %v7076_v44, %v7075_v43 }
 0x47f   : > { %v4963_v38 = vadd.f32 %v4962_v45, %v4922_v35  ;;  %v7187_v11 = vpop.f32.mrb[17].mxu1 }
 0x480   : > { %v4965_v2 = vpop.f32.mrb[18].mxu1 }
 0x481   : > { %v4966_v29 = vadd.f32 %v4965_v2, %v4925_v23  ;;  %v7188_v46 = vpop.f32.mrb[19].mxu1 }
 0x49a   : > { %v7103_v14 = vpop.f32.mrb[28].mxu0 }
 0x49b   : > { %v7104_v39 = vpop.f32.mrb[29].mxu0 }
 0x49c   : > { %v7105_v20 = vadd.f32 %v7104_v39, %v7103_v14  ;;  %v7106_v40 = vpop.f32.mrb[30].mxu0 }
 0x49d   : > { %v7107_v48 = vpop.f32.mrb[31].mxu0 }
 0x49e   : > { %v5260_v50 = vpop.f32.mrb[20].mxu1  ;;  %v7108_v53 = vadd.f32 %v7107_v48, %v7106_v40 }
 0x49f   : > { %v5261_v0 = vadd.f32 %v7074_v24, %v5260_v50  ;;  %v7207_v56 = vpop.f32.mrb[21].mxu1 }
 0x4a0   : > { %v5263_v57 = vpop.f32.mrb[22].mxu1 }
 0x4a1   : > { %v5267_v59 = vadd.f32 %v5261_v0, %v4963_v38  ;;  %v5264_v60 = vadd.f32 %v7077_v30, %v5263_v57  ;;  %v7208_v61 = vpop.f32.mrb[23].mxu1 }
 0x4a3   : > { %v5268_v62 = vadd.f32 %v5264_v60, %v4966_v29 }
 0x4ba   : > { %v7134_v63 = vpop.f32.mrb[32].mxu0 }
 0x4bb   : > { %v7135_v47 = vpop.f32.mrb[33].mxu0 }
 0x4bc   : > { %v7136_v1 = vadd.f32 %v7135_v47, %v7134_v63  ;;  %v7137_v49 = vpop.f32.mrb[34].mxu0 }
 0x4bd   : > { %v7138_v3 = vpop.f32.mrb[35].mxu0 }
 0x4be   : > { %v5602_v55 = vpop.f32.mrb[24].mxu1  ;;  %v7139_v37 = vadd.f32 %v7138_v3, %v7137_v49 }
 0x4bf   : > { %v5603_v4 = vadd.f32 %v7105_v20, %v5602_v55  ;;  %v7227_v21 = vpop.f32.mrb[25].mxu1 }
 0x4c0   : > { %v5605_v6 = vpop.f32.mrb[26].mxu1 }
 0x4c1   : > { %v5609_v7 = vadd.f32 %v5603_v4, %v5267_v59  ;;  %v5606_v52 = vadd.f32 %v7108_v53, %v5605_v6  ;;  %v7228_v8 = vpop.f32.mrb[27].mxu1 }
 0x4c3   : > { %v5610_v15 = vadd.f32 %v5606_v52, %v5268_v62 }
 0x4de   : > { %v5902_v16 = vpop.f32.mrb[28].mxu1 }
 0x4df   : > { %v5903_v19 = vadd.f32 %v7136_v1, %v5902_v16  ;;  %v7247_v51 = vpop.f32.mrb[29].mxu1 }
 0x4e0   : > { %v5905_v18 = vpop.f32.mrb[30].mxu1 }
 0x4e1   : > { %v5909_v12 = vadd.f32 %v5903_v19, %v5609_v7  ;;  %v5906_v28 = vadd.f32 %v7139_v37, %v5905_v18  ;;  %v7248_v13 = vpop.f32.mrb[31].mxu1 }
 0x4e3   : > { %v5913_v54 = vadd.f32 %v5911_v17, %v5909_v12  ;;  %v5910_v10 = vadd.f32 %v5906_v28, %v5610_v15 }
 0x4e5   : > { %5916 = vst.msk [vmem:[%s278_s27] sm:$0xff] %vm5915_vm12, %v5913_v54  ;;  %v5914_v25 = vadd.f32 %v5912_v58, %v5910_v10 }
 0x4e7   : > { %5917 = vst.msk [vmem:[%s278_s27 + $0x8] sm:$0xff] %vm5915_vm12, %v5914_v25 }
 0x4e8 PF: > { %s17_s24 = sadd.s32 1, %s8026_s24  }
 0x4e9   : > { %p14_p4 = scmp.ge.s32.totalorder %s17_s24, 4  }
 0x4eb   :  { %16 = sbr.rel (!%p14_p4) target bundleno = 1 (0x1), region = 90 }

</bundles_post_ra>
